<compile_context>
chip_gen: v6e
topology: v6e:2x2x1
jax: 0.10.0
libtpu: 0.0.40
codegen_flags: <defaults>
</compile_context>

<pallas_src>
import functools
import math

import jax
import jax.numpy as jnp
from jax.experimental import pallas as pl
from jax.experimental.pallas import tpu as pltpu

NEG_INF = -1e30
LN_EPS = 1e-5


# ------------------------------ in-kernel helpers ------------------------------ #

def _layernorm(x, g, b, eps):
    """LayerNorm over last axis. x:(R,D) f32, g/b:(1,D) f32."""
    mean = jnp.mean(x, axis=-1, keepdims=True)
    c = x - mean
    var = jnp.mean(c * c, axis=-1, keepdims=True)
    return c * jax.lax.rsqrt(var + eps) * g + b


def _mha(q, k, v, bias_fn, wo, bo, *, nhead, bt, lq, lk):
    """Multi-head attention on packed rows.

    q:(bt*lq,D) f32 (already projected, 1/sqrt(Dh) folded into the Q weights),
    k/v:(bt*lk,D) f32.  bias_fn(b) -> additive bias broadcastable to (lq,lk).
    Per-head outputs are lane-concatenated and pushed through ONE full-depth Wo
    matmul, so the MXU sees contraction depth D instead of Dh.
    """
    d = wo.shape[0]
    dh = d // nhead
    rows = []
    for b in range(bt):                                    # static unroll over batch block
        qb = q[b * lq:(b + 1) * lq]
        kb = k[b * lk:(b + 1) * lk]
        vb = v[b * lk:(b + 1) * lk]
        bias = bias_fn(b)
        ohs = []
        for h in range(nhead):                             # static unroll over heads
            sl = slice(h * dh, (h + 1) * dh)
            s = jax.lax.dot_general(
                qb[:, sl].astype(jnp.bfloat16), kb[:, sl].astype(jnp.bfloat16),
                (((1,), (1,)), ((), ())),
                preferred_element_type=jnp.float32) + bias
            m = jnp.max(s, axis=-1, keepdims=True)
            p = jnp.exp(s - m)
            p = p * pl.reciprocal(jnp.sum(p, axis=-1, keepdims=True), approx=True)
            ohs.append(jnp.dot(p.astype(jnp.bfloat16), vb[:, sl].astype(jnp.bfloat16),
                               preferred_element_type=jnp.float32))
        rows.append(jnp.concatenate(ohs, axis=-1))         # (lq, D) head concat (lanes)
    o = jnp.concatenate(rows, axis=0)                      # (bt*lq, D)
    return jnp.dot(o.astype(jnp.bfloat16), wo,
                   preferred_element_type=jnp.float32) + bo


# ------------------------------ fused stack kernels ------------------------------ #

def _enc_stack_kernel(x_ref, bias_ref,
                      wqkv_ref, bqkv_ref, wo_ref, bo_ref,
                      ln1g_ref, ln1b_ref, w1_ref, b1_ref, w2_ref, b2_ref,
                      ln2g_ref, ln2b_ref,
                      o_ref, act_ref, *, nhead, eps):
    l = pl.program_id(1)
    bt, L, D = act_ref.shape

    @pl.when(l == 0)
    def _():                                               # load residual stream once
        act_ref[...] = x_ref[...].astype(jnp.float32)

    x = act_ref[...].reshape(bt * L, D)                    # f32 residual stream
    bias = bias_ref[...]                                   # (bt, 1, L) key-padding bias

    # fused QKV projection (one D x 3D bf16 matmul over all bt*L rows)
    qkv = jnp.dot(x.astype(jnp.bfloat16), wqkv_ref[0],
                  preferred_element_type=jnp.float32) + bqkv_ref[0]
    attn = _mha(qkv[:, :D], qkv[:, D:2 * D], qkv[:, 2 * D:],
                lambda b: bias[b], wo_ref[0], bo_ref[0],
                nhead=nhead, bt=bt, lq=L, lk=L)
    y = _layernorm(x + attn, ln1g_ref[0], ln1b_ref[0], eps)

    # FFN  TODO(synk): split d_ff over a grid axis (f32 accumulator) for huge d_ff on v7x.
    h = jnp.maximum(jnp.dot(y.astype(jnp.bfloat16), w1_ref[0],
                            preferred_element_type=jnp.float32) + b1_ref[0], 0.0)
    f = jnp.dot(h.astype(jnp.bfloat16), w2_ref[0],
                preferred_element_type=jnp.float32) + b2_ref[0]
    y = _layernorm(y + f, ln2g_ref[0], ln2b_ref[0], eps)

    act_ref[...] = y.reshape(bt, L, D)

    @pl.when(l == pl.num_programs(1) - 1)
    def _():
        o_ref[...] = y.reshape(bt, L, D).astype(o_ref.dtype)


def _dec_stack_kernel(y_ref, mem_ref, tbias_ref, sbias_ref,
                      wqkv_ref, bqkv_ref, wo_ref, bo_ref,
                      ca_wq_ref, ca_bq_ref, ca_wkv_ref, ca_bkv_ref,
                      ca_wo_ref, ca_bo_ref,
                      ln1g_ref, ln1b_ref, ln2g_ref, ln2b_ref, ln3g_ref, ln3b_ref,
                      w1_ref, b1_ref, w2_ref, b2_ref,
                      o_ref, act_ref, *, nhead, eps):
    l = pl.program_id(1)
    bt, Lt, D = act_ref.shape
    Ls = mem_ref.shape[1]

    @pl.when(l == 0)
    def _():
        act_ref[...] = y_ref[...].astype(jnp.float32)

    y = act_ref[...].reshape(bt * Lt, D)                   # f32 residual stream
    mem = mem_ref[...].reshape(bt * Ls, D).astype(jnp.bfloat16)
    tbias = tbias_ref[...]                                 # (bt, 1, Lt) tgt key-padding
    sbias = sbias_ref[...]                                 # (bt, 1, Ls) src key-padding

    # causal mask built in-kernel on the VPU (no (B,Lt,Lt) HBM stream)
    row = jax.lax.broadcasted_iota(jnp.int32, (Lt, Lt), 0)
    col = jax.lax.broadcasted_iota(jnp.int32, (Lt, Lt), 1)
    causal = jnp.where(col > row, NEG_INF, 0.0).astype(jnp.float32)

    # self-attention (fused QKV)
    qkv = jnp.dot(y.astype(jnp.bfloat16), wqkv_ref[0],
                  preferred_element_type=jnp.float32) + bqkv_ref[0]
    sa = _mha(qkv[:, :D], qkv[:, D:2 * D], qkv[:, 2 * D:],
              lambda b: causal + tbias[b], wo_ref[0], bo_ref[0],
              nhead=nhead, bt=bt, lq=Lt, lk=Lt)
    y = _layernorm(y + sa, ln1g_ref[0], ln1b_ref[0], eps)

    # cross-attention: Q from y, fused KV from memory (memory resident in VMEM)
    q = jnp.dot(y.astype(jnp.bfloat16), ca_wq_ref[0],
                preferred_element_type=jnp.float32) + ca_bq_ref[0]
    kv = jnp.dot(mem, ca_wkv_ref[0],
                 preferred_element_type=jnp.float32) + ca_bkv_ref[0]
    ca = _mha(q, kv[:, :D], kv[:, D:], lambda b: sbias[b],
              ca_wo_ref[0], ca_bo_ref[0], nhead=nhead, bt=bt, lq=Lt, lk=Ls)
    y = _layernorm(y + ca, ln2g_ref[0], ln2b_ref[0], eps)

    # FFN
    h = jnp.maximum(jnp.dot(y.astype(jnp.bfloat16), w1_ref[0],
                            preferred_element_type=jnp.float32) + b1_ref[0], 0.0)
    f = jnp.dot(h.astype(jnp.bfloat16), w2_ref[0],
                preferred_element_type=jnp.float32) + b2_ref[0]
    y = _layernorm(y + f, ln3g_ref[0], ln3b_ref[0], eps)

    act_ref[...] = y.reshape(bt, Lt, D)

    @pl.when(l == pl.num_programs(1) - 1)
    def _():
        o_ref[...] = y.reshape(bt, Lt, D).astype(o_ref.dtype)


def _latent_kernel(h_ref, eps_ref, wmu_ref, bmu_ref, wlv_ref, blv_ref,
                   wld_ref, bld_ref, mu_ref, lv_ref, lat_ref):
    h = h_ref[...]                                              # (B, D) bf16
    mu = jnp.dot(h, wmu_ref[...], preferred_element_type=jnp.float32) + bmu_ref[...]
    lv = jnp.dot(h, wlv_ref[...], preferred_element_type=jnp.float32) + blv_ref[...]
    z = mu + eps_ref[...] * jnp.exp(0.5 * lv)                   # f32 reparameterize
    lat = jnp.dot(z.astype(jnp.bfloat16), wld_ref[...],
                  preferred_element_type=jnp.float32) + bld_ref[...]
    mu_ref[...] = mu.astype(mu_ref.dtype)
    lv_ref[...] = lv.astype(lv_ref.dtype)
    lat_ref[...] = lat.astype(lat_ref.dtype)


def _linear_kernel(x_ref, w_ref, b_ref, o_ref, *, relu):
    y = jnp.dot(x_ref[...], w_ref[...],
                preferred_element_type=jnp.float32) + b_ref[...]
    if relu:
        y = jnp.maximum(y, 0.0)
    o_ref[...] = y.astype(o_ref.dtype)


# ------------------------------ pallas_call wrappers ------------------------------ #

def _block_bytes(shape, dtype):
    n = 1
    for s in shape:
        n *= int(s)
    return n * jnp.dtype(dtype).itemsize


def _vmem_limit(in_blocks, out_blocks, scratch_blocks):
    """Scoped-VMEM budget from actual block sizes (x2 for double buffering) + headroom."""
    total = 2 * sum(_block_bytes(s, d) for s, d in in_blocks + out_blocks)
    total += sum(_block_bytes(s, d) for s, d in scratch_blocks)
    return int(min(64 << 20, max(16 << 20, total + (2 << 20))))


def _stacked_w_spec(w):
    """(num_layers, ...) weight: one layer slice per grid step, streamed along axis 1."""
    blk = (1,) + tuple(w.shape[1:])
    nz = len(w.shape) - 1
    return pl.BlockSpec(blk, lambda b, l, _n=nz: (l,) + (0,) * _n)


def _pick_bt(batch, seqlen):
    """Largest divisor of batch with Bt*seqlen <= 512 so each grid step feeds the MXU
    plenty of rows while keeping a parallel batch axis for megacore (v7x) at large B."""
    best = 1
    for bt in range(1, batch + 1):
        if batch % bt == 0 and bt * seqlen <= 512:
            best = bt
    return best


def encoder_stack(x, bias, ep, nhead):
    B, L, D = x.shape
    num_layers = ep["wqkv"].shape[0]
    bt = _pick_bt(B, L)
    names = ["wqkv", "bqkv", "wo", "bo", "ln1_g", "ln1_b",
             "w1", "b1", "w2", "b2", "ln2_g", "ln2_b"]
    weights = [ep[n] for n in names]
    in_specs = [pl.BlockSpec((bt, L, D), lambda b, l: (b, 0, 0)),
                pl.BlockSpec((bt, 1, L), lambda b, l: (b, 0, 0))]
    in_specs += [_stacked_w_spec(w) for w in weights]
    in_blocks = ([((bt, L, D), x.dtype), ((bt, 1, L), bias.dtype)]
                 + [((1,) + tuple(w.shape[1:]), w.dtype) for w in weights])
    return pl.pallas_call(
        functools.partial(_enc_stack_kernel, nhead=nhead, eps=LN_EPS),
        grid=(B // bt, num_layers),
        in_specs=in_specs,
        out_specs=pl.BlockSpec((bt, L, D), lambda b, l: (b, 0, 0)),
        out_shape=jax.ShapeDtypeStruct((B, L, D), x.dtype),
        scratch_shapes=[pltpu.VMEM((bt, L, D), jnp.float32)],
        compiler_params=pltpu.CompilerParams(
            dimension_semantics=("parallel", "arbitrary"),
            vmem_limit_bytes=_vmem_limit(in_blocks, [((bt, L, D), x.dtype)],
                                         [((bt, L, D), jnp.float32)])),
    )(x, bias, *weights)


def decoder_stack(y, memory, tgt_bias, src_bias, dp, nhead):
    B, Lt, D = y.shape
    Ls = memory.shape[1]
    num_layers = dp["wqkv"].shape[0]
    bt = _pick_bt(B, max(Lt, Ls))
    names = ["wqkv", "bqkv", "wo", "bo",
             "ca_wq", "ca_bq", "ca_wkv", "ca_bkv", "ca_wo", "ca_bo",
             "ln1_g", "ln1_b", "ln2_g", "ln2_b", "ln3_g", "ln3_b",
             "w1", "b1", "w2", "b2"]
    weights = [dp[n] for n in names]
    in_specs = [pl.BlockSpec((bt, Lt, D), lambda b, l: (b, 0, 0)),
                pl.BlockSpec((bt, Ls, D), lambda b, l: (b, 0, 0)),
                pl.BlockSpec((bt, 1, Lt), lambda b, l: (b, 0, 0)),
                pl.BlockSpec((bt, 1, Ls), lambda b, l: (b, 0, 0))]
    in_specs += [_stacked_w_spec(w) for w in weights]
    in_blocks = ([((bt, Lt, D), y.dtype), ((bt, Ls, D), memory.dtype),
                  ((bt, 1, Lt), tgt_bias.dtype), ((bt, 1, Ls), src_bias.dtype)]
                 + [((1,) + tuple(w.shape[1:]), w.dtype) for w in weights])
    return pl.pallas_call(
        functools.partial(_dec_stack_kernel, nhead=nhead, eps=LN_EPS),
        grid=(B // bt, num_layers),
        in_specs=in_specs,
        out_specs=pl.BlockSpec((bt, Lt, D), lambda b, l: (b, 0, 0)),
        out_shape=jax.ShapeDtypeStruct((B, Lt, D), y.dtype),
        scratch_shapes=[pltpu.VMEM((bt, Lt, D), jnp.float32)],
        compiler_params=pltpu.CompilerParams(
            dimension_semantics=("parallel", "arbitrary"),
            vmem_limit_bytes=_vmem_limit(in_blocks, [((bt, Lt, D), y.dtype)],
                                         [((bt, Lt, D), jnp.float32)])),
    )(y, memory, tgt_bias, src_bias, *weights)


def latent_head(h, eps, params):
    """Fused to_mu + to_logvar + reparameterize + latent_to_dec."""
    B, D = h.shape
    latent = params["to_mu_w"].shape[1]
    return pl.pallas_call(
        _latent_kernel,
        out_shape=(jax.ShapeDtypeStruct((B, latent), jnp.float32),
                   jax.ShapeDtypeStruct((B, latent), jnp.float32),
                   jax.ShapeDtypeStruct((B, D), h.dtype)),
    )(h, eps, params["to_mu_w"], params["to_mu_b"],
      params["to_logvar_w"], params["to_logvar_b"],
      params["lat2dec_w"], params["lat2dec_b"])


def _pick_tile(dim, candidates):
    for c in candidates:
        if dim % c == 0:
            return c
    return dim


def linear(x, w, b, relu=False, out_dtype=None):
    """Tiled linear. x:(M,K) bf16; w:(K,N) bf16 pre-transposed; b:(1,N) f32.
    N tiles on the OUTER grid axis so each (K, tn) weight tile streams from HBM once."""
    M, K = x.shape
    N = w.shape[1]
    out_dtype = out_dtype or x.dtype
    tm = _pick_tile(M, (512, 256, 128, 64, 32, 16, 8))
    tn = _pick_tile(N, (1024, 512, 256, 128))
    # TODO(synk): add a K reduction grid axis (f32 accumulator) for K > a few thousand.
    vmem = _vmem_limit([((tm, K), x.dtype), ((K, tn), w.dtype), ((1, tn), b.dtype)],
                       [((tm, tn), out_dtype)], [])
    return pl.pallas_call(
        functools.partial(_linear_kernel, relu=relu),
        grid=(N // tn, M // tm),
        in_specs=[pl.BlockSpec((tm, K), lambda jn, im: (im, 0)),
                  pl.BlockSpec((K, tn), lambda jn, im: (0, jn)),
                  pl.BlockSpec((1, tn), lambda jn, im: (0, jn))],
        out_specs=pl.BlockSpec((tm, tn), lambda jn, im: (im, jn)),
        out_shape=jax.ShapeDtypeStruct((M, N), out_dtype),
        compiler_params=pltpu.CompilerParams(
            dimension_semantics=("parallel", "parallel"),
            vmem_limit_bytes=vmem),
    )(x, w, b)


# --------------------------------- parameters --------------------------------- #

def positional_encoding(max_len, d_model):
    position = jnp.arange(max_len, dtype=jnp.float32)[:, None]
    div_term = jnp.exp(jnp.arange(0, d_model, 2, dtype=jnp.float32) *
                       (-math.log(10000.0) / d_model))
    pe = jnp.zeros((max_len, d_model), jnp.float32)
    pe = pe.at[:, 0::2].set(jnp.sin(position * div_term))
    pe = pe.at[:, 1::2].set(jnp.cos(position * div_term))
    return pe


def init_params(key, vocab, d_model, nhead, num_layers, latent_dim, max_len):
    """Matmul weights bf16, pre-transposed (in,out) and stacked per layer as
    (num_layers, ...).  Biases/LN params f32.  The 1/sqrt(Dh) attention scale is
    folded into the Q columns of wqkv / ca_wq (and would apply to their biases if
    they were nonzero)."""
    d_ff = 4 * d_model
    dh = d_model // nhead
    scale = 1.0 / math.sqrt(dh)
    nl = num_layers
    kit = iter(jax.random.split(key, 256))

    def w(shape, col_scale=None, dtype=jnp.bfloat16):
        a = jax.random.normal(next(kit), shape, jnp.float32) * 0.02
        if col_scale is not None:
            a = a * col_scale
        return a.astype(dtype)

    def zeros(shape):
        return jnp.zeros(shape, jnp.float32)

    def ones(shape):
        return jnp.ones(shape, jnp.float32)

    qcols = jnp.concatenate([jnp.full((d_model,), scale, jnp.float32),
                             jnp.ones((2 * d_model,), jnp.float32)])

    def enc_stack_params():
        return dict(
            wqkv=w((nl, d_model, 3 * d_model), qcols), bqkv=zeros((nl, 1, 3 * d_model)),
            wo=w((nl, d_model, d_model)), bo=zeros((nl, 1, d_model)),
            ln1_g=ones((nl, 1, d_model)), ln1_b=zeros((nl, 1, d_model)),
            w1=w((nl, d_model, d_ff)), b1=zeros((nl, 1, d_ff)),
            w2=w((nl, d_ff, d_model)), b2=zeros((nl, 1, d_model)),
            ln2_g=ones((nl, 1, d_model)), ln2_b=zeros((nl, 1, d_model)),
        )

    dec = enc_stack_params()
    dec.update(
        ca_wq=w((nl, d_model, d_model), scale), ca_bq=zeros((nl, 1, d_model)),
        ca_wkv=w((nl, d_model, 2 * d_model)), ca_bkv=zeros((nl, 1, 2 * d_model)),
        ca_wo=w((nl, d_model, d_model)), ca_bo=zeros((nl, 1, d_model)),
        ln3_g=ones((nl, 1, d_model)), ln3_b=zeros((nl, 1, d_model)),
    )

    return dict(
        embedding=w((vocab, d_model)),
        pe=positional_encoding(max_len, d_model),
        enc=enc_stack_params(),
        dec=dec,
        to_mu_w=w((d_model, latent_dim)), to_mu_b=zeros((1, latent_dim)),
        to_logvar_w=w((d_model, latent_dim)), to_logvar_b=zeros((1, latent_dim)),
        lat2dec_w=w((latent_dim, d_model)), lat2dec_b=zeros((1, d_model)),
        out_w=w((d_model, vocab)), out_b=zeros((1, vocab)),
    )


# ----------------------------------- forward ----------------------------------- #

def transformer_vae_forward(params, src, tgt, eps_key, pad_idx, nhead):
    B, Ls = src.shape
    Lt = tgt.shape[1]
    D = params["embedding"].shape[1]
    latent_dim = params["to_mu_w"].shape[1]

    src_bias = jnp.where(src == pad_idx, NEG_INF, 0.0).astype(jnp.float32)[:, None, :]
    tgt_bias = jnp.where(tgt == pad_idx, NEG_INF, 0.0).astype(jnp.float32)[:, None, :]

    # ------------------------------ encode ------------------------------ #
    # TODO(synk): embedding gather + positional add kept in XLA glue (data-dependent gather).
    x = (jnp.take(params["embedding"], src, axis=0).astype(jnp.float32)
         + params["pe"][:Ls][None]).astype(jnp.bfloat16)           # dropout == identity
    memory = encoder_stack(x, src_bias, params["enc"], nhead)       # (B, Ls, D) bf16
    last_hidden = memory[:, -1, :]                                  # memory[-1] in (L,B,D)

    # -------------------------- latent head ----------------------------- #
    eps = jax.random.normal(eps_key, (B, latent_dim), jnp.float32)
    mu, logvar, latent_memory = latent_head(last_hidden, eps, params)
    memory = memory + latent_memory[:, None, :]                     # expand over seq

    # ------------------------------ decode ------------------------------ #
    y = (jnp.take(params["embedding"], tgt, axis=0).astype(jnp.float32)
         + params["pe"][:Lt][None]).astype(jnp.bfloat16)
    y = decoder_stack(y, memory, tgt_bias, src_bias, params["dec"], nhead)

    logits = linear(y.reshape(B * Lt, D), params["out_w"], params["out_b"],
                    out_dtype=jnp.float32).reshape(B, Lt, -1)
    return logits, mu, logvar


# ------------------------------------ main ------------------------------------ #

if __name__ == "__main__":
    vocab_size, d_model, nhead, num_layers, latent_dim, max_len = 64, 32, 4, 2, 16, 64
    B, Ls, Lt = 2, 8, 8
    pad_idx = 0

    root = jax.random.PRNGKey(0)
    kp, ks, kt, ke = jax.random.split(root, 4)
    params = init_params(kp, vocab_size, d_model, nhead, num_layers,
                         latent_dim, max_len)

    src = jax.random.randint(ks, (B, Ls), 1, vocab_size, jnp.int32)
    tgt = jax.random.randint(kt, (B, Lt), 1, vocab_size, jnp.int32)
    src = src.at[0, -2:].set(pad_idx)   # exercise key-padding masks
    tgt = tgt.at[0, -1:].set(pad_idx)

    fwd = jax.jit(functools.partial(transformer_vae_forward,
                                    pad_idx=pad_idx, nhead=nhead))
    logits, mu, logvar = fwd(params, src, tgt, eps_key=ke)
    jax.block_until_ready((logits, mu, logvar))

    assert logits.shape == (B, Lt, vocab_size)
    assert mu.shape == (B, latent_dim) and logvar.shape == (B, latent_dim)
    assert bool(jnp.all(jnp.isfinite(logits)))
    print("KERNEL_OK")
</pallas_src>

<mosaic_0001>
module attributes {stable_mosaic.version = 11 : i64} {
  func.func @_latent_kernel(%arg0: memref<2x32xbf16, #tpu.memory_space<vmem>>, %arg1: memref<2x16xf32, #tpu.memory_space<vmem>>, %arg2: memref<32x16xbf16, #tpu.memory_space<vmem>>, %arg3: memref<1x16xf32, #tpu.memory_space<vmem>>, %arg4: memref<32x16xbf16, #tpu.memory_space<vmem>>, %arg5: memref<1x16xf32, #tpu.memory_space<vmem>>, %arg6: memref<16x32xbf16, #tpu.memory_space<vmem>>, %arg7: memref<1x32xf32, #tpu.memory_space<vmem>>, %arg8: memref<2x16xf32, #tpu.memory_space<vmem>>, %arg9: memref<2x16xf32, #tpu.memory_space<vmem>>, %arg10: memref<2x32xbf16, #tpu.memory_space<vmem>>) attributes {dimension_semantics = [], scalar_prefetch = 0 : i64, scratch_operands = 0 : i64, tpu.core_type = #tpu.core_type<tc>} {
    %c0 = arith.constant 0 : index
    %c0_0 = arith.constant 0 : index
    %0 = vector.load %arg0[%c0, %c0_0] : memref<2x32xbf16, #tpu.memory_space<vmem>>, vector<2x32xbf16>
    %c0_1 = arith.constant 0 : index
    %c0_2 = arith.constant 0 : index
    %1 = vector.load %arg2[%c0_1, %c0_2] : memref<32x16xbf16, #tpu.memory_space<vmem>>, vector<32x16xbf16>
    %cst = arith.constant dense<0.000000e+00> : vector<2x16xf32>
    %2 = tpu.matmul %0, %1, %cst {dimension_numbers = #tpu.dot_dimension_numbers<[1], [0], [0], [1], [0, 0, 1, 1], [], []>} : vector<2x32xbf16>, vector<32x16xbf16>, vector<2x16xf32> -> vector<2x16xf32>
    %c0_3 = arith.constant 0 : index
    %c0_4 = arith.constant 0 : index
    %3 = vector.load %arg3[%c0_3, %c0_4] : memref<1x16xf32, #tpu.memory_space<vmem>>, vector<1x16xf32>
    %4 = vector.broadcast %3 : vector<1x16xf32> to vector<2x16xf32>
    %5 = arith.addf %2, %4 : vector<2x16xf32>
    %c0_5 = arith.constant 0 : index
    %c0_6 = arith.constant 0 : index
    %6 = vector.load %arg4[%c0_5, %c0_6] : memref<32x16xbf16, #tpu.memory_space<vmem>>, vector<32x16xbf16>
    %cst_7 = arith.constant dense<0.000000e+00> : vector<2x16xf32>
    %7 = tpu.matmul %0, %6, %cst_7 {dimension_numbers = #tpu.dot_dimension_numbers<[1], [0], [0], [1], [0, 0, 1, 1], [], []>} : vector<2x32xbf16>, vector<32x16xbf16>, vector<2x16xf32> -> vector<2x16xf32>
    %c0_8 = arith.constant 0 : index
    %c0_9 = arith.constant 0 : index
    %8 = vector.load %arg5[%c0_8, %c0_9] : memref<1x16xf32, #tpu.memory_space<vmem>>, vector<1x16xf32>
    %9 = vector.broadcast %8 : vector<1x16xf32> to vector<2x16xf32>
    %10 = arith.addf %7, %9 : vector<2x16xf32>
    %c0_10 = arith.constant 0 : index
    %c0_11 = arith.constant 0 : index
    %11 = vector.load %arg1[%c0_10, %c0_11] : memref<2x16xf32, #tpu.memory_space<vmem>>, vector<2x16xf32>
    %cst_12 = arith.constant 5.000000e-01 : f32
    %12 = vector.broadcast %cst_12 : f32 to vector<2x16xf32>
    %13 = arith.mulf %12, %10 : vector<2x16xf32>
    %14 = math.exp %13 : vector<2x16xf32>
    %15 = arith.mulf %11, %14 : vector<2x16xf32>
    %16 = arith.addf %5, %15 : vector<2x16xf32>
    %17 = arith.truncf %16 : vector<2x16xf32> to vector<2x16xbf16>
    %c0_13 = arith.constant 0 : index
    %c0_14 = arith.constant 0 : index
    %18 = vector.load %arg6[%c0_13, %c0_14] : memref<16x32xbf16, #tpu.memory_space<vmem>>, vector<16x32xbf16>
    %cst_15 = arith.constant dense<0.000000e+00> : vector<2x32xf32>
    %19 = tpu.matmul %17, %18, %cst_15 {dimension_numbers = #tpu.dot_dimension_numbers<[1], [0], [0], [1], [0, 0, 1, 1], [], []>} : vector<2x16xbf16>, vector<16x32xbf16>, vector<2x32xf32> -> vector<2x32xf32>
    %c0_16 = arith.constant 0 : index
    %c0_17 = arith.constant 0 : index
    %20 = vector.load %arg7[%c0_16, %c0_17] : memref<1x32xf32, #tpu.memory_space<vmem>>, vector<1x32xf32>
    %21 = vector.broadcast %20 : vector<1x32xf32> to vector<2x32xf32>
    %22 = arith.addf %19, %21 : vector<2x32xf32>
    %c0_18 = arith.constant 0 : index
    %c0_19 = arith.constant 0 : index
    %23 = vector.load %arg8[%c0_18, %c0_19] : memref<2x16xf32, #tpu.memory_space<vmem>>, vector<2x16xf32>
    tpu.vector_store %arg8[%c0_18, %c0_19], %5 {strides = array<i32>} : memref<2x16xf32, #tpu.memory_space<vmem>>, vector<2x16xf32>,
    %c0_20 = arith.constant 0 : index
    %c0_21 = arith.constant 0 : index
    %24 = vector.load %arg9[%c0_20, %c0_21] : memref<2x16xf32, #tpu.memory_space<vmem>>, vector<2x16xf32>
    tpu.vector_store %arg9[%c0_20, %c0_21], %10 {strides = array<i32>} : memref<2x16xf32, #tpu.memory_space<vmem>>, vector<2x16xf32>,
    %25 = arith.truncf %22 : vector<2x32xf32> to vector<2x32xbf16>
    %c0_22 = arith.constant 0 : index
    %c0_23 = arith.constant 0 : index
    %26 = vector.load %arg10[%c0_22, %c0_23] : memref<2x32xbf16, #tpu.memory_space<vmem>>, vector<2x32xbf16>
    tpu.vector_store %arg10[%c0_22, %c0_23], %25 {strides = array<i32>} : memref<2x32xbf16, #tpu.memory_space<vmem>>, vector<2x32xbf16>,
    return
  }
}

module attributes {stable_mosaic.version = 11 : i64} {
  func.func @_enc_stack_kernel(%arg0: i32, %arg1: i32, %arg2: memref<2x8x32xbf16, #tpu.memory_space<vmem>>, %arg3: memref<2x1x8xf32, #tpu.memory_space<vmem>>, %arg4: memref<1x32x96xbf16, #tpu.memory_space<vmem>>, %arg5: memref<1x1x96xf32, #tpu.memory_space<vmem>>, %arg6: memref<1x32x32xbf16, #tpu.memory_space<vmem>>, %arg7: memref<1x1x32xf32, #tpu.memory_space<vmem>>, %arg8: memref<1x1x32xf32, #tpu.memory_space<vmem>>, %arg9: memref<1x1x32xf32, #tpu.memory_space<vmem>>, %arg10: memref<1x32x128xbf16, #tpu.memory_space<vmem>>, %arg11: memref<1x1x128xf32, #tpu.memory_space<vmem>>, %arg12: memref<1x128x32xbf16, #tpu.memory_space<vmem>>, %arg13: memref<1x1x32xf32, #tpu.memory_space<vmem>>, %arg14: memref<1x1x32xf32, #tpu.memory_space<vmem>>, %arg15: memref<1x1x32xf32, #tpu.memory_space<vmem>>, %arg16: memref<2x8x32xbf16, #tpu.memory_space<vmem>>, %arg17: memref<2x8x32xf32, #tpu.memory_space<vmem>>) attributes {dimension_semantics = [#tpu.dimension_semantics<parallel>, #tpu.dimension_semantics<arbitrary>], iteration_bounds = array<i64: 1, 2>, scalar_prefetch = 0 : i64, scratch_operands = 1 : i64, tpu.core_type = #tpu.core_type<tc>, window_params = [{transform_indices = @transform_0, window_bounds = array<i64: 2, 8, 32>}, {transform_indices = @transform_1, window_bounds = array<i64: 2, 1, 8>}, {transform_indices = @transform_2, window_bounds = array<i64: 1, 32, 96>}, {transform_indices = @transform_3, window_bounds = array<i64: 1, 1, 96>}, {transform_indices = @transform_4, window_bounds = array<i64: 1, 32, 32>}, {transform_indices = @transform_5, window_bounds = array<i64: 1, 1, 32>}, {transform_indices = @transform_6, window_bounds = array<i64: 1, 1, 32>}, {transform_indices = @transform_7, window_bounds = array<i64: 1, 1, 32>}, {transform_indices = @transform_8, window_bounds = array<i64: 1, 32, 128>}, {transform_indices = @transform_9, window_bounds = array<i64: 1, 1, 128>}, {transform_indices = @transform_10, window_bounds = array<i64: 1, 128, 32>}, {transform_indices = @transform_11, window_bounds = array<i64: 1, 1, 32>}, {transform_indices = @transform_12, window_bounds = array<i64: 1, 1, 32>}, {transform_indices = @transform_13, window_bounds = array<i64: 1, 1, 32>}, {transform_indices = @transform_14, window_bounds = array<i64: 2, 8, 32>}]} {
    %c0_i32 = arith.constant 0 : i32
    %0 = arith.cmpi eq, %arg1, %c0_i32 : i32
    %1 = arith.extui %0 : i1 to i32
    %c0_i32_0 = arith.constant 0 : i32
    %2 = arith.cmpi ne, %1, %c0_i32_0 : i32
    scf.if %2 {
      %c0_92 = arith.constant 0 : index
      %c0_93 = arith.constant 0 : index
      %c0_94 = arith.constant 0 : index
      %279 = vector.load %arg2[%c0_92, %c0_93, %c0_94] : memref<2x8x32xbf16, #tpu.memory_space<vmem>>, vector<2x8x32xbf16>
      %280 = arith.extf %279 : vector<2x8x32xbf16> to vector<2x8x32xf32>
      %c0_95 = arith.constant 0 : index
      %c0_96 = arith.constant 0 : index
      %c0_97 = arith.constant 0 : index
      %281 = vector.load %arg17[%c0_95, %c0_96, %c0_97] : memref<2x8x32xf32, #tpu.memory_space<vmem>>, vector<2x8x32xf32>
      tpu.vector_store %arg17[%c0_95, %c0_96, %c0_97], %280 {strides = array<i32>} : memref<2x8x32xf32, #tpu.memory_space<vmem>>, vector<2x8x32xf32>,
    } else {
    }
    %c0 = arith.constant 0 : index
    %c0_1 = arith.constant 0 : index
    %c0_2 = arith.constant 0 : index
    %3 = vector.load %arg17[%c0, %c0_1, %c0_2] : memref<2x8x32xf32, #tpu.memory_space<vmem>>, vector<2x8x32xf32>
    %4 = vector.shape_cast %3 : vector<2x8x32xf32> to vector<16x32xf32>
    %c0_3 = arith.constant 0 : index
    %c0_4 = arith.constant 0 : index
    %c0_5 = arith.constant 0 : index
    %5 = vector.load %arg3[%c0_3, %c0_4, %c0_5] : memref<2x1x8xf32, #tpu.memory_space<vmem>>, vector<2x1x8xf32>
    %6 = arith.truncf %4 : vector<16x32xf32> to vector<16x32xbf16>
    %c0_6 = arith.constant 0 : index
    %c0_7 = arith.constant 0 : index
    %c0_8 = arith.constant 0 : index
    %7 = vector.load %arg4[%c0_6, %c0_7, %c0_8] : memref<1x32x96xbf16, #tpu.memory_space<vmem>>, vector<1x32x96xbf16>
    %8 = vector.shape_cast %7 : vector<1x32x96xbf16> to vector<32x96xbf16>
    %cst = arith.constant dense<0.000000e+00> : vector<16x96xf32>
    %9 = tpu.matmul %6, %8, %cst {dimension_numbers = #tpu.dot_dimension_numbers<[1], [0], [0], [1], [0, 0, 1, 1], [], []>} : vector<16x32xbf16>, vector<32x96xbf16>, vector<16x96xf32> -> vector<16x96xf32>
    %c0_9 = arith.constant 0 : index
    %c0_10 = arith.constant 0 : index
    %c0_11 = arith.constant 0 : index
    %10 = vector.load %arg5[%c0_9, %c0_10, %c0_11] : memref<1x1x96xf32, #tpu.memory_space<vmem>>, vector<1x1x96xf32>
    %11 = vector.shape_cast %10 : vector<1x1x96xf32> to vector<1x96xf32>
    %12 = vector.broadcast %11 : vector<1x96xf32> to vector<16x96xf32>
    %13 = arith.addf %9, %12 : vector<16x96xf32>
    %14 = vector.extract_strided_slice %13 {offsets = [0, 0], sizes = [16, 32], strides = [1, 1]} : vector<16x96xf32> to vector<16x32xf32>
    %15 = vector.extract_strided_slice %13 {offsets = [0, 32], sizes = [16, 32], strides = [1, 1]} : vector<16x96xf32> to vector<16x32xf32>
    %16 = vector.extract_strided_slice %13 {offsets = [0, 64], sizes = [16, 32], strides = [1, 1]} : vector<16x96xf32> to vector<16x32xf32>
    %c0_12 = arith.constant 0 : index
    %c0_13 = arith.constant 0 : index
    %c0_14 = arith.constant 0 : index
    %17 = vector.load %arg6[%c0_12, %c0_13, %c0_14] : memref<1x32x32xbf16, #tpu.memory_space<vmem>>, vector<1x32x32xbf16>
    %18 = vector.shape_cast %17 : vector<1x32x32xbf16> to vector<32x32xbf16>
    %c0_15 = arith.constant 0 : index
    %c0_16 = arith.constant 0 : index
    %c0_17 = arith.constant 0 : index
    %19 = vector.load %arg7[%c0_15, %c0_16, %c0_17] : memref<1x1x32xf32, #tpu.memory_space<vmem>>, vector<1x1x32xf32>
    %20 = vector.shape_cast %19 : vector<1x1x32xf32> to vector<1x32xf32>
    %21 = vector.extract_strided_slice %14 {offsets = [0, 0], sizes = [8, 32], strides = [1, 1]} : vector<16x32xf32> to vector<8x32xf32>
    %22 = vector.extract_strided_slice %15 {offsets = [0, 0], sizes = [8, 32], strides = [1, 1]} : vector<16x32xf32> to vector<8x32xf32>
    %23 = vector.extract_strided_slice %16 {offsets = [0, 0], sizes = [8, 32], strides = [1, 1]} : vector<16x32xf32> to vector<8x32xf32>
    %24 = vector.extract_strided_slice %5 {offsets = [0, 0, 0], sizes = [1, 1, 8], strides = [1, 1, 1]} : vector<2x1x8xf32> to vector<1x1x8xf32>
    %25 = vector.shape_cast %24 : vector<1x1x8xf32> to vector<1x8xf32>
    %26 = vector.extract_strided_slice %21 {offsets = [0, 0], sizes = [8, 8], strides = [1, 1]} : vector<8x32xf32> to vector<8x8xf32>
    %27 = arith.truncf %26 : vector<8x8xf32> to vector<8x8xbf16>
    %28 = vector.extract_strided_slice %22 {offsets = [0, 0], sizes = [8, 8], strides = [1, 1]} : vector<8x32xf32> to vector<8x8xf32>
    %29 = arith.truncf %28 : vector<8x8xf32> to vector<8x8xbf16>
    %cst_18 = arith.constant dense<0.000000e+00> : vector<8x8xf32>
    %30 = tpu.matmul %27, %29, %cst_18 {dimension_numbers = #tpu.dot_dimension_numbers<[1], [1], [0], [0], [0, 0, 1, 0], [], []>} : vector<8x8xbf16>, vector<8x8xbf16>, vector<8x8xf32> -> vector<8x8xf32>
    %31 = vector.broadcast %25 : vector<1x8xf32> to vector<8x8xf32>
    %32 = arith.addf %30, %31 : vector<8x8xf32>
    %cst_19 = arith.constant dense<0xFF800000> : vector<8xf32>
    %33 = vector.multi_reduction <maximumf>, %32, %cst_19 [1] : vector<8x8xf32> to vector<8xf32>
    %34 = vector.shape_cast %33 : vector<8xf32> to vector<8x1xf32>
    %35 = vector.broadcast %34 : vector<8x1xf32> to vector<8x8xf32>
    %36 = arith.subf %32, %35 : vector<8x8xf32>
    %37 = math.exp %36 : vector<8x8xf32>
    %cst_20 = arith.constant dense<0.000000e+00> : vector<8xf32>
    %38 = vector.multi_reduction <add>, %37, %cst_20 [1] : vector<8x8xf32> to vector<8xf32>
    %39 = vector.shape_cast %38 : vector<8xf32> to vector<8x1xf32>
    %40 = tpu.reciprocal %39 {approx = true} : vector<8x1xf32> -> vector<8x1xf32>
    %41 = vector.broadcast %40 : vector<8x1xf32> to vector<8x8xf32>
    %42 = arith.mulf %37, %41 : vector<8x8xf32>
    %43 = arith.truncf %42 : vector<8x8xf32> to vector<8x8xbf16>
    %44 = vector.extract_strided_slice %23 {offsets = [0, 0], sizes = [8, 8], strides = [1, 1]} : vector<8x32xf32> to vector<8x8xf32>
    %45 = arith.truncf %44 : vector<8x8xf32> to vector<8x8xbf16>
    %cst_21 = arith.constant dense<0.000000e+00> : vector<8x8xf32>
    %46 = tpu.matmul %43, %45, %cst_21 {dimension_numbers = #tpu.dot_dimension_numbers<[1], [0], [0], [1], [0, 0, 1, 1], [], []>} : vector<8x8xbf16>, vector<8x8xbf16>, vector<8x8xf32> -> vector<8x8xf32>
    %47 = vector.extract_strided_slice %21 {offsets = [0, 8], sizes = [8, 8], strides = [1, 1]} : vector<8x32xf32> to vector<8x8xf32>
    %48 = arith.truncf %47 : vector<8x8xf32> to vector<8x8xbf16>
    %49 = vector.extract_strided_slice %22 {offsets = [0, 8], sizes = [8, 8], strides = [1, 1]} : vector<8x32xf32> to vector<8x8xf32>
    %50 = arith.truncf %49 : vector<8x8xf32> to vector<8x8xbf16>
    %cst_22 = arith.constant dense<0.000000e+00> : vector<8x8xf32>
    %51 = tpu.matmul %48, %50, %cst_22 {dimension_numbers = #tpu.dot_dimension_numbers<[1], [1], [0], [0], [0, 0, 1, 0], [], []>} : vector<8x8xbf16>, vector<8x8xbf16>, vector<8x8xf32> -> vector<8x8xf32>
    %52 = vector.broadcast %25 : vector<1x8xf32> to vector<8x8xf32>
    %53 = arith.addf %51, %52 : vector<8x8xf32>
    %cst_23 = arith.constant dense<0xFF800000> : vector<8xf32>
    %54 = vector.multi_reduction <maximumf>, %53, %cst_23 [1] : vector<8x8xf32> to vector<8xf32>
    %55 = vector.shape_cast %54 : vector<8xf32> to vector<8x1xf32>
    %56 = vector.broadcast %55 : vector<8x1xf32> to vector<8x8xf32>
    %57 = arith.subf %53, %56 : vector<8x8xf32>
    %58 = math.exp %57 : vector<8x8xf32>
    %cst_24 = arith.constant dense<0.000000e+00> : vector<8xf32>
    %59 = vector.multi_reduction <add>, %58, %cst_24 [1] : vector<8x8xf32> to vector<8xf32>
    %60 = vector.shape_cast %59 : vector<8xf32> to vector<8x1xf32>
    %61 = tpu.reciprocal %60 {approx = true} : vector<8x1xf32> -> vector<8x1xf32>
    %62 = vector.broadcast %61 : vector<8x1xf32> to vector<8x8xf32>
    %63 = arith.mulf %58, %62 : vector<8x8xf32>
    %64 = arith.truncf %63 : vector<8x8xf32> to vector<8x8xbf16>
    %65 = vector.extract_strided_slice %23 {offsets = [0, 8], sizes = [8, 8], strides = [1, 1]} : vector<8x32xf32> to vector<8x8xf32>
    %66 = arith.truncf %65 : vector<8x8xf32> to vector<8x8xbf16>
    %cst_25 = arith.constant dense<0.000000e+00> : vector<8x8xf32>
    %67 = tpu.matmul %64, %66, %cst_25 {dimension_numbers = #tpu.dot_dimension_numbers<[1], [0], [0], [1], [0, 0, 1, 1], [], []>} : vector<8x8xbf16>, vector<8x8xbf16>, vector<8x8xf32> -> vector<8x8xf32>
    %68 = vector.extract_strided_slice %21 {offsets = [0, 16], sizes = [8, 8], strides = [1, 1]} : vector<8x32xf32> to vector<8x8xf32>
    %69 = arith.truncf %68 : vector<8x8xf32> to vector<8x8xbf16>
    %70 = vector.extract_strided_slice %22 {offsets = [0, 16], sizes = [8, 8], strides = [1, 1]} : vector<8x32xf32> to vector<8x8xf32>
    %71 = arith.truncf %70 : vector<8x8xf32> to vector<8x8xbf16>
    %cst_26 = arith.constant dense<0.000000e+00> : vector<8x8xf32>
    %72 = tpu.matmul %69, %71, %cst_26 {dimension_numbers = #tpu.dot_dimension_numbers<[1], [1], [0], [0], [0, 0, 1, 0], [], []>} : vector<8x8xbf16>, vector<8x8xbf16>, vector<8x8xf32> -> vector<8x8xf32>
    %73 = vector.broadcast %25 : vector<1x8xf32> to vector<8x8xf32>
    %74 = arith.addf %72, %73 : vector<8x8xf32>
    %cst_27 = arith.constant dense<0xFF800000> : vector<8xf32>
    %75 = vector.multi_reduction <maximumf>, %74, %cst_27 [1] : vector<8x8xf32> to vector<8xf32>
    %76 = vector.shape_cast %75 : vector<8xf32> to vector<8x1xf32>
    %77 = vector.broadcast %76 : vector<8x1xf32> to vector<8x8xf32>
    %78 = arith.subf %74, %77 : vector<8x8xf32>
    %79 = math.exp %78 : vector<8x8xf32>
    %cst_28 = arith.constant dense<0.000000e+00> : vector<8xf32>
    %80 = vector.multi_reduction <add>, %79, %cst_28 [1] : vector<8x8xf32> to vector<8xf32>
    %81 = vector.shape_cast %80 : vector<8xf32> to vector<8x1xf32>
    %82 = tpu.reciprocal %81 {approx = true} : vector<8x1xf32> -> vector<8x1xf32>
    %83 = vector.broadcast %82 : vector<8x1xf32> to vector<8x8xf32>
    %84 = arith.mulf %79, %83 : vector<8x8xf32>
    %85 = arith.truncf %84 : vector<8x8xf32> to vector<8x8xbf16>
    %86 = vector.extract_strided_slice %23 {offsets = [0, 16], sizes = [8, 8], strides = [1, 1]} : vector<8x32xf32> to vector<8x8xf32>
    %87 = arith.truncf %86 : vector<8x8xf32> to vector<8x8xbf16>
    %cst_29 = arith.constant dense<0.000000e+00> : vector<8x8xf32>
    %88 = tpu.matmul %85, %87, %cst_29 {dimension_numbers = #tpu.dot_dimension_numbers<[1], [0], [0], [1], [0, 0, 1, 1], [], []>} : vector<8x8xbf16>, vector<8x8xbf16>, vector<8x8xf32> -> vector<8x8xf32>
    %89 = vector.extract_strided_slice %21 {offsets = [0, 24], sizes = [8, 8], strides = [1, 1]} : vector<8x32xf32> to vector<8x8xf32>
    %90 = arith.truncf %89 : vector<8x8xf32> to vector<8x8xbf16>
    %91 = vector.extract_strided_slice %22 {offsets = [0, 24], sizes = [8, 8], strides = [1, 1]} : vector<8x32xf32> to vector<8x8xf32>
    %92 = arith.truncf %91 : vector<8x8xf32> to vector<8x8xbf16>
    %cst_30 = arith.constant dense<0.000000e+00> : vector<8x8xf32>
    %93 = tpu.matmul %90, %92, %cst_30 {dimension_numbers = #tpu.dot_dimension_numbers<[1], [1], [0], [0], [0, 0, 1, 0], [], []>} : vector<8x8xbf16>, vector<8x8xbf16>, vector<8x8xf32> -> vector<8x8xf32>
    %94 = vector.broadcast %25 : vector<1x8xf32> to vector<8x8xf32>
    %95 = arith.addf %93, %94 : vector<8x8xf32>
    %cst_31 = arith.constant dense<0xFF800000> : vector<8xf32>
    %96 = vector.multi_reduction <maximumf>, %95, %cst_31 [1] : vector<8x8xf32> to vector<8xf32>
    %97 = vector.shape_cast %96 : vector<8xf32> to vector<8x1xf32>
    %98 = vector.broadcast %97 : vector<8x1xf32> to vector<8x8xf32>
    %99 = arith.subf %95, %98 : vector<8x8xf32>
    %100 = math.exp %99 : vector<8x8xf32>
    %cst_32 = arith.constant dense<0.000000e+00> : vector<8xf32>
    %101 = vector.multi_reduction <add>, %100, %cst_32 [1] : vector<8x8xf32> to vector<8xf32>
    %102 = vector.shape_cast %101 : vector<8xf32> to vector<8x1xf32>
    %103 = tpu.reciprocal %102 {approx = true} : vector<8x1xf32> -> vector<8x1xf32>
    %104 = vector.broadcast %103 : vector<8x1xf32> to vector<8x8xf32>
    %105 = arith.mulf %100, %104 : vector<8x8xf32>
    %106 = arith.truncf %105 : vector<8x8xf32> to vector<8x8xbf16>
    %107 = vector.extract_strided_slice %23 {offsets = [0, 24], sizes = [8, 8], strides = [1, 1]} : vector<8x32xf32> to vector<8x8xf32>
    %108 = arith.truncf %107 : vector<8x8xf32> to vector<8x8xbf16>
    %cst_33 = arith.constant dense<0.000000e+00> : vector<8x8xf32>
    %109 = tpu.matmul %106, %108, %cst_33 {dimension_numbers = #tpu.dot_dimension_numbers<[1], [0], [0], [1], [0, 0, 1, 1], [], []>} : vector<8x8xbf16>, vector<8x8xbf16>, vector<8x8xf32> -> vector<8x8xf32>
    %110 = tpu.concatenate %46, %67, %88, %109 in 1 : vector<8x8xf32>, vector<8x8xf32>, vector<8x8xf32>, vector<8x8xf32> -> vector<8x32xf32>
    %111 = vector.extract_strided_slice %14 {offsets = [8, 0], sizes = [8, 32], strides = [1, 1]} : vector<16x32xf32> to vector<8x32xf32>
    %112 = vector.extract_strided_slice %15 {offsets = [8, 0], sizes = [8, 32], strides = [1, 1]} : vector<16x32xf32> to vector<8x32xf32>
    %113 = vector.extract_strided_slice %16 {offsets = [8, 0], sizes = [8, 32], strides = [1, 1]} : vector<16x32xf32> to vector<8x32xf32>
    %114 = vector.extract_strided_slice %5 {offsets = [1, 0, 0], sizes = [1, 1, 8], strides = [1, 1, 1]} : vector<2x1x8xf32> to vector<1x1x8xf32>
    %115 = vector.shape_cast %114 : vector<1x1x8xf32> to vector<1x8xf32>
    %116 = vector.extract_strided_slice %111 {offsets = [0, 0], sizes = [8, 8], strides = [1, 1]} : vector<8x32xf32> to vector<8x8xf32>
    %117 = arith.truncf %116 : vector<8x8xf32> to vector<8x8xbf16>
    %118 = vector.extract_strided_slice %112 {offsets = [0, 0], sizes = [8, 8], strides = [1, 1]} : vector<8x32xf32> to vector<8x8xf32>
    %119 = arith.truncf %118 : vector<8x8xf32> to vector<8x8xbf16>
    %cst_34 = arith.constant dense<0.000000e+00> : vector<8x8xf32>
    %120 = tpu.matmul %117, %119, %cst_34 {dimension_numbers = #tpu.dot_dimension_numbers<[1], [1], [0], [0], [0, 0, 1, 0], [], []>} : vector<8x8xbf16>, vector<8x8xbf16>, vector<8x8xf32> -> vector<8x8xf32>
    %121 = vector.broadcast %115 : vector<1x8xf32> to vector<8x8xf32>
    %122 = arith.addf %120, %121 : vector<8x8xf32>
    %cst_35 = arith.constant dense<0xFF800000> : vector<8xf32>
    %123 = vector.multi_reduction <maximumf>, %122, %cst_35 [1] : vector<8x8xf32> to vector<8xf32>
    %124 = vector.shape_cast %123 : vector<8xf32> to vector<8x1xf32>
    %125 = vector.broadcast %124 : vector<8x1xf32> to vector<8x8xf32>
    %126 = arith.subf %122, %125 : vector<8x8xf32>
    %127 = math.exp %126 : vector<8x8xf32>
    %cst_36 = arith.constant dense<0.000000e+00> : vector<8xf32>
    %128 = vector.multi_reduction <add>, %127, %cst_36 [1] : vector<8x8xf32> to vector<8xf32>
    %129 = vector.shape_cast %128 : vector<8xf32> to vector<8x1xf32>
    %130 = tpu.reciprocal %129 {approx = true} : vector<8x1xf32> -> vector<8x1xf32>
    %131 = vector.broadcast %130 : vector<8x1xf32> to vector<8x8xf32>
    %132 = arith.mulf %127, %131 : vector<8x8xf32>
    %133 = arith.truncf %132 : vector<8x8xf32> to vector<8x8xbf16>
    %134 = vector.extract_strided_slice %113 {offsets = [0, 0], sizes = [8, 8], strides = [1, 1]} : vector<8x32xf32> to vector<8x8xf32>
    %135 = arith.truncf %134 : vector<8x8xf32> to vector<8x8xbf16>
    %cst_37 = arith.constant dense<0.000000e+00> : vector<8x8xf32>
    %136 = tpu.matmul %133, %135, %cst_37 {dimension_numbers = #tpu.dot_dimension_numbers<[1], [0], [0], [1], [0, 0, 1, 1], [], []>} : vector<8x8xbf16>, vector<8x8xbf16>, vector<8x8xf32> -> vector<8x8xf32>
    %137 = vector.extract_strided_slice %111 {offsets = [0, 8], sizes = [8, 8], strides = [1, 1]} : vector<8x32xf32> to vector<8x8xf32>
    %138 = arith.truncf %137 : vector<8x8xf32> to vector<8x8xbf16>
    %139 = vector.extract_strided_slice %112 {offsets = [0, 8], sizes = [8, 8], strides = [1, 1]} : vector<8x32xf32> to vector<8x8xf32>
    %140 = arith.truncf %139 : vector<8x8xf32> to vector<8x8xbf16>
    %cst_38 = arith.constant dense<0.000000e+00> : vector<8x8xf32>
    %141 = tpu.matmul %138, %140, %cst_38 {dimension_numbers = #tpu.dot_dimension_numbers<[1], [1], [0], [0], [0, 0, 1, 0], [], []>} : vector<8x8xbf16>, vector<8x8xbf16>, vector<8x8xf32> -> vector<8x8xf32>
    %142 = vector.broadcast %115 : vector<1x8xf32> to vector<8x8xf32>
    %143 = arith.addf %141, %142 : vector<8x8xf32>
    %cst_39 = arith.constant dense<0xFF800000> : vector<8xf32>
    %144 = vector.multi_reduction <maximumf>, %143, %cst_39 [1] : vector<8x8xf32> to vector<8xf32>
    %145 = vector.shape_cast %144 : vector<8xf32> to vector<8x1xf32>
    %146 = vector.broadcast %145 : vector<8x1xf32> to vector<8x8xf32>
    %147 = arith.subf %143, %146 : vector<8x8xf32>
    %148 = math.exp %147 : vector<8x8xf32>
    %cst_40 = arith.constant dense<0.000000e+00> : vector<8xf32>
    %149 = vector.multi_reduction <add>, %148, %cst_40 [1] : vector<8x8xf32> to vector<8xf32>
    %150 = vector.shape_cast %149 : vector<8xf32> to vector<8x1xf32>
    %151 = tpu.reciprocal %150 {approx = true} : vector<8x1xf32> -> vector<8x1xf32>
    %152 = vector.broadcast %151 : vector<8x1xf32> to vector<8x8xf32>
    %153 = arith.mulf %148, %152 : vector<8x8xf32>
    %154 = arith.truncf %153 : vector<8x8xf32> to vector<8x8xbf16>
    %155 = vector.extract_strided_slice %113 {offsets = [0, 8], sizes = [8, 8], strides = [1, 1]} : vector<8x32xf32> to vector<8x8xf32>
    %156 = arith.truncf %155 : vector<8x8xf32> to vector<8x8xbf16>
    %cst_41 = arith.constant dense<0.000000e+00> : vector<8x8xf32>
    %157 = tpu.matmul %154, %156, %cst_41 {dimension_numbers = #tpu.dot_dimension_numbers<[1], [0], [0], [1], [0, 0, 1, 1], [], []>} : vector<8x8xbf16>, vector<8x8xbf16>, vector<8x8xf32> -> vector<8x8xf32>
    %158 = vector.extract_strided_slice %111 {offsets = [0, 16], sizes = [8, 8], strides = [1, 1]} : vector<8x32xf32> to vector<8x8xf32>
    %159 = arith.truncf %158 : vector<8x8xf32> to vector<8x8xbf16>
    %160 = vector.extract_strided_slice %112 {offsets = [0, 16], sizes = [8, 8], strides = [1, 1]} : vector<8x32xf32> to vector<8x8xf32>
    %161 = arith.truncf %160 : vector<8x8xf32> to vector<8x8xbf16>
    %cst_42 = arith.constant dense<0.000000e+00> : vector<8x8xf32>
    %162 = tpu.matmul %159, %161, %cst_42 {dimension_numbers = #tpu.dot_dimension_numbers<[1], [1], [0], [0], [0, 0, 1, 0], [], []>} : vector<8x8xbf16>, vector<8x8xbf16>, vector<8x8xf32> -> vector<8x8xf32>
    %163 = vector.broadcast %115 : vector<1x8xf32> to vector<8x8xf32>
    %164 = arith.addf %162, %163 : vector<8x8xf32>
    %cst_43 = arith.constant dense<0xFF800000> : vector<8xf32>
    %165 = vector.multi_reduction <maximumf>, %164, %cst_43 [1] : vector<8x8xf32> to vector<8xf32>
    %166 = vector.shape_cast %165 : vector<8xf32> to vector<8x1xf32>
    %167 = vector.broadcast %166 : vector<8x1xf32> to vector<8x8xf32>
    %168 = arith.subf %164, %167 : vector<8x8xf32>
    %169 = math.exp %168 : vector<8x8xf32>
    %cst_44 = arith.constant dense<0.000000e+00> : vector<8xf32>
    %170 = vector.multi_reduction <add>, %169, %cst_44 [1] : vector<8x8xf32> to vector<8xf32>
    %171 = vector.shape_cast %170 : vector<8xf32> to vector<8x1xf32>
    %172 = tpu.reciprocal %171 {approx = true} : vector<8x1xf32> -> vector<8x1xf32>
    %173 = vector.broadcast %172 : vector<8x1xf32> to vector<8x8xf32>
    %174 = arith.mulf %169, %173 : vector<8x8xf32>
    %175 = arith.truncf %174 : vector<8x8xf32> to vector<8x8xbf16>
    %176 = vector.extract_strided_slice %113 {offsets = [0, 16], sizes = [8, 8], strides = [1, 1]} : vector<8x32xf32> to vector<8x8xf32>
    %177 = arith.truncf %176 : vector<8x8xf32> to vector<8x8xbf16>
    %cst_45 = arith.constant dense<0.000000e+00> : vector<8x8xf32>
    %178 = tpu.matmul %175, %177, %cst_45 {dimension_numbers = #tpu.dot_dimension_numbers<[1], [0], [0], [1], [0, 0, 1, 1], [], []>} : vector<8x8xbf16>, vector<8x8xbf16>, vector<8x8xf32> -> vector<8x8xf32>
    %179 = vector.extract_strided_slice %111 {offsets = [0, 24], sizes = [8, 8], strides = [1, 1]} : vector<8x32xf32> to vector<8x8xf32>
    %180 = arith.truncf %179 : vector<8x8xf32> to vector<8x8xbf16>
    %181 = vector.extract_strided_slice %112 {offsets = [0, 24], sizes = [8, 8], strides = [1, 1]} : vector<8x32xf32> to vector<8x8xf32>
    %182 = arith.truncf %181 : vector<8x8xf32> to vector<8x8xbf16>
    %cst_46 = arith.constant dense<0.000000e+00> : vector<8x8xf32>
    %183 = tpu.matmul %180, %182, %cst_46 {dimension_numbers = #tpu.dot_dimension_numbers<[1], [1], [0], [0], [0, 0, 1, 0], [], []>} : vector<8x8xbf16>, vector<8x8xbf16>, vector<8x8xf32> -> vector<8x8xf32>
    %184 = vector.broadcast %115 : vector<1x8xf32> to vector<8x8xf32>
    %185 = arith.addf %183, %184 : vector<8x8xf32>
    %cst_47 = arith.constant dense<0xFF800000> : vector<8xf32>
    %186 = vector.multi_reduction <maximumf>, %185, %cst_47 [1] : vector<8x8xf32> to vector<8xf32>
    %187 = vector.shape_cast %186 : vector<8xf32> to vector<8x1xf32>
    %188 = vector.broadcast %187 : vector<8x1xf32> to vector<8x8xf32>
    %189 = arith.subf %185, %188 : vector<8x8xf32>
    %190 = math.exp %189 : vector<8x8xf32>
    %cst_48 = arith.constant dense<0.000000e+00> : vector<8xf32>
    %191 = vector.multi_reduction <add>, %190, %cst_48 [1] : vector<8x8xf32> to vector<8xf32>
    %192 = vector.shape_cast %191 : vector<8xf32> to vector<8x1xf32>
    %193 = tpu.reciprocal %192 {approx = true} : vector<8x1xf32> -> vector<8x1xf32>
    %194 = vector.broadcast %193 : vector<8x1xf32> to vector<8x8xf32>
    %195 = arith.mulf %190, %194 : vector<8x8xf32>
    %196 = arith.truncf %195 : vector<8x8xf32> to vector<8x8xbf16>
    %197 = vector.extract_strided_slice %113 {offsets = [0, 24], sizes = [8, 8], strides = [1, 1]} : vector<8x32xf32> to vector<8x8xf32>
    %198 = arith.truncf %197 : vector<8x8xf32> to vector<8x8xbf16>
    %cst_49 = arith.constant dense<0.000000e+00> : vector<8x8xf32>
    %199 = tpu.matmul %196, %198, %cst_49 {dimension_numbers = #tpu.dot_dimension_numbers<[1], [0], [0], [1], [0, 0, 1, 1], [], []>} : vector<8x8xbf16>, vector<8x8xbf16>, vector<8x8xf32> -> vector<8x8xf32>
    %200 = tpu.concatenate %136, %157, %178, %199 in 1 : vector<8x8xf32>, vector<8x8xf32>, vector<8x8xf32>, vector<8x8xf32> -> vector<8x32xf32>
    %201 = tpu.concatenate %110, %200 in 0 : vector<8x32xf32>, vector<8x32xf32> -> vector<16x32xf32>
    %202 = arith.truncf %201 : vector<16x32xf32> to vector<16x32xbf16>
    %cst_50 = arith.constant dense<0.000000e+00> : vector<16x32xf32>
    %203 = tpu.matmul %202, %18, %cst_50 {dimension_numbers = #tpu.dot_dimension_numbers<[1], [0], [0], [1], [0, 0, 1, 1], [], []>} : vector<16x32xbf16>, vector<32x32xbf16>, vector<16x32xf32> -> vector<16x32xf32>
    %204 = vector.broadcast %20 : vector<1x32xf32> to vector<16x32xf32>
    %205 = arith.addf %203, %204 : vector<16x32xf32>
    %206 = arith.addf %4, %205 : vector<16x32xf32>
    %c0_51 = arith.constant 0 : index
    %c0_52 = arith.constant 0 : index
    %c0_53 = arith.constant 0 : index
    %207 = vector.load %arg8[%c0_51, %c0_52, %c0_53] : memref<1x1x32xf32, #tpu.memory_space<vmem>>, vector<1x1x32xf32>
    %208 = vector.shape_cast %207 : vector<1x1x32xf32> to vector<1x32xf32>
    %c0_54 = arith.constant 0 : index
    %c0_55 = arith.constant 0 : index
    %c0_56 = arith.constant 0 : index
    %209 = vector.load %arg9[%c0_54, %c0_55, %c0_56] : memref<1x1x32xf32, #tpu.memory_space<vmem>>, vector<1x1x32xf32>
    %210 = vector.shape_cast %209 : vector<1x1x32xf32> to vector<1x32xf32>
    %cst_57 = arith.constant dense<0.000000e+00> : vector<16xf32>
    %211 = vector.multi_reduction <add>, %206, %cst_57 [1] : vector<16x32xf32> to vector<16xf32>
    %212 = vector.shape_cast %211 : vector<16xf32> to vector<16x1xf32>
    %cst_58 = arith.constant 3.200000e+01 : f32
    %213 = vector.broadcast %cst_58 : f32 to vector<16x1xf32>
    %214 = arith.divf %212, %213 : vector<16x1xf32>
    %215 = vector.broadcast %214 : vector<16x1xf32> to vector<16x32xf32>
    %216 = arith.subf %206, %215 : vector<16x32xf32>
    %217 = arith.mulf %216, %216 : vector<16x32xf32>
    %cst_59 = arith.constant dense<0.000000e+00> : vector<16xf32>
    %218 = vector.multi_reduction <add>, %217, %cst_59 [1] : vector<16x32xf32> to vector<16xf32>
    %219 = vector.shape_cast %218 : vector<16xf32> to vector<16x1xf32>
    %cst_60 = arith.constant 3.200000e+01 : f32
    %220 = vector.broadcast %cst_60 : f32 to vector<16x1xf32>
    %221 = arith.divf %219, %220 : vector<16x1xf32>
    %cst_61 = arith.constant 9.99999974E-6 : f32
    %222 = vector.broadcast %cst_61 : f32 to vector<16x1xf32>
    %223 = arith.addf %221, %222 : vector<16x1xf32>
    %224 = math.rsqrt %223 : vector<16x1xf32>
    %225 = vector.broadcast %224 : vector<16x1xf32> to vector<16x32xf32>
    %226 = arith.mulf %216, %225 : vector<16x32xf32>
    %227 = vector.broadcast %208 : vector<1x32xf32> to vector<16x32xf32>
    %228 = arith.mulf %226, %227 : vector<16x32xf32>
    %229 = vector.broadcast %210 : vector<1x32xf32> to vector<16x32xf32>
    %230 = arith.addf %228, %229 : vector<16x32xf32>
    %231 = arith.truncf %230 : vector<16x32xf32> to vector<16x32xbf16>
    %c0_62 = arith.constant 0 : index
    %c0_63 = arith.constant 0 : index
    %c0_64 = arith.constant 0 : index
    %232 = vector.load %arg10[%c0_62, %c0_63, %c0_64] : memref<1x32x128xbf16, #tpu.memory_space<vmem>>, vector<1x32x128xbf16>
    %233 = vector.shape_cast %232 : vector<1x32x128xbf16> to vector<32x128xbf16>
    %cst_65 = arith.constant dense<0.000000e+00> : vector<16x128xf32>
    %234 = tpu.matmul %231, %233, %cst_65 {dimension_numbers = #tpu.dot_dimension_numbers<[1], [0], [0], [1], [0, 0, 1, 1], [], []>} : vector<16x32xbf16>, vector<32x128xbf16>, vector<16x128xf32> -> vector<16x128xf32>
    %c0_66 = arith.constant 0 : index
    %c0_67 = arith.constant 0 : index
    %c0_68 = arith.constant 0 : index
    %235 = vector.load %arg11[%c0_66, %c0_67, %c0_68] : memref<1x1x128xf32, #tpu.memory_space<vmem>>, vector<1x1x128xf32>
    %236 = vector.shape_cast %235 : vector<1x1x128xf32> to vector<1x128xf32>
    %237 = vector.broadcast %236 : vector<1x128xf32> to vector<16x128xf32>
    %238 = arith.addf %234, %237 : vector<16x128xf32>
    %cst_69 = arith.constant 0.000000e+00 : f32
    %239 = vector.broadcast %cst_69 : f32 to vector<16x128xf32>
    %240 = arith.maximumf %238, %239 : vector<16x128xf32>
    %241 = arith.truncf %240 : vector<16x128xf32> to vector<16x128xbf16>
    %c0_70 = arith.constant 0 : index
    %c0_71 = arith.constant 0 : index
    %c0_72 = arith.constant 0 : index
    %242 = vector.load %arg12[%c0_70, %c0_71, %c0_72] : memref<1x128x32xbf16, #tpu.memory_space<vmem>>, vector<1x128x32xbf16>
    %243 = vector.shape_cast %242 : vector<1x128x32xbf16> to vector<128x32xbf16>
    %cst_73 = arith.constant dense<0.000000e+00> : vector<16x32xf32>
    %244 = tpu.matmul %241, %243, %cst_73 {dimension_numbers = #tpu.dot_dimension_numbers<[1], [0], [0], [1], [0, 0, 1, 1], [], []>} : vector<16x128xbf16>, vector<128x32xbf16>, vector<16x32xf32> -> vector<16x32xf32>
    %c0_74 = arith.constant 0 : index
    %c0_75 = arith.constant 0 : index
    %c0_76 = arith.constant 0 : index
    %245 = vector.load %arg13[%c0_74, %c0_75, %c0_76] : memref<1x1x32xf32, #tpu.memory_space<vmem>>, vector<1x1x32xf32>
    %246 = vector.shape_cast %245 : vector<1x1x32xf32> to vector<1x32xf32>
    %247 = vector.broadcast %246 : vector<1x32xf32> to vector<16x32xf32>
    %248 = arith.addf %244, %247 : vector<16x32xf32>
    %249 = arith.addf %230, %248 : vector<16x32xf32>
    %c0_77 = arith.constant 0 : index
    %c0_78 = arith.constant 0 : index
    %c0_79 = arith.constant 0 : index
    %250 = vector.load %arg14[%c0_77, %c0_78, %c0_79] : memref<1x1x32xf32, #tpu.memory_space<vmem>>, vector<1x1x32xf32>
    %251 = vector.shape_cast %250 : vector<1x1x32xf32> to vector<1x32xf32>
    %c0_80 = arith.constant 0 : index
    %c0_81 = arith.constant 0 : index
    %c0_82 = arith.constant 0 : index
    %252 = vector.load %arg15[%c0_80, %c0_81, %c0_82] : memref<1x1x32xf32, #tpu.memory_space<vmem>>, vector<1x1x32xf32>
    %253 = vector.shape_cast %252 : vector<1x1x32xf32> to vector<1x32xf32>
    %cst_83 = arith.constant dense<0.000000e+00> : vector<16xf32>
    %254 = vector.multi_reduction <add>, %249, %cst_83 [1] : vector<16x32xf32> to vector<16xf32>
    %255 = vector.shape_cast %254 : vector<16xf32> to vector<16x1xf32>
    %cst_84 = arith.constant 3.200000e+01 : f32
    %256 = vector.broadcast %cst_84 : f32 to vector<16x1xf32>
    %257 = arith.divf %255, %256 : vector<16x1xf32>
    %258 = vector.broadcast %257 : vector<16x1xf32> to vector<16x32xf32>
    %259 = arith.subf %249, %258 : vector<16x32xf32>
    %260 = arith.mulf %259, %259 : vector<16x32xf32>
    %cst_85 = arith.constant dense<0.000000e+00> : vector<16xf32>
    %261 = vector.multi_reduction <add>, %260, %cst_85 [1] : vector<16x32xf32> to vector<16xf32>
    %262 = vector.shape_cast %261 : vector<16xf32> to vector<16x1xf32>
    %cst_86 = arith.constant 3.200000e+01 : f32
    %263 = vector.broadcast %cst_86 : f32 to vector<16x1xf32>
    %264 = arith.divf %262, %263 : vector<16x1xf32>
    %cst_87 = arith.constant 9.99999974E-6 : f32
    %265 = vector.broadcast %cst_87 : f32 to vector<16x1xf32>
    %266 = arith.addf %264, %265 : vector<16x1xf32>
    %267 = math.rsqrt %266 : vector<16x1xf32>
    %268 = vector.broadcast %267 : vector<16x1xf32> to vector<16x32xf32>
    %269 = arith.mulf %259, %268 : vector<16x32xf32>
    %270 = vector.broadcast %251 : vector<1x32xf32> to vector<16x32xf32>
    %271 = arith.mulf %269, %270 : vector<16x32xf32>
    %272 = vector.broadcast %253 : vector<1x32xf32> to vector<16x32xf32>
    %273 = arith.addf %271, %272 : vector<16x32xf32>
    %274 = vector.shape_cast %273 : vector<16x32xf32> to vector<2x8x32xf32>
    %c0_88 = arith.constant 0 : index
    %c0_89 = arith.constant 0 : index
    %c0_90 = arith.constant 0 : index
    %275 = vector.load %arg17[%c0_88, %c0_89, %c0_90] : memref<2x8x32xf32, #tpu.memory_space<vmem>>, vector<2x8x32xf32>
    tpu.vector_store %arg17[%c0_88, %c0_89, %c0_90], %274 {strides = array<i32>} : memref<2x8x32xf32, #tpu.memory_space<vmem>>, vector<2x8x32xf32>,
    %c1_i32 = arith.constant 1 : i32
    %276 = arith.cmpi eq, %arg1, %c1_i32 : i32
    %277 = arith.extui %276 : i1 to i32
    %c0_i32_91 = arith.constant 0 : i32
    %278 = arith.cmpi ne, %277, %c0_i32_91 : i32
    scf.if %278 {
      %279 = vector.shape_cast %273 : vector<16x32xf32> to vector<2x8x32xf32>
      %280 = arith.truncf %279 : vector<2x8x32xf32> to vector<2x8x32xbf16>
      %c0_92 = arith.constant 0 : index
      %c0_93 = arith.constant 0 : index
      %c0_94 = arith.constant 0 : index
      %281 = vector.load %arg16[%c0_92, %c0_93, %c0_94] : memref<2x8x32xbf16, #tpu.memory_space<vmem>>, vector<2x8x32xbf16>
      tpu.vector_store %arg16[%c0_92, %c0_93, %c0_94], %280 {strides = array<i32>} : memref<2x8x32xbf16, #tpu.memory_space<vmem>>, vector<2x8x32xbf16>,
    } else {
    }
    return
  }
  func.func @transform_0(%arg0: i32, %arg1: i32) -> (i32, i32, i32) {
    %c0_i32 = arith.constant 0 : i32
    %c0_i32_0 = arith.constant 0 : i32
    %c0_i32_1 = arith.constant 0 : i32
    return %arg0, %c0_i32, %c0_i32_0 : i32, i32, i32
  }
  func.func @transform_1(%arg0: i32, %arg1: i32) -> (i32, i32, i32) {
    %c0_i32 = arith.constant 0 : i32
    %c0_i32_0 = arith.constant 0 : i32
    %c0_i32_1 = arith.constant 0 : i32
    return %arg0, %c0_i32, %c0_i32_0 : i32, i32, i32
  }
  func.func @transform_2(%arg0: i32, %arg1: i32) -> (i32, i32, i32) {
    %c0_i32 = arith.constant 0 : i32
    %c0_i32_0 = arith.constant 0 : i32
    %c0_i32_1 = arith.constant 0 : i32
    return %arg1, %c0_i32, %c0_i32_0 : i32, i32, i32
  }
  func.func @transform_3(%arg0: i32, %arg1: i32) -> (i32, i32, i32) {
    %c0_i32 = arith.constant 0 : i32
    %c0_i32_0 = arith.constant 0 : i32
    %c0_i32_1 = arith.constant 0 : i32
    return %arg1, %c0_i32, %c0_i32_0 : i32, i32, i32
  }
  func.func @transform_4(%arg0: i32, %arg1: i32) -> (i32, i32, i32) {
    %c0_i32 = arith.constant 0 : i32
    %c0_i32_0 = arith.constant 0 : i32
    %c0_i32_1 = arith.constant 0 : i32
    return %arg1, %c0_i32, %c0_i32_0 : i32, i32, i32
  }
  func.func @transform_5(%arg0: i32, %arg1: i32) -> (i32, i32, i32) {
    %c0_i32 = arith.constant 0 : i32
    %c0_i32_0 = arith.constant 0 : i32
    %c0_i32_1 = arith.constant 0 : i32
    return %arg1, %c0_i32, %c0_i32_0 : i32, i32, i32
  }
  func.func @transform_6(%arg0: i32, %arg1: i32) -> (i32, i32, i32) {
    %c0_i32 = arith.constant 0 : i32
    %c0_i32_0 = arith.constant 0 : i32
    %c0_i32_1 = arith.constant 0 : i32
    return %arg1, %c0_i32, %c0_i32_0 : i32, i32, i32
  }
  func.func @transform_7(%arg0: i32, %arg1: i32) -> (i32, i32, i32) {
    %c0_i32 = arith.constant 0 : i32
    %c0_i32_0 = arith.constant 0 : i32
    %c0_i32_1 = arith.constant 0 : i32
    return %arg1, %c0_i32, %c0_i32_0 : i32, i32, i32
  }
  func.func @transform_8(%arg0: i32, %arg1: i32) -> (i32, i32, i32) {
    %c0_i32 = arith.constant 0 : i32
    %c0_i32_0 = arith.constant 0 : i32
    %c0_i32_1 = arith.constant 0 : i32
    return %arg1, %c0_i32, %c0_i32_0 : i32, i32, i32
  }
  func.func @transform_9(%arg0: i32, %arg1: i32) -> (i32, i32, i32) {
    %c0_i32 = arith.constant 0 : i32
    %c0_i32_0 = arith.constant 0 : i32
    %c0_i32_1 = arith.constant 0 : i32
    return %arg1, %c0_i32, %c0_i32_0 : i32, i32, i32
  }
  func.func @transform_10(%arg0: i32, %arg1: i32) -> (i32, i32, i32) {
    %c0_i32 = arith.constant 0 : i32
    %c0_i32_0 = arith.constant 0 : i32
    %c0_i32_1 = arith.constant 0 : i32
    return %arg1, %c0_i32, %c0_i32_0 : i32, i32, i32
  }
  func.func @transform_11(%arg0: i32, %arg1: i32) -> (i32, i32, i32) {
    %c0_i32 = arith.constant 0 : i32
    %c0_i32_0 = arith.constant 0 : i32
    %c0_i32_1 = arith.constant 0 : i32
    return %arg1, %c0_i32, %c0_i32_0 : i32, i32, i32
  }
  func.func @transform_12(%arg0: i32, %arg1: i32) -> (i32, i32, i32) {
    %c0_i32 = arith.constant 0 : i32
    %c0_i32_0 = arith.constant 0 : i32
    %c0_i32_1 = arith.constant 0 : i32
    return %arg1, %c0_i32, %c0_i32_0 : i32, i32, i32
  }
  func.func @transform_13(%arg0: i32, %arg1: i32) -> (i32, i32, i32) {
    %c0_i32 = arith.constant 0 : i32
    %c0_i32_0 = arith.constant 0 : i32
    %c0_i32_1 = arith.constant 0 : i32
    return %arg1, %c0_i32, %c0_i32_0 : i32, i32, i32
  }
  func.func @transform_14(%arg0: i32, %arg1: i32) -> (i32, i32, i32) {
    %c0_i32 = arith.constant 0 : i32
    %c0_i32_0 = arith.constant 0 : i32
    %c0_i32_1 = arith.constant 0 : i32
    return %arg0, %c0_i32, %c0_i32_0 : i32, i32, i32
  }
}

module attributes {stable_mosaic.version = 11 : i64} {
  func.func @_linear_kernel(%arg0: i32, %arg1: i32, %arg2: memref<16x32xbf16, #tpu.memory_space<vmem>>, %arg3: memref<32x64xbf16, #tpu.memory_space<vmem>>, %arg4: memref<1x64xf32, #tpu.memory_space<vmem>>, %arg5: memref<16x64xf32, #tpu.memory_space<vmem>>) attributes {dimension_semantics = [#tpu.dimension_semantics<parallel>, #tpu.dimension_semantics<parallel>], iteration_bounds = array<i64: 1, 1>, scalar_prefetch = 0 : i64, scratch_operands = 0 : i64, tpu.core_type = #tpu.core_type<tc>, window_params = [{transform_indices = @transform_0, window_bounds = array<i64: 16, 32>}, {transform_indices = @transform_1, window_bounds = array<i64: 32, 64>}, {transform_indices = @transform_2, window_bounds = array<i64: 1, 64>}, {transform_indices = @transform_3, window_bounds = array<i64: 16, 64>}]} {
    %c0 = arith.constant 0 : index
    %c0_0 = arith.constant 0 : index
    %0 = vector.load %arg2[%c0, %c0_0] : memref<16x32xbf16, #tpu.memory_space<vmem>>, vector<16x32xbf16>
    %c0_1 = arith.constant 0 : index
    %c0_2 = arith.constant 0 : index
    %1 = vector.load %arg3[%c0_1, %c0_2] : memref<32x64xbf16, #tpu.memory_space<vmem>>, vector<32x64xbf16>
    %cst = arith.constant dense<0.000000e+00> : vector<16x64xf32>
    %2 = tpu.matmul %0, %1, %cst {dimension_numbers = #tpu.dot_dimension_numbers<[1], [0], [0], [1], [0, 0, 1, 1], [], []>} : vector<16x32xbf16>, vector<32x64xbf16>, vector<16x64xf32> -> vector<16x64xf32>
    %c0_3 = arith.constant 0 : index
    %c0_4 = arith.constant 0 : index
    %3 = vector.load %arg4[%c0_3, %c0_4] : memref<1x64xf32, #tpu.memory_space<vmem>>, vector<1x64xf32>
    %4 = vector.broadcast %3 : vector<1x64xf32> to vector<16x64xf32>
    %5 = arith.addf %2, %4 : vector<16x64xf32>
    %c0_5 = arith.constant 0 : index
    %c0_6 = arith.constant 0 : index
    %6 = vector.load %arg5[%c0_5, %c0_6] : memref<16x64xf32, #tpu.memory_space<vmem>>, vector<16x64xf32>
    tpu.vector_store %arg5[%c0_5, %c0_6], %5 {strides = array<i32>} : memref<16x64xf32, #tpu.memory_space<vmem>>, vector<16x64xf32>,
    return
  }
  func.func @transform_0(%arg0: i32, %arg1: i32) -> (i32, i32) {
    %c0_i32 = arith.constant 0 : i32
    %c0_i32_0 = arith.constant 0 : i32
    return %arg1, %c0_i32 : i32, i32
  }
  func.func @transform_1(%arg0: i32, %arg1: i32) -> (i32, i32) {
    %c0_i32 = arith.constant 0 : i32
    %c0_i32_0 = arith.constant 0 : i32
    return %c0_i32, %arg0 : i32, i32
  }
  func.func @transform_2(%arg0: i32, %arg1: i32) -> (i32, i32) {
    %c0_i32 = arith.constant 0 : i32
    %c0_i32_0 = arith.constant 0 : i32
    return %c0_i32, %arg0 : i32, i32
  }
  func.func @transform_3(%arg0: i32, %arg1: i32) -> (i32, i32) {
    %c0_i32 = arith.constant 0 : i32
    return %arg1, %arg0 : i32, i32
  }
}

module attributes {stable_mosaic.version = 11 : i64} {
  func.func @_dec_stack_kernel(%arg0: i32, %arg1: i32, %arg2: memref<2x8x32xbf16, #tpu.memory_space<vmem>>, %arg3: memref<2x8x32xbf16, #tpu.memory_space<vmem>>, %arg4: memref<2x1x8xf32, #tpu.memory_space<vmem>>, %arg5: memref<2x1x8xf32, #tpu.memory_space<vmem>>, %arg6: memref<1x32x96xbf16, #tpu.memory_space<vmem>>, %arg7: memref<1x1x96xf32, #tpu.memory_space<vmem>>, %arg8: memref<1x32x32xbf16, #tpu.memory_space<vmem>>, %arg9: memref<1x1x32xf32, #tpu.memory_space<vmem>>, %arg10: memref<1x32x32xbf16, #tpu.memory_space<vmem>>, %arg11: memref<1x1x32xf32, #tpu.memory_space<vmem>>, %arg12: memref<1x32x64xbf16, #tpu.memory_space<vmem>>, %arg13: memref<1x1x64xf32, #tpu.memory_space<vmem>>, %arg14: memref<1x32x32xbf16, #tpu.memory_space<vmem>>, %arg15: memref<1x1x32xf32, #tpu.memory_space<vmem>>, %arg16: memref<1x1x32xf32, #tpu.memory_space<vmem>>, %arg17: memref<1x1x32xf32, #tpu.memory_space<vmem>>, %arg18: memref<1x1x32xf32, #tpu.memory_space<vmem>>, %arg19: memref<1x1x32xf32, #tpu.memory_space<vmem>>, %arg20: memref<1x1x32xf32, #tpu.memory_space<vmem>>, %arg21: memref<1x1x32xf32, #tpu.memory_space<vmem>>, %arg22: memref<1x32x128xbf16, #tpu.memory_space<vmem>>, %arg23: memref<1x1x128xf32, #tpu.memory_space<vmem>>, %arg24: memref<1x128x32xbf16, #tpu.memory_space<vmem>>, %arg25: memref<1x1x32xf32, #tpu.memory_space<vmem>>, %arg26: memref<2x8x32xbf16, #tpu.memory_space<vmem>>, %arg27: memref<2x8x32xf32, #tpu.memory_space<vmem>>) attributes {dimension_semantics = [#tpu.dimension_semantics<parallel>, #tpu.dimension_semantics<arbitrary>], iteration_bounds = array<i64: 1, 2>, scalar_prefetch = 0 : i64, scratch_operands = 1 : i64, tpu.core_type = #tpu.core_type<tc>, window_params = [{transform_indices = @transform_0, window_bounds = array<i64: 2, 8, 32>}, {transform_indices = @transform_1, window_bounds = array<i64: 2, 8, 32>}, {transform_indices = @transform_2, window_bounds = array<i64: 2, 1, 8>}, {transform_indices = @transform_3, window_bounds = array<i64: 2, 1, 8>}, {transform_indices = @transform_4, window_bounds = array<i64: 1, 32, 96>}, {transform_indices = @transform_5, window_bounds = array<i64: 1, 1, 96>}, {transform_indices = @transform_6, window_bounds = array<i64: 1, 32, 32>}, {transform_indices = @transform_7, window_bounds = array<i64: 1, 1, 32>}, {transform_indices = @transform_8, window_bounds = array<i64: 1, 32, 32>}, {transform_indices = @transform_9, window_bounds = array<i64: 1, 1, 32>}, {transform_indices = @transform_10, window_bounds = array<i64: 1, 32, 64>}, {transform_indices = @transform_11, window_bounds = array<i64: 1, 1, 64>}, {transform_indices = @transform_12, window_bounds = array<i64: 1, 32, 32>}, {transform_indices = @transform_13, window_bounds = array<i64: 1, 1, 32>}, {transform_indices = @transform_14, window_bounds = array<i64: 1, 1, 32>}, {transform_indices = @transform_15, window_bounds = array<i64: 1, 1, 32>}, {transform_indices = @transform_16, window_bounds = array<i64: 1, 1, 32>}, {transform_indices = @transform_17, window_bounds = array<i64: 1, 1, 32>}, {transform_indices = @transform_18, window_bounds = array<i64: 1, 1, 32>}, {transform_indices = @transform_19, window_bounds = array<i64: 1, 1, 32>}, {transform_indices = @transform_20, window_bounds = array<i64: 1, 32, 128>}, {transform_indices = @transform_21, window_bounds = array<i64: 1, 1, 128>}, {transform_indices = @transform_22, window_bounds = array<i64: 1, 128, 32>}, {transform_indices = @transform_23, window_bounds = array<i64: 1, 1, 32>}, {transform_indices = @transform_24, window_bounds = array<i64: 2, 8, 32>}]} {
    %c0_i32 = arith.constant 0 : i32
    %0 = arith.cmpi eq, %arg1, %c0_i32 : i32
    %1 = arith.extui %0 : i1 to i32
    %c0_i32_0 = arith.constant 0 : i32
    %2 = arith.cmpi ne, %1, %c0_i32_0 : i32
    scf.if %2 {
      %c0_164 = arith.constant 0 : index
      %c0_165 = arith.constant 0 : index
      %c0_166 = arith.constant 0 : index
      %515 = vector.load %arg2[%c0_164, %c0_165, %c0_166] : memref<2x8x32xbf16, #tpu.memory_space<vmem>>, vector<2x8x32xbf16>
      %516 = arith.extf %515 : vector<2x8x32xbf16> to vector<2x8x32xf32>
      %c0_167 = arith.constant 0 : index
      %c0_168 = arith.constant 0 : index
      %c0_169 = arith.constant 0 : index
      %517 = vector.load %arg27[%c0_167, %c0_168, %c0_169] : memref<2x8x32xf32, #tpu.memory_space<vmem>>, vector<2x8x32xf32>
      tpu.vector_store %arg27[%c0_167, %c0_168, %c0_169], %516 {strides = array<i32>} : memref<2x8x32xf32, #tpu.memory_space<vmem>>, vector<2x8x32xf32>,
    } else {
    }
    %c0 = arith.constant 0 : index
    %c0_1 = arith.constant 0 : index
    %c0_2 = arith.constant 0 : index
    %3 = vector.load %arg27[%c0, %c0_1, %c0_2] : memref<2x8x32xf32, #tpu.memory_space<vmem>>, vector<2x8x32xf32>
    %4 = vector.shape_cast %3 : vector<2x8x32xf32> to vector<16x32xf32>
    %c0_3 = arith.constant 0 : index
    %c0_4 = arith.constant 0 : index
    %c0_5 = arith.constant 0 : index
    %5 = vector.load %arg3[%c0_3, %c0_4, %c0_5] : memref<2x8x32xbf16, #tpu.memory_space<vmem>>, vector<2x8x32xbf16>
    %6 = vector.shape_cast %5 : vector<2x8x32xbf16> to vector<16x32xbf16>
    %c0_6 = arith.constant 0 : index
    %c0_7 = arith.constant 0 : index
    %c0_8 = arith.constant 0 : index
    %7 = vector.load %arg4[%c0_6, %c0_7, %c0_8] : memref<2x1x8xf32, #tpu.memory_space<vmem>>, vector<2x1x8xf32>
    %c0_9 = arith.constant 0 : index
    %c0_10 = arith.constant 0 : index
    %c0_11 = arith.constant 0 : index
    %8 = vector.load %arg5[%c0_9, %c0_10, %c0_11] : memref<2x1x8xf32, #tpu.memory_space<vmem>>, vector<2x1x8xf32>
    %9 = tpu.iota {dimensions = array<i32: 0>} : vector<8x8xi32>
    %10 = tpu.iota {dimensions = array<i32: 1>} : vector<8x8xi32>
    %11 = arith.cmpi sgt, %10, %9 : vector<8x8xi32>
    %cst = arith.constant -1.000000e+30 : f32
    %cst_12 = arith.constant 0.000000e+00 : f32
    %12 = vector.broadcast %cst : f32 to vector<8x8xf32>
    %13 = vector.broadcast %cst_12 : f32 to vector<8x8xf32>
    %14 = arith.select %11, %12, %13 : vector<8x8xi1>, vector<8x8xf32>
    %15 = arith.truncf %4 : vector<16x32xf32> to vector<16x32xbf16>
    %c0_13 = arith.constant 0 : index
    %c0_14 = arith.constant 0 : index
    %c0_15 = arith.constant 0 : index
    %16 = vector.load %arg6[%c0_13, %c0_14, %c0_15] : memref<1x32x96xbf16, #tpu.memory_space<vmem>>, vector<1x32x96xbf16>
    %17 = vector.shape_cast %16 : vector<1x32x96xbf16> to vector<32x96xbf16>
    %cst_16 = arith.constant dense<0.000000e+00> : vector<16x96xf32>
    %18 = tpu.matmul %15, %17, %cst_16 {dimension_numbers = #tpu.dot_dimension_numbers<[1], [0], [0], [1], [0, 0, 1, 1], [], []>} : vector<16x32xbf16>, vector<32x96xbf16>, vector<16x96xf32> -> vector<16x96xf32>
    %c0_17 = arith.constant 0 : index
    %c0_18 = arith.constant 0 : index
    %c0_19 = arith.constant 0 : index
    %19 = vector.load %arg7[%c0_17, %c0_18, %c0_19] : memref<1x1x96xf32, #tpu.memory_space<vmem>>, vector<1x1x96xf32>
    %20 = vector.shape_cast %19 : vector<1x1x96xf32> to vector<1x96xf32>
    %21 = vector.broadcast %20 : vector<1x96xf32> to vector<16x96xf32>
    %22 = arith.addf %18, %21 : vector<16x96xf32>
    %23 = vector.extract_strided_slice %22 {offsets = [0, 0], sizes = [16, 32], strides = [1, 1]} : vector<16x96xf32> to vector<16x32xf32>
    %24 = vector.extract_strided_slice %22 {offsets = [0, 32], sizes = [16, 32], strides = [1, 1]} : vector<16x96xf32> to vector<16x32xf32>
    %25 = vector.extract_strided_slice %22 {offsets = [0, 64], sizes = [16, 32], strides = [1, 1]} : vector<16x96xf32> to vector<16x32xf32>
    %c0_20 = arith.constant 0 : index
    %c0_21 = arith.constant 0 : index
    %c0_22 = arith.constant 0 : index
    %26 = vector.load %arg8[%c0_20, %c0_21, %c0_22] : memref<1x32x32xbf16, #tpu.memory_space<vmem>>, vector<1x32x32xbf16>
    %27 = vector.shape_cast %26 : vector<1x32x32xbf16> to vector<32x32xbf16>
    %c0_23 = arith.constant 0 : index
    %c0_24 = arith.constant 0 : index
    %c0_25 = arith.constant 0 : index
    %28 = vector.load %arg9[%c0_23, %c0_24, %c0_25] : memref<1x1x32xf32, #tpu.memory_space<vmem>>, vector<1x1x32xf32>
    %29 = vector.shape_cast %28 : vector<1x1x32xf32> to vector<1x32xf32>
    %30 = vector.extract_strided_slice %23 {offsets = [0, 0], sizes = [8, 32], strides = [1, 1]} : vector<16x32xf32> to vector<8x32xf32>
    %31 = vector.extract_strided_slice %24 {offsets = [0, 0], sizes = [8, 32], strides = [1, 1]} : vector<16x32xf32> to vector<8x32xf32>
    %32 = vector.extract_strided_slice %25 {offsets = [0, 0], sizes = [8, 32], strides = [1, 1]} : vector<16x32xf32> to vector<8x32xf32>
    %33 = vector.extract_strided_slice %7 {offsets = [0, 0, 0], sizes = [1, 1, 8], strides = [1, 1, 1]} : vector<2x1x8xf32> to vector<1x1x8xf32>
    %34 = vector.shape_cast %33 : vector<1x1x8xf32> to vector<1x8xf32>
    %35 = vector.broadcast %34 : vector<1x8xf32> to vector<8x8xf32>
    %36 = arith.addf %14, %35 : vector<8x8xf32>
    %37 = vector.extract_strided_slice %30 {offsets = [0, 0], sizes = [8, 8], strides = [1, 1]} : vector<8x32xf32> to vector<8x8xf32>
    %38 = arith.truncf %37 : vector<8x8xf32> to vector<8x8xbf16>
    %39 = vector.extract_strided_slice %31 {offsets = [0, 0], sizes = [8, 8], strides = [1, 1]} : vector<8x32xf32> to vector<8x8xf32>
    %40 = arith.truncf %39 : vector<8x8xf32> to vector<8x8xbf16>
    %cst_26 = arith.constant dense<0.000000e+00> : vector<8x8xf32>
    %41 = tpu.matmul %38, %40, %cst_26 {dimension_numbers = #tpu.dot_dimension_numbers<[1], [1], [0], [0], [0, 0, 1, 0], [], []>} : vector<8x8xbf16>, vector<8x8xbf16>, vector<8x8xf32> -> vector<8x8xf32>
    %42 = arith.addf %41, %36 : vector<8x8xf32>
    %cst_27 = arith.constant dense<0xFF800000> : vector<8xf32>
    %43 = vector.multi_reduction <maximumf>, %42, %cst_27 [1] : vector<8x8xf32> to vector<8xf32>
    %44 = vector.shape_cast %43 : vector<8xf32> to vector<8x1xf32>
    %45 = vector.broadcast %44 : vector<8x1xf32> to vector<8x8xf32>
    %46 = arith.subf %42, %45 : vector<8x8xf32>
    %47 = math.exp %46 : vector<8x8xf32>
    %cst_28 = arith.constant dense<0.000000e+00> : vector<8xf32>
    %48 = vector.multi_reduction <add>, %47, %cst_28 [1] : vector<8x8xf32> to vector<8xf32>
    %49 = vector.shape_cast %48 : vector<8xf32> to vector<8x1xf32>
    %50 = tpu.reciprocal %49 {approx = true} : vector<8x1xf32> -> vector<8x1xf32>
    %51 = vector.broadcast %50 : vector<8x1xf32> to vector<8x8xf32>
    %52 = arith.mulf %47, %51 : vector<8x8xf32>
    %53 = arith.truncf %52 : vector<8x8xf32> to vector<8x8xbf16>
    %54 = vector.extract_strided_slice %32 {offsets = [0, 0], sizes = [8, 8], strides = [1, 1]} : vector<8x32xf32> to vector<8x8xf32>
    %55 = arith.truncf %54 : vector<8x8xf32> to vector<8x8xbf16>
    %cst_29 = arith.constant dense<0.000000e+00> : vector<8x8xf32>
    %56 = tpu.matmul %53, %55, %cst_29 {dimension_numbers = #tpu.dot_dimension_numbers<[1], [0], [0], [1], [0, 0, 1, 1], [], []>} : vector<8x8xbf16>, vector<8x8xbf16>, vector<8x8xf32> -> vector<8x8xf32>
    %57 = vector.extract_strided_slice %30 {offsets = [0, 8], sizes = [8, 8], strides = [1, 1]} : vector<8x32xf32> to vector<8x8xf32>
    %58 = arith.truncf %57 : vector<8x8xf32> to vector<8x8xbf16>
    %59 = vector.extract_strided_slice %31 {offsets = [0, 8], sizes = [8, 8], strides = [1, 1]} : vector<8x32xf32> to vector<8x8xf32>
    %60 = arith.truncf %59 : vector<8x8xf32> to vector<8x8xbf16>
    %cst_30 = arith.constant dense<0.000000e+00> : vector<8x8xf32>
    %61 = tpu.matmul %58, %60, %cst_30 {dimension_numbers = #tpu.dot_dimension_numbers<[1], [1], [0], [0], [0, 0, 1, 0], [], []>} : vector<8x8xbf16>, vector<8x8xbf16>, vector<8x8xf32> -> vector<8x8xf32>
    %62 = arith.addf %61, %36 : vector<8x8xf32>
    %cst_31 = arith.constant dense<0xFF800000> : vector<8xf32>
    %63 = vector.multi_reduction <maximumf>, %62, %cst_31 [1] : vector<8x8xf32> to vector<8xf32>
    %64 = vector.shape_cast %63 : vector<8xf32> to vector<8x1xf32>
    %65 = vector.broadcast %64 : vector<8x1xf32> to vector<8x8xf32>
    %66 = arith.subf %62, %65 : vector<8x8xf32>
    %67 = math.exp %66 : vector<8x8xf32>
    %cst_32 = arith.constant dense<0.000000e+00> : vector<8xf32>
    %68 = vector.multi_reduction <add>, %67, %cst_32 [1] : vector<8x8xf32> to vector<8xf32>
    %69 = vector.shape_cast %68 : vector<8xf32> to vector<8x1xf32>
    %70 = tpu.reciprocal %69 {approx = true} : vector<8x1xf32> -> vector<8x1xf32>
    %71 = vector.broadcast %70 : vector<8x1xf32> to vector<8x8xf32>
    %72 = arith.mulf %67, %71 : vector<8x8xf32>
    %73 = arith.truncf %72 : vector<8x8xf32> to vector<8x8xbf16>
    %74 = vector.extract_strided_slice %32 {offsets = [0, 8], sizes = [8, 8], strides = [1, 1]} : vector<8x32xf32> to vector<8x8xf32>
    %75 = arith.truncf %74 : vector<8x8xf32> to vector<8x8xbf16>
    %cst_33 = arith.constant dense<0.000000e+00> : vector<8x8xf32>
    %76 = tpu.matmul %73, %75, %cst_33 {dimension_numbers = #tpu.dot_dimension_numbers<[1], [0], [0], [1], [0, 0, 1, 1], [], []>} : vector<8x8xbf16>, vector<8x8xbf16>, vector<8x8xf32> -> vector<8x8xf32>
    %77 = vector.extract_strided_slice %30 {offsets = [0, 16], sizes = [8, 8], strides = [1, 1]} : vector<8x32xf32> to vector<8x8xf32>
    %78 = arith.truncf %77 : vector<8x8xf32> to vector<8x8xbf16>
    %79 = vector.extract_strided_slice %31 {offsets = [0, 16], sizes = [8, 8], strides = [1, 1]} : vector<8x32xf32> to vector<8x8xf32>
    %80 = arith.truncf %79 : vector<8x8xf32> to vector<8x8xbf16>
    %cst_34 = arith.constant dense<0.000000e+00> : vector<8x8xf32>
    %81 = tpu.matmul %78, %80, %cst_34 {dimension_numbers = #tpu.dot_dimension_numbers<[1], [1], [0], [0], [0, 0, 1, 0], [], []>} : vector<8x8xbf16>, vector<8x8xbf16>, vector<8x8xf32> -> vector<8x8xf32>
    %82 = arith.addf %81, %36 : vector<8x8xf32>
    %cst_35 = arith.constant dense<0xFF800000> : vector<8xf32>
    %83 = vector.multi_reduction <maximumf>, %82, %cst_35 [1] : vector<8x8xf32> to vector<8xf32>
    %84 = vector.shape_cast %83 : vector<8xf32> to vector<8x1xf32>
    %85 = vector.broadcast %84 : vector<8x1xf32> to vector<8x8xf32>
    %86 = arith.subf %82, %85 : vector<8x8xf32>
    %87 = math.exp %86 : vector<8x8xf32>
    %cst_36 = arith.constant dense<0.000000e+00> : vector<8xf32>
    %88 = vector.multi_reduction <add>, %87, %cst_36 [1] : vector<8x8xf32> to vector<8xf32>
    %89 = vector.shape_cast %88 : vector<8xf32> to vector<8x1xf32>
    %90 = tpu.reciprocal %89 {approx = true} : vector<8x1xf32> -> vector<8x1xf32>
    %91 = vector.broadcast %90 : vector<8x1xf32> to vector<8x8xf32>
    %92 = arith.mulf %87, %91 : vector<8x8xf32>
    %93 = arith.truncf %92 : vector<8x8xf32> to vector<8x8xbf16>
    %94 = vector.extract_strided_slice %32 {offsets = [0, 16], sizes = [8, 8], strides = [1, 1]} : vector<8x32xf32> to vector<8x8xf32>
    %95 = arith.truncf %94 : vector<8x8xf32> to vector<8x8xbf16>
    %cst_37 = arith.constant dense<0.000000e+00> : vector<8x8xf32>
    %96 = tpu.matmul %93, %95, %cst_37 {dimension_numbers = #tpu.dot_dimension_numbers<[1], [0], [0], [1], [0, 0, 1, 1], [], []>} : vector<8x8xbf16>, vector<8x8xbf16>, vector<8x8xf32> -> vector<8x8xf32>
    %97 = vector.extract_strided_slice %30 {offsets = [0, 24], sizes = [8, 8], strides = [1, 1]} : vector<8x32xf32> to vector<8x8xf32>
    %98 = arith.truncf %97 : vector<8x8xf32> to vector<8x8xbf16>
    %99 = vector.extract_strided_slice %31 {offsets = [0, 24], sizes = [8, 8], strides = [1, 1]} : vector<8x32xf32> to vector<8x8xf32>
    %100 = arith.truncf %99 : vector<8x8xf32> to vector<8x8xbf16>
    %cst_38 = arith.constant dense<0.000000e+00> : vector<8x8xf32>
    %101 = tpu.matmul %98, %100, %cst_38 {dimension_numbers = #tpu.dot_dimension_numbers<[1], [1], [0], [0], [0, 0, 1, 0], [], []>} : vector<8x8xbf16>, vector<8x8xbf16>, vector<8x8xf32> -> vector<8x8xf32>
    %102 = arith.addf %101, %36 : vector<8x8xf32>
    %cst_39 = arith.constant dense<0xFF800000> : vector<8xf32>
    %103 = vector.multi_reduction <maximumf>, %102, %cst_39 [1] : vector<8x8xf32> to vector<8xf32>
    %104 = vector.shape_cast %103 : vector<8xf32> to vector<8x1xf32>
    %105 = vector.broadcast %104 : vector<8x1xf32> to vector<8x8xf32>
    %106 = arith.subf %102, %105 : vector<8x8xf32>
    %107 = math.exp %106 : vector<8x8xf32>
    %cst_40 = arith.constant dense<0.000000e+00> : vector<8xf32>
    %108 = vector.multi_reduction <add>, %107, %cst_40 [1] : vector<8x8xf32> to vector<8xf32>
    %109 = vector.shape_cast %108 : vector<8xf32> to vector<8x1xf32>
    %110 = tpu.reciprocal %109 {approx = true} : vector<8x1xf32> -> vector<8x1xf32>
    %111 = vector.broadcast %110 : vector<8x1xf32> to vector<8x8xf32>
    %112 = arith.mulf %107, %111 : vector<8x8xf32>
    %113 = arith.truncf %112 : vector<8x8xf32> to vector<8x8xbf16>
    %114 = vector.extract_strided_slice %32 {offsets = [0, 24], sizes = [8, 8], strides = [1, 1]} : vector<8x32xf32> to vector<8x8xf32>
    %115 = arith.truncf %114 : vector<8x8xf32> to vector<8x8xbf16>
    %cst_41 = arith.constant dense<0.000000e+00> : vector<8x8xf32>
    %116 = tpu.matmul %113, %115, %cst_41 {dimension_numbers = #tpu.dot_dimension_numbers<[1], [0], [0], [1], [0, 0, 1, 1], [], []>} : vector<8x8xbf16>, vector<8x8xbf16>, vector<8x8xf32> -> vector<8x8xf32>
    %117 = tpu.concatenate %56, %76, %96, %116 in 1 : vector<8x8xf32>, vector<8x8xf32>, vector<8x8xf32>, vector<8x8xf32> -> vector<8x32xf32>
    %118 = vector.extract_strided_slice %23 {offsets = [8, 0], sizes = [8, 32], strides = [1, 1]} : vector<16x32xf32> to vector<8x32xf32>
    %119 = vector.extract_strided_slice %24 {offsets = [8, 0], sizes = [8, 32], strides = [1, 1]} : vector<16x32xf32> to vector<8x32xf32>
    %120 = vector.extract_strided_slice %25 {offsets = [8, 0], sizes = [8, 32], strides = [1, 1]} : vector<16x32xf32> to vector<8x32xf32>
    %121 = vector.extract_strided_slice %7 {offsets = [1, 0, 0], sizes = [1, 1, 8], strides = [1, 1, 1]} : vector<2x1x8xf32> to vector<1x1x8xf32>
    %122 = vector.shape_cast %121 : vector<1x1x8xf32> to vector<1x8xf32>
    %123 = vector.broadcast %122 : vector<1x8xf32> to vector<8x8xf32>
    %124 = arith.addf %14, %123 : vector<8x8xf32>
    %125 = vector.extract_strided_slice %118 {offsets = [0, 0], sizes = [8, 8], strides = [1, 1]} : vector<8x32xf32> to vector<8x8xf32>
    %126 = arith.truncf %125 : vector<8x8xf32> to vector<8x8xbf16>
    %127 = vector.extract_strided_slice %119 {offsets = [0, 0], sizes = [8, 8], strides = [1, 1]} : vector<8x32xf32> to vector<8x8xf32>
    %128 = arith.truncf %127 : vector<8x8xf32> to vector<8x8xbf16>
    %cst_42 = arith.constant dense<0.000000e+00> : vector<8x8xf32>
    %129 = tpu.matmul %126, %128, %cst_42 {dimension_numbers = #tpu.dot_dimension_numbers<[1], [1], [0], [0], [0, 0, 1, 0], [], []>} : vector<8x8xbf16>, vector<8x8xbf16>, vector<8x8xf32> -> vector<8x8xf32>
    %130 = arith.addf %129, %124 : vector<8x8xf32>
    %cst_43 = arith.constant dense<0xFF800000> : vector<8xf32>
    %131 = vector.multi_reduction <maximumf>, %130, %cst_43 [1] : vector<8x8xf32> to vector<8xf32>
    %132 = vector.shape_cast %131 : vector<8xf32> to vector<8x1xf32>
    %133 = vector.broadcast %132 : vector<8x1xf32> to vector<8x8xf32>
    %134 = arith.subf %130, %133 : vector<8x8xf32>
    %135 = math.exp %134 : vector<8x8xf32>
    %cst_44 = arith.constant dense<0.000000e+00> : vector<8xf32>
    %136 = vector.multi_reduction <add>, %135, %cst_44 [1] : vector<8x8xf32> to vector<8xf32>
    %137 = vector.shape_cast %136 : vector<8xf32> to vector<8x1xf32>
    %138 = tpu.reciprocal %137 {approx = true} : vector<8x1xf32> -> vector<8x1xf32>
    %139 = vector.broadcast %138 : vector<8x1xf32> to vector<8x8xf32>
    %140 = arith.mulf %135, %139 : vector<8x8xf32>
    %141 = arith.truncf %140 : vector<8x8xf32> to vector<8x8xbf16>
    %142 = vector.extract_strided_slice %120 {offsets = [0, 0], sizes = [8, 8], strides = [1, 1]} : vector<8x32xf32> to vector<8x8xf32>
    %143 = arith.truncf %142 : vector<8x8xf32> to vector<8x8xbf16>
    %cst_45 = arith.constant dense<0.000000e+00> : vector<8x8xf32>
    %144 = tpu.matmul %141, %143, %cst_45 {dimension_numbers = #tpu.dot_dimension_numbers<[1], [0], [0], [1], [0, 0, 1, 1], [], []>} : vector<8x8xbf16>, vector<8x8xbf16>, vector<8x8xf32> -> vector<8x8xf32>
    %145 = vector.extract_strided_slice %118 {offsets = [0, 8], sizes = [8, 8], strides = [1, 1]} : vector<8x32xf32> to vector<8x8xf32>
    %146 = arith.truncf %145 : vector<8x8xf32> to vector<8x8xbf16>
    %147 = vector.extract_strided_slice %119 {offsets = [0, 8], sizes = [8, 8], strides = [1, 1]} : vector<8x32xf32> to vector<8x8xf32>
    %148 = arith.truncf %147 : vector<8x8xf32> to vector<8x8xbf16>
    %cst_46 = arith.constant dense<0.000000e+00> : vector<8x8xf32>
    %149 = tpu.matmul %146, %148, %cst_46 {dimension_numbers = #tpu.dot_dimension_numbers<[1], [1], [0], [0], [0, 0, 1, 0], [], []>} : vector<8x8xbf16>, vector<8x8xbf16>, vector<8x8xf32> -> vector<8x8xf32>
    %150 = arith.addf %149, %124 : vector<8x8xf32>
    %cst_47 = arith.constant dense<0xFF800000> : vector<8xf32>
    %151 = vector.multi_reduction <maximumf>, %150, %cst_47 [1] : vector<8x8xf32> to vector<8xf32>
    %152 = vector.shape_cast %151 : vector<8xf32> to vector<8x1xf32>
    %153 = vector.broadcast %152 : vector<8x1xf32> to vector<8x8xf32>
    %154 = arith.subf %150, %153 : vector<8x8xf32>
    %155 = math.exp %154 : vector<8x8xf32>
    %cst_48 = arith.constant dense<0.000000e+00> : vector<8xf32>
    %156 = vector.multi_reduction <add>, %155, %cst_48 [1] : vector<8x8xf32> to vector<8xf32>
    %157 = vector.shape_cast %156 : vector<8xf32> to vector<8x1xf32>
    %158 = tpu.reciprocal %157 {approx = true} : vector<8x1xf32> -> vector<8x1xf32>
    %159 = vector.broadcast %158 : vector<8x1xf32> to vector<8x8xf32>
    %160 = arith.mulf %155, %159 : vector<8x8xf32>
    %161 = arith.truncf %160 : vector<8x8xf32> to vector<8x8xbf16>
    %162 = vector.extract_strided_slice %120 {offsets = [0, 8], sizes = [8, 8], strides = [1, 1]} : vector<8x32xf32> to vector<8x8xf32>
    %163 = arith.truncf %162 : vector<8x8xf32> to vector<8x8xbf16>
    %cst_49 = arith.constant dense<0.000000e+00> : vector<8x8xf32>
    %164 = tpu.matmul %161, %163, %cst_49 {dimension_numbers = #tpu.dot_dimension_numbers<[1], [0], [0], [1], [0, 0, 1, 1], [], []>} : vector<8x8xbf16>, vector<8x8xbf16>, vector<8x8xf32> -> vector<8x8xf32>
    %165 = vector.extract_strided_slice %118 {offsets = [0, 16], sizes = [8, 8], strides = [1, 1]} : vector<8x32xf32> to vector<8x8xf32>
    %166 = arith.truncf %165 : vector<8x8xf32> to vector<8x8xbf16>
    %167 = vector.extract_strided_slice %119 {offsets = [0, 16], sizes = [8, 8], strides = [1, 1]} : vector<8x32xf32> to vector<8x8xf32>
    %168 = arith.truncf %167 : vector<8x8xf32> to vector<8x8xbf16>
    %cst_50 = arith.constant dense<0.000000e+00> : vector<8x8xf32>
    %169 = tpu.matmul %166, %168, %cst_50 {dimension_numbers = #tpu.dot_dimension_numbers<[1], [1], [0], [0], [0, 0, 1, 0], [], []>} : vector<8x8xbf16>, vector<8x8xbf16>, vector<8x8xf32> -> vector<8x8xf32>
    %170 = arith.addf %169, %124 : vector<8x8xf32>
    %cst_51 = arith.constant dense<0xFF800000> : vector<8xf32>
    %171 = vector.multi_reduction <maximumf>, %170, %cst_51 [1] : vector<8x8xf32> to vector<8xf32>
    %172 = vector.shape_cast %171 : vector<8xf32> to vector<8x1xf32>
    %173 = vector.broadcast %172 : vector<8x1xf32> to vector<8x8xf32>
    %174 = arith.subf %170, %173 : vector<8x8xf32>
    %175 = math.exp %174 : vector<8x8xf32>
    %cst_52 = arith.constant dense<0.000000e+00> : vector<8xf32>
    %176 = vector.multi_reduction <add>, %175, %cst_52 [1] : vector<8x8xf32> to vector<8xf32>
    %177 = vector.shape_cast %176 : vector<8xf32> to vector<8x1xf32>
    %178 = tpu.reciprocal %177 {approx = true} : vector<8x1xf32> -> vector<8x1xf32>
    %179 = vector.broadcast %178 : vector<8x1xf32> to vector<8x8xf32>
    %180 = arith.mulf %175, %179 : vector<8x8xf32>
    %181 = arith.truncf %180 : vector<8x8xf32> to vector<8x8xbf16>
    %182 = vector.extract_strided_slice %120 {offsets = [0, 16], sizes = [8, 8], strides = [1, 1]} : vector<8x32xf32> to vector<8x8xf32>
    %183 = arith.truncf %182 : vector<8x8xf32> to vector<8x8xbf16>
    %cst_53 = arith.constant dense<0.000000e+00> : vector<8x8xf32>
    %184 = tpu.matmul %181, %183, %cst_53 {dimension_numbers = #tpu.dot_dimension_numbers<[1], [0], [0], [1], [0, 0, 1, 1], [], []>} : vector<8x8xbf16>, vector<8x8xbf16>, vector<8x8xf32> -> vector<8x8xf32>
    %185 = vector.extract_strided_slice %118 {offsets = [0, 24], sizes = [8, 8], strides = [1, 1]} : vector<8x32xf32> to vector<8x8xf32>
    %186 = arith.truncf %185 : vector<8x8xf32> to vector<8x8xbf16>
    %187 = vector.extract_strided_slice %119 {offsets = [0, 24], sizes = [8, 8], strides = [1, 1]} : vector<8x32xf32> to vector<8x8xf32>
    %188 = arith.truncf %187 : vector<8x8xf32> to vector<8x8xbf16>
    %cst_54 = arith.constant dense<0.000000e+00> : vector<8x8xf32>
    %189 = tpu.matmul %186, %188, %cst_54 {dimension_numbers = #tpu.dot_dimension_numbers<[1], [1], [0], [0], [0, 0, 1, 0], [], []>} : vector<8x8xbf16>, vector<8x8xbf16>, vector<8x8xf32> -> vector<8x8xf32>
    %190 = arith.addf %189, %124 : vector<8x8xf32>
    %cst_55 = arith.constant dense<0xFF800000> : vector<8xf32>
    %191 = vector.multi_reduction <maximumf>, %190, %cst_55 [1] : vector<8x8xf32> to vector<8xf32>
    %192 = vector.shape_cast %191 : vector<8xf32> to vector<8x1xf32>
    %193 = vector.broadcast %192 : vector<8x1xf32> to vector<8x8xf32>
    %194 = arith.subf %190, %193 : vector<8x8xf32>
    %195 = math.exp %194 : vector<8x8xf32>
    %cst_56 = arith.constant dense<0.000000e+00> : vector<8xf32>
    %196 = vector.multi_reduction <add>, %195, %cst_56 [1] : vector<8x8xf32> to vector<8xf32>
    %197 = vector.shape_cast %196 : vector<8xf32> to vector<8x1xf32>
    %198 = tpu.reciprocal %197 {approx = true} : vector<8x1xf32> -> vector<8x1xf32>
    %199 = vector.broadcast %198 : vector<8x1xf32> to vector<8x8xf32>
    %200 = arith.mulf %195, %199 : vector<8x8xf32>
    %201 = arith.truncf %200 : vector<8x8xf32> to vector<8x8xbf16>
    %202 = vector.extract_strided_slice %120 {offsets = [0, 24], sizes = [8, 8], strides = [1, 1]} : vector<8x32xf32> to vector<8x8xf32>
    %203 = arith.truncf %202 : vector<8x8xf32> to vector<8x8xbf16>
    %cst_57 = arith.constant dense<0.000000e+00> : vector<8x8xf32>
    %204 = tpu.matmul %201, %203, %cst_57 {dimension_numbers = #tpu.dot_dimension_numbers<[1], [0], [0], [1], [0, 0, 1, 1], [], []>} : vector<8x8xbf16>, vector<8x8xbf16>, vector<8x8xf32> -> vector<8x8xf32>
    %205 = tpu.concatenate %144, %164, %184, %204 in 1 : vector<8x8xf32>, vector<8x8xf32>, vector<8x8xf32>, vector<8x8xf32> -> vector<8x32xf32>
    %206 = tpu.concatenate %117, %205 in 0 : vector<8x32xf32>, vector<8x32xf32> -> vector<16x32xf32>
    %207 = arith.truncf %206 : vector<16x32xf32> to vector<16x32xbf16>
    %cst_58 = arith.constant dense<0.000000e+00> : vector<16x32xf32>
    %208 = tpu.matmul %207, %27, %cst_58 {dimension_numbers = #tpu.dot_dimension_numbers<[1], [0], [0], [1], [0, 0, 1, 1], [], []>} : vector<16x32xbf16>, vector<32x32xbf16>, vector<16x32xf32> -> vector<16x32xf32>
    %209 = vector.broadcast %29 : vector<1x32xf32> to vector<16x32xf32>
    %210 = arith.addf %208, %209 : vector<16x32xf32>
    %211 = arith.addf %4, %210 : vector<16x32xf32>
    %c0_59 = arith.constant 0 : index
    %c0_60 = arith.constant 0 : index
    %c0_61 = arith.constant 0 : index
    %212 = vector.load %arg16[%c0_59, %c0_60, %c0_61] : memref<1x1x32xf32, #tpu.memory_space<vmem>>, vector<1x1x32xf32>
    %213 = vector.shape_cast %212 : vector<1x1x32xf32> to vector<1x32xf32>
    %c0_62 = arith.constant 0 : index
    %c0_63 = arith.constant 0 : index
    %c0_64 = arith.constant 0 : index
    %214 = vector.load %arg17[%c0_62, %c0_63, %c0_64] : memref<1x1x32xf32, #tpu.memory_space<vmem>>, vector<1x1x32xf32>
    %215 = vector.shape_cast %214 : vector<1x1x32xf32> to vector<1x32xf32>
    %cst_65 = arith.constant dense<0.000000e+00> : vector<16xf32>
    %216 = vector.multi_reduction <add>, %211, %cst_65 [1] : vector<16x32xf32> to vector<16xf32>
    %217 = vector.shape_cast %216 : vector<16xf32> to vector<16x1xf32>
    %cst_66 = arith.constant 3.200000e+01 : f32
    %218 = vector.broadcast %cst_66 : f32 to vector<16x1xf32>
    %219 = arith.divf %217, %218 : vector<16x1xf32>
    %220 = vector.broadcast %219 : vector<16x1xf32> to vector<16x32xf32>
    %221 = arith.subf %211, %220 : vector<16x32xf32>
    %222 = arith.mulf %221, %221 : vector<16x32xf32>
    %cst_67 = arith.constant dense<0.000000e+00> : vector<16xf32>
    %223 = vector.multi_reduction <add>, %222, %cst_67 [1] : vector<16x32xf32> to vector<16xf32>
    %224 = vector.shape_cast %223 : vector<16xf32> to vector<16x1xf32>
    %cst_68 = arith.constant 3.200000e+01 : f32
    %225 = vector.broadcast %cst_68 : f32 to vector<16x1xf32>
    %226 = arith.divf %224, %225 : vector<16x1xf32>
    %cst_69 = arith.constant 9.99999974E-6 : f32
    %227 = vector.broadcast %cst_69 : f32 to vector<16x1xf32>
    %228 = arith.addf %226, %227 : vector<16x1xf32>
    %229 = math.rsqrt %228 : vector<16x1xf32>
    %230 = vector.broadcast %229 : vector<16x1xf32> to vector<16x32xf32>
    %231 = arith.mulf %221, %230 : vector<16x32xf32>
    %232 = vector.broadcast %213 : vector<1x32xf32> to vector<16x32xf32>
    %233 = arith.mulf %231, %232 : vector<16x32xf32>
    %234 = vector.broadcast %215 : vector<1x32xf32> to vector<16x32xf32>
    %235 = arith.addf %233, %234 : vector<16x32xf32>
    %236 = arith.truncf %235 : vector<16x32xf32> to vector<16x32xbf16>
    %c0_70 = arith.constant 0 : index
    %c0_71 = arith.constant 0 : index
    %c0_72 = arith.constant 0 : index
    %237 = vector.load %arg10[%c0_70, %c0_71, %c0_72] : memref<1x32x32xbf16, #tpu.memory_space<vmem>>, vector<1x32x32xbf16>
    %238 = vector.shape_cast %237 : vector<1x32x32xbf16> to vector<32x32xbf16>
    %cst_73 = arith.constant dense<0.000000e+00> : vector<16x32xf32>
    %239 = tpu.matmul %236, %238, %cst_73 {dimension_numbers = #tpu.dot_dimension_numbers<[1], [0], [0], [1], [0, 0, 1, 1], [], []>} : vector<16x32xbf16>, vector<32x32xbf16>, vector<16x32xf32> -> vector<16x32xf32>
    %c0_74 = arith.constant 0 : index
    %c0_75 = arith.constant 0 : index
    %c0_76 = arith.constant 0 : index
    %240 = vector.load %arg11[%c0_74, %c0_75, %c0_76] : memref<1x1x32xf32, #tpu.memory_space<vmem>>, vector<1x1x32xf32>
    %241 = vector.shape_cast %240 : vector<1x1x32xf32> to vector<1x32xf32>
    %242 = vector.broadcast %241 : vector<1x32xf32> to vector<16x32xf32>
    %243 = arith.addf %239, %242 : vector<16x32xf32>
    %c0_77 = arith.constant 0 : index
    %c0_78 = arith.constant 0 : index
    %c0_79 = arith.constant 0 : index
    %244 = vector.load %arg12[%c0_77, %c0_78, %c0_79] : memref<1x32x64xbf16, #tpu.memory_space<vmem>>, vector<1x32x64xbf16>
    %245 = vector.shape_cast %244 : vector<1x32x64xbf16> to vector<32x64xbf16>
    %cst_80 = arith.constant dense<0.000000e+00> : vector<16x64xf32>
    %246 = tpu.matmul %6, %245, %cst_80 {dimension_numbers = #tpu.dot_dimension_numbers<[1], [0], [0], [1], [0, 0, 1, 1], [], []>} : vector<16x32xbf16>, vector<32x64xbf16>, vector<16x64xf32> -> vector<16x64xf32>
    %c0_81 = arith.constant 0 : index
    %c0_82 = arith.constant 0 : index
    %c0_83 = arith.constant 0 : index
    %247 = vector.load %arg13[%c0_81, %c0_82, %c0_83] : memref<1x1x64xf32, #tpu.memory_space<vmem>>, vector<1x1x64xf32>
    %248 = vector.shape_cast %247 : vector<1x1x64xf32> to vector<1x64xf32>
    %249 = vector.broadcast %248 : vector<1x64xf32> to vector<16x64xf32>
    %250 = arith.addf %246, %249 : vector<16x64xf32>
    %251 = vector.extract_strided_slice %250 {offsets = [0, 0], sizes = [16, 32], strides = [1, 1]} : vector<16x64xf32> to vector<16x32xf32>
    %252 = vector.extract_strided_slice %250 {offsets = [0, 32], sizes = [16, 32], strides = [1, 1]} : vector<16x64xf32> to vector<16x32xf32>
    %c0_84 = arith.constant 0 : index
    %c0_85 = arith.constant 0 : index
    %c0_86 = arith.constant 0 : index
    %253 = vector.load %arg14[%c0_84, %c0_85, %c0_86] : memref<1x32x32xbf16, #tpu.memory_space<vmem>>, vector<1x32x32xbf16>
    %254 = vector.shape_cast %253 : vector<1x32x32xbf16> to vector<32x32xbf16>
    %c0_87 = arith.constant 0 : index
    %c0_88 = arith.constant 0 : index
    %c0_89 = arith.constant 0 : index
    %255 = vector.load %arg15[%c0_87, %c0_88, %c0_89] : memref<1x1x32xf32, #tpu.memory_space<vmem>>, vector<1x1x32xf32>
    %256 = vector.shape_cast %255 : vector<1x1x32xf32> to vector<1x32xf32>
    %257 = vector.extract_strided_slice %243 {offsets = [0, 0], sizes = [8, 32], strides = [1, 1]} : vector<16x32xf32> to vector<8x32xf32>
    %258 = vector.extract_strided_slice %251 {offsets = [0, 0], sizes = [8, 32], strides = [1, 1]} : vector<16x32xf32> to vector<8x32xf32>
    %259 = vector.extract_strided_slice %252 {offsets = [0, 0], sizes = [8, 32], strides = [1, 1]} : vector<16x32xf32> to vector<8x32xf32>
    %260 = vector.extract_strided_slice %8 {offsets = [0, 0, 0], sizes = [1, 1, 8], strides = [1, 1, 1]} : vector<2x1x8xf32> to vector<1x1x8xf32>
    %261 = vector.shape_cast %260 : vector<1x1x8xf32> to vector<1x8xf32>
    %262 = vector.extract_strided_slice %257 {offsets = [0, 0], sizes = [8, 8], strides = [1, 1]} : vector<8x32xf32> to vector<8x8xf32>
    %263 = arith.truncf %262 : vector<8x8xf32> to vector<8x8xbf16>
    %264 = vector.extract_strided_slice %258 {offsets = [0, 0], sizes = [8, 8], strides = [1, 1]} : vector<8x32xf32> to vector<8x8xf32>
    %265 = arith.truncf %264 : vector<8x8xf32> to vector<8x8xbf16>
    %cst_90 = arith.constant dense<0.000000e+00> : vector<8x8xf32>
    %266 = tpu.matmul %263, %265, %cst_90 {dimension_numbers = #tpu.dot_dimension_numbers<[1], [1], [0], [0], [0, 0, 1, 0], [], []>} : vector<8x8xbf16>, vector<8x8xbf16>, vector<8x8xf32> -> vector<8x8xf32>
    %267 = vector.broadcast %261 : vector<1x8xf32> to vector<8x8xf32>
    %268 = arith.addf %266, %267 : vector<8x8xf32>
    %cst_91 = arith.constant dense<0xFF800000> : vector<8xf32>
    %269 = vector.multi_reduction <maximumf>, %268, %cst_91 [1] : vector<8x8xf32> to vector<8xf32>
    %270 = vector.shape_cast %269 : vector<8xf32> to vector<8x1xf32>
    %271 = vector.broadcast %270 : vector<8x1xf32> to vector<8x8xf32>
    %272 = arith.subf %268, %271 : vector<8x8xf32>
    %273 = math.exp %272 : vector<8x8xf32>
    %cst_92 = arith.constant dense<0.000000e+00> : vector<8xf32>
    %274 = vector.multi_reduction <add>, %273, %cst_92 [1] : vector<8x8xf32> to vector<8xf32>
    %275 = vector.shape_cast %274 : vector<8xf32> to vector<8x1xf32>
    %276 = tpu.reciprocal %275 {approx = true} : vector<8x1xf32> -> vector<8x1xf32>
    %277 = vector.broadcast %276 : vector<8x1xf32> to vector<8x8xf32>
    %278 = arith.mulf %273, %277 : vector<8x8xf32>
    %279 = arith.truncf %278 : vector<8x8xf32> to vector<8x8xbf16>
    %280 = vector.extract_strided_slice %259 {offsets = [0, 0], sizes = [8, 8], strides = [1, 1]} : vector<8x32xf32> to vector<8x8xf32>
    %281 = arith.truncf %280 : vector<8x8xf32> to vector<8x8xbf16>
    %cst_93 = arith.constant dense<0.000000e+00> : vector<8x8xf32>
    %282 = tpu.matmul %279, %281, %cst_93 {dimension_numbers = #tpu.dot_dimension_numbers<[1], [0], [0], [1], [0, 0, 1, 1], [], []>} : vector<8x8xbf16>, vector<8x8xbf16>, vector<8x8xf32> -> vector<8x8xf32>
    %283 = vector.extract_strided_slice %257 {offsets = [0, 8], sizes = [8, 8], strides = [1, 1]} : vector<8x32xf32> to vector<8x8xf32>
    %284 = arith.truncf %283 : vector<8x8xf32> to vector<8x8xbf16>
    %285 = vector.extract_strided_slice %258 {offsets = [0, 8], sizes = [8, 8], strides = [1, 1]} : vector<8x32xf32> to vector<8x8xf32>
    %286 = arith.truncf %285 : vector<8x8xf32> to vector<8x8xbf16>
    %cst_94 = arith.constant dense<0.000000e+00> : vector<8x8xf32>
    %287 = tpu.matmul %284, %286, %cst_94 {dimension_numbers = #tpu.dot_dimension_numbers<[1], [1], [0], [0], [0, 0, 1, 0], [], []>} : vector<8x8xbf16>, vector<8x8xbf16>, vector<8x8xf32> -> vector<8x8xf32>
    %288 = vector.broadcast %261 : vector<1x8xf32> to vector<8x8xf32>
    %289 = arith.addf %287, %288 : vector<8x8xf32>
    %cst_95 = arith.constant dense<0xFF800000> : vector<8xf32>
    %290 = vector.multi_reduction <maximumf>, %289, %cst_95 [1] : vector<8x8xf32> to vector<8xf32>
    %291 = vector.shape_cast %290 : vector<8xf32> to vector<8x1xf32>
    %292 = vector.broadcast %291 : vector<8x1xf32> to vector<8x8xf32>
    %293 = arith.subf %289, %292 : vector<8x8xf32>
    %294 = math.exp %293 : vector<8x8xf32>
    %cst_96 = arith.constant dense<0.000000e+00> : vector<8xf32>
    %295 = vector.multi_reduction <add>, %294, %cst_96 [1] : vector<8x8xf32> to vector<8xf32>
    %296 = vector.shape_cast %295 : vector<8xf32> to vector<8x1xf32>
    %297 = tpu.reciprocal %296 {approx = true} : vector<8x1xf32> -> vector<8x1xf32>
    %298 = vector.broadcast %297 : vector<8x1xf32> to vector<8x8xf32>
    %299 = arith.mulf %294, %298 : vector<8x8xf32>
    %300 = arith.truncf %299 : vector<8x8xf32> to vector<8x8xbf16>
    %301 = vector.extract_strided_slice %259 {offsets = [0, 8], sizes = [8, 8], strides = [1, 1]} : vector<8x32xf32> to vector<8x8xf32>
    %302 = arith.truncf %301 : vector<8x8xf32> to vector<8x8xbf16>
    %cst_97 = arith.constant dense<0.000000e+00> : vector<8x8xf32>
    %303 = tpu.matmul %300, %302, %cst_97 {dimension_numbers = #tpu.dot_dimension_numbers<[1], [0], [0], [1], [0, 0, 1, 1], [], []>} : vector<8x8xbf16>, vector<8x8xbf16>, vector<8x8xf32> -> vector<8x8xf32>
    %304 = vector.extract_strided_slice %257 {offsets = [0, 16], sizes = [8, 8], strides = [1, 1]} : vector<8x32xf32> to vector<8x8xf32>
    %305 = arith.truncf %304 : vector<8x8xf32> to vector<8x8xbf16>
    %306 = vector.extract_strided_slice %258 {offsets = [0, 16], sizes = [8, 8], strides = [1, 1]} : vector<8x32xf32> to vector<8x8xf32>
    %307 = arith.truncf %306 : vector<8x8xf32> to vector<8x8xbf16>
    %cst_98 = arith.constant dense<0.000000e+00> : vector<8x8xf32>
    %308 = tpu.matmul %305, %307, %cst_98 {dimension_numbers = #tpu.dot_dimension_numbers<[1], [1], [0], [0], [0, 0, 1, 0], [], []>} : vector<8x8xbf16>, vector<8x8xbf16>, vector<8x8xf32> -> vector<8x8xf32>
    %309 = vector.broadcast %261 : vector<1x8xf32> to vector<8x8xf32>
    %310 = arith.addf %308, %309 : vector<8x8xf32>
    %cst_99 = arith.constant dense<0xFF800000> : vector<8xf32>
    %311 = vector.multi_reduction <maximumf>, %310, %cst_99 [1] : vector<8x8xf32> to vector<8xf32>
    %312 = vector.shape_cast %311 : vector<8xf32> to vector<8x1xf32>
    %313 = vector.broadcast %312 : vector<8x1xf32> to vector<8x8xf32>
    %314 = arith.subf %310, %313 : vector<8x8xf32>
    %315 = math.exp %314 : vector<8x8xf32>
    %cst_100 = arith.constant dense<0.000000e+00> : vector<8xf32>
    %316 = vector.multi_reduction <add>, %315, %cst_100 [1] : vector<8x8xf32> to vector<8xf32>
    %317 = vector.shape_cast %316 : vector<8xf32> to vector<8x1xf32>
    %318 = tpu.reciprocal %317 {approx = true} : vector<8x1xf32> -> vector<8x1xf32>
    %319 = vector.broadcast %318 : vector<8x1xf32> to vector<8x8xf32>
    %320 = arith.mulf %315, %319 : vector<8x8xf32>
    %321 = arith.truncf %320 : vector<8x8xf32> to vector<8x8xbf16>
    %322 = vector.extract_strided_slice %259 {offsets = [0, 16], sizes = [8, 8], strides = [1, 1]} : vector<8x32xf32> to vector<8x8xf32>
    %323 = arith.truncf %322 : vector<8x8xf32> to vector<8x8xbf16>
    %cst_101 = arith.constant dense<0.000000e+00> : vector<8x8xf32>
    %324 = tpu.matmul %321, %323, %cst_101 {dimension_numbers = #tpu.dot_dimension_numbers<[1], [0], [0], [1], [0, 0, 1, 1], [], []>} : vector<8x8xbf16>, vector<8x8xbf16>, vector<8x8xf32> -> vector<8x8xf32>
    %325 = vector.extract_strided_slice %257 {offsets = [0, 24], sizes = [8, 8], strides = [1, 1]} : vector<8x32xf32> to vector<8x8xf32>
    %326 = arith.truncf %325 : vector<8x8xf32> to vector<8x8xbf16>
    %327 = vector.extract_strided_slice %258 {offsets = [0, 24], sizes = [8, 8], strides = [1, 1]} : vector<8x32xf32> to vector<8x8xf32>
    %328 = arith.truncf %327 : vector<8x8xf32> to vector<8x8xbf16>
    %cst_102 = arith.constant dense<0.000000e+00> : vector<8x8xf32>
    %329 = tpu.matmul %326, %328, %cst_102 {dimension_numbers = #tpu.dot_dimension_numbers<[1], [1], [0], [0], [0, 0, 1, 0], [], []>} : vector<8x8xbf16>, vector<8x8xbf16>, vector<8x8xf32> -> vector<8x8xf32>
    %330 = vector.broadcast %261 : vector<1x8xf32> to vector<8x8xf32>
    %331 = arith.addf %329, %330 : vector<8x8xf32>
    %cst_103 = arith.constant dense<0xFF800000> : vector<8xf32>
    %332 = vector.multi_reduction <maximumf>, %331, %cst_103 [1] : vector<8x8xf32> to vector<8xf32>
    %333 = vector.shape_cast %332 : vector<8xf32> to vector<8x1xf32>
    %334 = vector.broadcast %333 : vector<8x1xf32> to vector<8x8xf32>
    %335 = arith.subf %331, %334 : vector<8x8xf32>
    %336 = math.exp %335 : vector<8x8xf32>
    %cst_104 = arith.constant dense<0.000000e+00> : vector<8xf32>
    %337 = vector.multi_reduction <add>, %336, %cst_104 [1] : vector<8x8xf32> to vector<8xf32>
    %338 = vector.shape_cast %337 : vector<8xf32> to vector<8x1xf32>
    %339 = tpu.reciprocal %338 {approx = true} : vector<8x1xf32> -> vector<8x1xf32>
    %340 = vector.broadcast %339 : vector<8x1xf32> to vector<8x8xf32>
    %341 = arith.mulf %336, %340 : vector<8x8xf32>
    %342 = arith.truncf %341 : vector<8x8xf32> to vector<8x8xbf16>
    %343 = vector.extract_strided_slice %259 {offsets = [0, 24], sizes = [8, 8], strides = [1, 1]} : vector<8x32xf32> to vector<8x8xf32>
    %344 = arith.truncf %343 : vector<8x8xf32> to vector<8x8xbf16>
    %cst_105 = arith.constant dense<0.000000e+00> : vector<8x8xf32>
    %345 = tpu.matmul %342, %344, %cst_105 {dimension_numbers = #tpu.dot_dimension_numbers<[1], [0], [0], [1], [0, 0, 1, 1], [], []>} : vector<8x8xbf16>, vector<8x8xbf16>, vector<8x8xf32> -> vector<8x8xf32>
    %346 = tpu.concatenate %282, %303, %324, %345 in 1 : vector<8x8xf32>, vector<8x8xf32>, vector<8x8xf32>, vector<8x8xf32> -> vector<8x32xf32>
    %347 = vector.extract_strided_slice %243 {offsets = [8, 0], sizes = [8, 32], strides = [1, 1]} : vector<16x32xf32> to vector<8x32xf32>
    %348 = vector.extract_strided_slice %251 {offsets = [8, 0], sizes = [8, 32], strides = [1, 1]} : vector<16x32xf32> to vector<8x32xf32>
    %349 = vector.extract_strided_slice %252 {offsets = [8, 0], sizes = [8, 32], strides = [1, 1]} : vector<16x32xf32> to vector<8x32xf32>
    %350 = vector.extract_strided_slice %8 {offsets = [1, 0, 0], sizes = [1, 1, 8], strides = [1, 1, 1]} : vector<2x1x8xf32> to vector<1x1x8xf32>
    %351 = vector.shape_cast %350 : vector<1x1x8xf32> to vector<1x8xf32>
    %352 = vector.extract_strided_slice %347 {offsets = [0, 0], sizes = [8, 8], strides = [1, 1]} : vector<8x32xf32> to vector<8x8xf32>
    %353 = arith.truncf %352 : vector<8x8xf32> to vector<8x8xbf16>
    %354 = vector.extract_strided_slice %348 {offsets = [0, 0], sizes = [8, 8], strides = [1, 1]} : vector<8x32xf32> to vector<8x8xf32>
    %355 = arith.truncf %354 : vector<8x8xf32> to vector<8x8xbf16>
    %cst_106 = arith.constant dense<0.000000e+00> : vector<8x8xf32>
    %356 = tpu.matmul %353, %355, %cst_106 {dimension_numbers = #tpu.dot_dimension_numbers<[1], [1], [0], [0], [0, 0, 1, 0], [], []>} : vector<8x8xbf16>, vector<8x8xbf16>, vector<8x8xf32> -> vector<8x8xf32>
    %357 = vector.broadcast %351 : vector<1x8xf32> to vector<8x8xf32>
    %358 = arith.addf %356, %357 : vector<8x8xf32>
    %cst_107 = arith.constant dense<0xFF800000> : vector<8xf32>
    %359 = vector.multi_reduction <maximumf>, %358, %cst_107 [1] : vector<8x8xf32> to vector<8xf32>
    %360 = vector.shape_cast %359 : vector<8xf32> to vector<8x1xf32>
    %361 = vector.broadcast %360 : vector<8x1xf32> to vector<8x8xf32>
    %362 = arith.subf %358, %361 : vector<8x8xf32>
    %363 = math.exp %362 : vector<8x8xf32>
    %cst_108 = arith.constant dense<0.000000e+00> : vector<8xf32>
    %364 = vector.multi_reduction <add>, %363, %cst_108 [1] : vector<8x8xf32> to vector<8xf32>
    %365 = vector.shape_cast %364 : vector<8xf32> to vector<8x1xf32>
    %366 = tpu.reciprocal %365 {approx = true} : vector<8x1xf32> -> vector<8x1xf32>
    %367 = vector.broadcast %366 : vector<8x1xf32> to vector<8x8xf32>
    %368 = arith.mulf %363, %367 : vector<8x8xf32>
    %369 = arith.truncf %368 : vector<8x8xf32> to vector<8x8xbf16>
    %370 = vector.extract_strided_slice %349 {offsets = [0, 0], sizes = [8, 8], strides = [1, 1]} : vector<8x32xf32> to vector<8x8xf32>
    %371 = arith.truncf %370 : vector<8x8xf32> to vector<8x8xbf16>
    %cst_109 = arith.constant dense<0.000000e+00> : vector<8x8xf32>
    %372 = tpu.matmul %369, %371, %cst_109 {dimension_numbers = #tpu.dot_dimension_numbers<[1], [0], [0], [1], [0, 0, 1, 1], [], []>} : vector<8x8xbf16>, vector<8x8xbf16>, vector<8x8xf32> -> vector<8x8xf32>
    %373 = vector.extract_strided_slice %347 {offsets = [0, 8], sizes = [8, 8], strides = [1, 1]} : vector<8x32xf32> to vector<8x8xf32>
    %374 = arith.truncf %373 : vector<8x8xf32> to vector<8x8xbf16>
    %375 = vector.extract_strided_slice %348 {offsets = [0, 8], sizes = [8, 8], strides = [1, 1]} : vector<8x32xf32> to vector<8x8xf32>
    %376 = arith.truncf %375 : vector<8x8xf32> to vector<8x8xbf16>
    %cst_110 = arith.constant dense<0.000000e+00> : vector<8x8xf32>
    %377 = tpu.matmul %374, %376, %cst_110 {dimension_numbers = #tpu.dot_dimension_numbers<[1], [1], [0], [0], [0, 0, 1, 0], [], []>} : vector<8x8xbf16>, vector<8x8xbf16>, vector<8x8xf32> -> vector<8x8xf32>
    %378 = vector.broadcast %351 : vector<1x8xf32> to vector<8x8xf32>
    %379 = arith.addf %377, %378 : vector<8x8xf32>
    %cst_111 = arith.constant dense<0xFF800000> : vector<8xf32>
    %380 = vector.multi_reduction <maximumf>, %379, %cst_111 [1] : vector<8x8xf32> to vector<8xf32>
    %381 = vector.shape_cast %380 : vector<8xf32> to vector<8x1xf32>
    %382 = vector.broadcast %381 : vector<8x1xf32> to vector<8x8xf32>
    %383 = arith.subf %379, %382 : vector<8x8xf32>
    %384 = math.exp %383 : vector<8x8xf32>
    %cst_112 = arith.constant dense<0.000000e+00> : vector<8xf32>
    %385 = vector.multi_reduction <add>, %384, %cst_112 [1] : vector<8x8xf32> to vector<8xf32>
    %386 = vector.shape_cast %385 : vector<8xf32> to vector<8x1xf32>
    %387 = tpu.reciprocal %386 {approx = true} : vector<8x1xf32> -> vector<8x1xf32>
    %388 = vector.broadcast %387 : vector<8x1xf32> to vector<8x8xf32>
    %389 = arith.mulf %384, %388 : vector<8x8xf32>
    %390 = arith.truncf %389 : vector<8x8xf32> to vector<8x8xbf16>
    %391 = vector.extract_strided_slice %349 {offsets = [0, 8], sizes = [8, 8], strides = [1, 1]} : vector<8x32xf32> to vector<8x8xf32>
    %392 = arith.truncf %391 : vector<8x8xf32> to vector<8x8xbf16>
    %cst_113 = arith.constant dense<0.000000e+00> : vector<8x8xf32>
    %393 = tpu.matmul %390, %392, %cst_113 {dimension_numbers = #tpu.dot_dimension_numbers<[1], [0], [0], [1], [0, 0, 1, 1], [], []>} : vector<8x8xbf16>, vector<8x8xbf16>, vector<8x8xf32> -> vector<8x8xf32>
    %394 = vector.extract_strided_slice %347 {offsets = [0, 16], sizes = [8, 8], strides = [1, 1]} : vector<8x32xf32> to vector<8x8xf32>
    %395 = arith.truncf %394 : vector<8x8xf32> to vector<8x8xbf16>
    %396 = vector.extract_strided_slice %348 {offsets = [0, 16], sizes = [8, 8], strides = [1, 1]} : vector<8x32xf32> to vector<8x8xf32>
    %397 = arith.truncf %396 : vector<8x8xf32> to vector<8x8xbf16>
    %cst_114 = arith.constant dense<0.000000e+00> : vector<8x8xf32>
    %398 = tpu.matmul %395, %397, %cst_114 {dimension_numbers = #tpu.dot_dimension_numbers<[1], [1], [0], [0], [0, 0, 1, 0], [], []>} : vector<8x8xbf16>, vector<8x8xbf16>, vector<8x8xf32> -> vector<8x8xf32>
    %399 = vector.broadcast %351 : vector<1x8xf32> to vector<8x8xf32>
    %400 = arith.addf %398, %399 : vector<8x8xf32>
    %cst_115 = arith.constant dense<0xFF800000> : vector<8xf32>
    %401 = vector.multi_reduction <maximumf>, %400, %cst_115 [1] : vector<8x8xf32> to vector<8xf32>
    %402 = vector.shape_cast %401 : vector<8xf32> to vector<8x1xf32>
    %403 = vector.broadcast %402 : vector<8x1xf32> to vector<8x8xf32>
    %404 = arith.subf %400, %403 : vector<8x8xf32>
    %405 = math.exp %404 : vector<8x8xf32>
    %cst_116 = arith.constant dense<0.000000e+00> : vector<8xf32>
    %406 = vector.multi_reduction <add>, %405, %cst_116 [1] : vector<8x8xf32> to vector<8xf32>
    %407 = vector.shape_cast %406 : vector<8xf32> to vector<8x1xf32>
    %408 = tpu.reciprocal %407 {approx = true} : vector<8x1xf32> -> vector<8x1xf32>
    %409 = vector.broadcast %408 : vector<8x1xf32> to vector<8x8xf32>
    %410 = arith.mulf %405, %409 : vector<8x8xf32>
    %411 = arith.truncf %410 : vector<8x8xf32> to vector<8x8xbf16>
    %412 = vector.extract_strided_slice %349 {offsets = [0, 16], sizes = [8, 8], strides = [1, 1]} : vector<8x32xf32> to vector<8x8xf32>
    %413 = arith.truncf %412 : vector<8x8xf32> to vector<8x8xbf16>
    %cst_117 = arith.constant dense<0.000000e+00> : vector<8x8xf32>
    %414 = tpu.matmul %411, %413, %cst_117 {dimension_numbers = #tpu.dot_dimension_numbers<[1], [0], [0], [1], [0, 0, 1, 1], [], []>} : vector<8x8xbf16>, vector<8x8xbf16>, vector<8x8xf32> -> vector<8x8xf32>
    %415 = vector.extract_strided_slice %347 {offsets = [0, 24], sizes = [8, 8], strides = [1, 1]} : vector<8x32xf32> to vector<8x8xf32>
    %416 = arith.truncf %415 : vector<8x8xf32> to vector<8x8xbf16>
    %417 = vector.extract_strided_slice %348 {offsets = [0, 24], sizes = [8, 8], strides = [1, 1]} : vector<8x32xf32> to vector<8x8xf32>
    %418 = arith.truncf %417 : vector<8x8xf32> to vector<8x8xbf16>
    %cst_118 = arith.constant dense<0.000000e+00> : vector<8x8xf32>
    %419 = tpu.matmul %416, %418, %cst_118 {dimension_numbers = #tpu.dot_dimension_numbers<[1], [1], [0], [0], [0, 0, 1, 0], [], []>} : vector<8x8xbf16>, vector<8x8xbf16>, vector<8x8xf32> -> vector<8x8xf32>
    %420 = vector.broadcast %351 : vector<1x8xf32> to vector<8x8xf32>
    %421 = arith.addf %419, %420 : vector<8x8xf32>
    %cst_119 = arith.constant dense<0xFF800000> : vector<8xf32>
    %422 = vector.multi_reduction <maximumf>, %421, %cst_119 [1] : vector<8x8xf32> to vector<8xf32>
    %423 = vector.shape_cast %422 : vector<8xf32> to vector<8x1xf32>
    %424 = vector.broadcast %423 : vector<8x1xf32> to vector<8x8xf32>
    %425 = arith.subf %421, %424 : vector<8x8xf32>
    %426 = math.exp %425 : vector<8x8xf32>
    %cst_120 = arith.constant dense<0.000000e+00> : vector<8xf32>
    %427 = vector.multi_reduction <add>, %426, %cst_120 [1] : vector<8x8xf32> to vector<8xf32>
    %428 = vector.shape_cast %427 : vector<8xf32> to vector<8x1xf32>
    %429 = tpu.reciprocal %428 {approx = true} : vector<8x1xf32> -> vector<8x1xf32>
    %430 = vector.broadcast %429 : vector<8x1xf32> to vector<8x8xf32>
    %431 = arith.mulf %426, %430 : vector<8x8xf32>
    %432 = arith.truncf %431 : vector<8x8xf32> to vector<8x8xbf16>
    %433 = vector.extract_strided_slice %349 {offsets = [0, 24], sizes = [8, 8], strides = [1, 1]} : vector<8x32xf32> to vector<8x8xf32>
    %434 = arith.truncf %433 : vector<8x8xf32> to vector<8x8xbf16>
    %cst_121 = arith.constant dense<0.000000e+00> : vector<8x8xf32>
    %435 = tpu.matmul %432, %434, %cst_121 {dimension_numbers = #tpu.dot_dimension_numbers<[1], [0], [0], [1], [0, 0, 1, 1], [], []>} : vector<8x8xbf16>, vector<8x8xbf16>, vector<8x8xf32> -> vector<8x8xf32>
    %436 = tpu.concatenate %372, %393, %414, %435 in 1 : vector<8x8xf32>, vector<8x8xf32>, vector<8x8xf32>, vector<8x8xf32> -> vector<8x32xf32>
    %437 = tpu.concatenate %346, %436 in 0 : vector<8x32xf32>, vector<8x32xf32> -> vector<16x32xf32>
    %438 = arith.truncf %437 : vector<16x32xf32> to vector<16x32xbf16>
    %cst_122 = arith.constant dense<0.000000e+00> : vector<16x32xf32>
    %439 = tpu.matmul %438, %254, %cst_122 {dimension_numbers = #tpu.dot_dimension_numbers<[1], [0], [0], [1], [0, 0, 1, 1], [], []>} : vector<16x32xbf16>, vector<32x32xbf16>, vector<16x32xf32> -> vector<16x32xf32>
    %440 = vector.broadcast %256 : vector<1x32xf32> to vector<16x32xf32>
    %441 = arith.addf %439, %440 : vector<16x32xf32>
    %442 = arith.addf %235, %441 : vector<16x32xf32>
    %c0_123 = arith.constant 0 : index
    %c0_124 = arith.constant 0 : index
    %c0_125 = arith.constant 0 : index
    %443 = vector.load %arg18[%c0_123, %c0_124, %c0_125] : memref<1x1x32xf32, #tpu.memory_space<vmem>>, vector<1x1x32xf32>
    %444 = vector.shape_cast %443 : vector<1x1x32xf32> to vector<1x32xf32>
    %c0_126 = arith.constant 0 : index
    %c0_127 = arith.constant 0 : index
    %c0_128 = arith.constant 0 : index
    %445 = vector.load %arg19[%c0_126, %c0_127, %c0_128] : memref<1x1x32xf32, #tpu.memory_space<vmem>>, vector<1x1x32xf32>
    %446 = vector.shape_cast %445 : vector<1x1x32xf32> to vector<1x32xf32>
    %cst_129 = arith.constant dense<0.000000e+00> : vector<16xf32>
    %447 = vector.multi_reduction <add>, %442, %cst_129 [1] : vector<16x32xf32> to vector<16xf32>
    %448 = vector.shape_cast %447 : vector<16xf32> to vector<16x1xf32>
    %cst_130 = arith.constant 3.200000e+01 : f32
    %449 = vector.broadcast %cst_130 : f32 to vector<16x1xf32>
    %450 = arith.divf %448, %449 : vector<16x1xf32>
    %451 = vector.broadcast %450 : vector<16x1xf32> to vector<16x32xf32>
    %452 = arith.subf %442, %451 : vector<16x32xf32>
    %453 = arith.mulf %452, %452 : vector<16x32xf32>
    %cst_131 = arith.constant dense<0.000000e+00> : vector<16xf32>
    %454 = vector.multi_reduction <add>, %453, %cst_131 [1] : vector<16x32xf32> to vector<16xf32>
    %455 = vector.shape_cast %454 : vector<16xf32> to vector<16x1xf32>
    %cst_132 = arith.constant 3.200000e+01 : f32
    %456 = vector.broadcast %cst_132 : f32 to vector<16x1xf32>
    %457 = arith.divf %455, %456 : vector<16x1xf32>
    %cst_133 = arith.constant 9.99999974E-6 : f32
    %458 = vector.broadcast %cst_133 : f32 to vector<16x1xf32>
    %459 = arith.addf %457, %458 : vector<16x1xf32>
    %460 = math.rsqrt %459 : vector<16x1xf32>
    %461 = vector.broadcast %460 : vector<16x1xf32> to vector<16x32xf32>
    %462 = arith.mulf %452, %461 : vector<16x32xf32>
    %463 = vector.broadcast %444 : vector<1x32xf32> to vector<16x32xf32>
    %464 = arith.mulf %462, %463 : vector<16x32xf32>
    %465 = vector.broadcast %446 : vector<1x32xf32> to vector<16x32xf32>
    %466 = arith.addf %464, %465 : vector<16x32xf32>
    %467 = arith.truncf %466 : vector<16x32xf32> to vector<16x32xbf16>
    %c0_134 = arith.constant 0 : index
    %c0_135 = arith.constant 0 : index
    %c0_136 = arith.constant 0 : index
    %468 = vector.load %arg22[%c0_134, %c0_135, %c0_136] : memref<1x32x128xbf16, #tpu.memory_space<vmem>>, vector<1x32x128xbf16>
    %469 = vector.shape_cast %468 : vector<1x32x128xbf16> to vector<32x128xbf16>
    %cst_137 = arith.constant dense<0.000000e+00> : vector<16x128xf32>
    %470 = tpu.matmul %467, %469, %cst_137 {dimension_numbers = #tpu.dot_dimension_numbers<[1], [0], [0], [1], [0, 0, 1, 1], [], []>} : vector<16x32xbf16>, vector<32x128xbf16>, vector<16x128xf32> -> vector<16x128xf32>
    %c0_138 = arith.constant 0 : index
    %c0_139 = arith.constant 0 : index
    %c0_140 = arith.constant 0 : index
    %471 = vector.load %arg23[%c0_138, %c0_139, %c0_140] : memref<1x1x128xf32, #tpu.memory_space<vmem>>, vector<1x1x128xf32>
    %472 = vector.shape_cast %471 : vector<1x1x128xf32> to vector<1x128xf32>
    %473 = vector.broadcast %472 : vector<1x128xf32> to vector<16x128xf32>
    %474 = arith.addf %470, %473 : vector<16x128xf32>
    %cst_141 = arith.constant 0.000000e+00 : f32
    %475 = vector.broadcast %cst_141 : f32 to vector<16x128xf32>
    %476 = arith.maximumf %474, %475 : vector<16x128xf32>
    %477 = arith.truncf %476 : vector<16x128xf32> to vector<16x128xbf16>
    %c0_142 = arith.constant 0 : index
    %c0_143 = arith.constant 0 : index
    %c0_144 = arith.constant 0 : index
    %478 = vector.load %arg24[%c0_142, %c0_143, %c0_144] : memref<1x128x32xbf16, #tpu.memory_space<vmem>>, vector<1x128x32xbf16>
    %479 = vector.shape_cast %478 : vector<1x128x32xbf16> to vector<128x32xbf16>
    %cst_145 = arith.constant dense<0.000000e+00> : vector<16x32xf32>
    %480 = tpu.matmul %477, %479, %cst_145 {dimension_numbers = #tpu.dot_dimension_numbers<[1], [0], [0], [1], [0, 0, 1, 1], [], []>} : vector<16x128xbf16>, vector<128x32xbf16>, vector<16x32xf32> -> vector<16x32xf32>
    %c0_146 = arith.constant 0 : index
    %c0_147 = arith.constant 0 : index
    %c0_148 = arith.constant 0 : index
    %481 = vector.load %arg25[%c0_146, %c0_147, %c0_148] : memref<1x1x32xf32, #tpu.memory_space<vmem>>, vector<1x1x32xf32>
    %482 = vector.shape_cast %481 : vector<1x1x32xf32> to vector<1x32xf32>
    %483 = vector.broadcast %482 : vector<1x32xf32> to vector<16x32xf32>
    %484 = arith.addf %480, %483 : vector<16x32xf32>
    %485 = arith.addf %466, %484 : vector<16x32xf32>
    %c0_149 = arith.constant 0 : index
    %c0_150 = arith.constant 0 : index
    %c0_151 = arith.constant 0 : index
    %486 = vector.load %arg20[%c0_149, %c0_150, %c0_151] : memref<1x1x32xf32, #tpu.memory_space<vmem>>, vector<1x1x32xf32>
    %487 = vector.shape_cast %486 : vector<1x1x32xf32> to vector<1x32xf32>
    %c0_152 = arith.constant 0 : index
    %c0_153 = arith.constant 0 : index
    %c0_154 = arith.constant 0 : index
    %488 = vector.load %arg21[%c0_152, %c0_153, %c0_154] : memref<1x1x32xf32, #tpu.memory_space<vmem>>, vector<1x1x32xf32>
    %489 = vector.shape_cast %488 : vector<1x1x32xf32> to vector<1x32xf32>
    %cst_155 = arith.constant dense<0.000000e+00> : vector<16xf32>
    %490 = vector.multi_reduction <add>, %485, %cst_155 [1] : vector<16x32xf32> to vector<16xf32>
    %491 = vector.shape_cast %490 : vector<16xf32> to vector<16x1xf32>
    %cst_156 = arith.constant 3.200000e+01 : f32
    %492 = vector.broadcast %cst_156 : f32 to vector<16x1xf32>
    %493 = arith.divf %491, %492 : vector<16x1xf32>
    %494 = vector.broadcast %493 : vector<16x1xf32> to vector<16x32xf32>
    %495 = arith.subf %485, %494 : vector<16x32xf32>
    %496 = arith.mulf %495, %495 : vector<16x32xf32>
    %cst_157 = arith.constant dense<0.000000e+00> : vector<16xf32>
    %497 = vector.multi_reduction <add>, %496, %cst_157 [1] : vector<16x32xf32> to vector<16xf32>
    %498 = vector.shape_cast %497 : vector<16xf32> to vector<16x1xf32>
    %cst_158 = arith.constant 3.200000e+01 : f32
    %499 = vector.broadcast %cst_158 : f32 to vector<16x1xf32>
    %500 = arith.divf %498, %499 : vector<16x1xf32>
    %cst_159 = arith.constant 9.99999974E-6 : f32
    %501 = vector.broadcast %cst_159 : f32 to vector<16x1xf32>
    %502 = arith.addf %500, %501 : vector<16x1xf32>
    %503 = math.rsqrt %502 : vector<16x1xf32>
    %504 = vector.broadcast %503 : vector<16x1xf32> to vector<16x32xf32>
    %505 = arith.mulf %495, %504 : vector<16x32xf32>
    %506 = vector.broadcast %487 : vector<1x32xf32> to vector<16x32xf32>
    %507 = arith.mulf %505, %506 : vector<16x32xf32>
    %508 = vector.broadcast %489 : vector<1x32xf32> to vector<16x32xf32>
    %509 = arith.addf %507, %508 : vector<16x32xf32>
    %510 = vector.shape_cast %509 : vector<16x32xf32> to vector<2x8x32xf32>
    %c0_160 = arith.constant 0 : index
    %c0_161 = arith.constant 0 : index
    %c0_162 = arith.constant 0 : index
    %511 = vector.load %arg27[%c0_160, %c0_161, %c0_162] : memref<2x8x32xf32, #tpu.memory_space<vmem>>, vector<2x8x32xf32>
    tpu.vector_store %arg27[%c0_160, %c0_161, %c0_162], %510 {strides = array<i32>} : memref<2x8x32xf32, #tpu.memory_space<vmem>>, vector<2x8x32xf32>,
    %c1_i32 = arith.constant 1 : i32
    %512 = arith.cmpi eq, %arg1, %c1_i32 : i32
    %513 = arith.extui %512 : i1 to i32
    %c0_i32_163 = arith.constant 0 : i32
    %514 = arith.cmpi ne, %513, %c0_i32_163 : i32
    scf.if %514 {
      %515 = vector.shape_cast %509 : vector<16x32xf32> to vector<2x8x32xf32>
      %516 = arith.truncf %515 : vector<2x8x32xf32> to vector<2x8x32xbf16>
      %c0_164 = arith.constant 0 : index
      %c0_165 = arith.constant 0 : index
      %c0_166 = arith.constant 0 : index
      %517 = vector.load %arg26[%c0_164, %c0_165, %c0_166] : memref<2x8x32xbf16, #tpu.memory_space<vmem>>, vector<2x8x32xbf16>
      tpu.vector_store %arg26[%c0_164, %c0_165, %c0_166], %516 {strides = array<i32>} : memref<2x8x32xbf16, #tpu.memory_space<vmem>>, vector<2x8x32xbf16>,
    } else {
    }
    return
  }
  func.func @transform_0(%arg0: i32, %arg1: i32) -> (i32, i32, i32) {
    %c0_i32 = arith.constant 0 : i32
    %c0_i32_0 = arith.constant 0 : i32
    %c0_i32_1 = arith.constant 0 : i32
    return %arg0, %c0_i32, %c0_i32_0 : i32, i32, i32
  }
  func.func @transform_1(%arg0: i32, %arg1: i32) -> (i32, i32, i32) {
    %c0_i32 = arith.constant 0 : i32
    %c0_i32_0 = arith.constant 0 : i32
    %c0_i32_1 = arith.constant 0 : i32
    return %arg0, %c0_i32, %c0_i32_0 : i32, i32, i32
  }
  func.func @transform_2(%arg0: i32, %arg1: i32) -> (i32, i32, i32) {
    %c0_i32 = arith.constant 0 : i32
    %c0_i32_0 = arith.constant 0 : i32
    %c0_i32_1 = arith.constant 0 : i32
    return %arg0, %c0_i32, %c0_i32_0 : i32, i32, i32
  }
  func.func @transform_3(%arg0: i32, %arg1: i32) -> (i32, i32, i32) {
    %c0_i32 = arith.constant 0 : i32
    %c0_i32_0 = arith.constant 0 : i32
    %c0_i32_1 = arith.constant 0 : i32
    return %arg0, %c0_i32, %c0_i32_0 : i32, i32, i32
  }
  func.func @transform_4(%arg0: i32, %arg1: i32) -> (i32, i32, i32) {
    %c0_i32 = arith.constant 0 : i32
    %c0_i32_0 = arith.constant 0 : i32
    %c0_i32_1 = arith.constant 0 : i32
    return %arg1, %c0_i32, %c0_i32_0 : i32, i32, i32
  }
  func.func @transform_5(%arg0: i32, %arg1: i32) -> (i32, i32, i32) {
    %c0_i32 = arith.constant 0 : i32
    %c0_i32_0 = arith.constant 0 : i32
    %c0_i32_1 = arith.constant 0 : i32
    return %arg1, %c0_i32, %c0_i32_0 : i32, i32, i32
  }
  func.func @transform_6(%arg0: i32, %arg1: i32) -> (i32, i32, i32) {
    %c0_i32 = arith.constant 0 : i32
    %c0_i32_0 = arith.constant 0 : i32
    %c0_i32_1 = arith.constant 0 : i32
    return %arg1, %c0_i32, %c0_i32_0 : i32, i32, i32
  }
  func.func @transform_7(%arg0: i32, %arg1: i32) -> (i32, i32, i32) {
    %c0_i32 = arith.constant 0 : i32
    %c0_i32_0 = arith.constant 0 : i32
    %c0_i32_1 = arith.constant 0 : i32
    return %arg1, %c0_i32, %c0_i32_0 : i32, i32, i32
  }
  func.func @transform_8(%arg0: i32, %arg1: i32) -> (i32, i32, i32) {
    %c0_i32 = arith.constant 0 : i32
    %c0_i32_0 = arith.constant 0 : i32
    %c0_i32_1 = arith.constant 0 : i32
    return %arg1, %c0_i32, %c0_i32_0 : i32, i32, i32
  }
  func.func @transform_9(%arg0: i32, %arg1: i32) -> (i32, i32, i32) {
    %c0_i32 = arith.constant 0 : i32
    %c0_i32_0 = arith.constant 0 : i32
    %c0_i32_1 = arith.constant 0 : i32
    return %arg1, %c0_i32, %c0_i32_0 : i32, i32, i32
  }
  func.func @transform_10(%arg0: i32, %arg1: i32) -> (i32, i32, i32) {
    %c0_i32 = arith.constant 0 : i32
    %c0_i32_0 = arith.constant 0 : i32
    %c0_i32_1 = arith.constant 0 : i32
    return %arg1, %c0_i32, %c0_i32_0 : i32, i32, i32
  }
  func.func @transform_11(%arg0: i32, %arg1: i32) -> (i32, i32, i32) {
    %c0_i32 = arith.constant 0 : i32
    %c0_i32_0 = arith.constant 0 : i32
    %c0_i32_1 = arith.constant 0 : i32
    return %arg1, %c0_i32, %c0_i32_0 : i32, i32, i32
  }
  func.func @transform_12(%arg0: i32, %arg1: i32) -> (i32, i32, i32) {
    %c0_i32 = arith.constant 0 : i32
    %c0_i32_0 = arith.constant 0 : i32
    %c0_i32_1 = arith.constant 0 : i32
    return %arg1, %c0_i32, %c0_i32_0 : i32, i32, i32
  }
  func.func @transform_13(%arg0: i32, %arg1: i32) -> (i32, i32, i32) {
    %c0_i32 = arith.constant 0 : i32
    %c0_i32_0 = arith.constant 0 : i32
    %c0_i32_1 = arith.constant 0 : i32
    return %arg1, %c0_i32, %c0_i32_0 : i32, i32, i32
  }
  func.func @transform_14(%arg0: i32, %arg1: i32) -> (i32, i32, i32) {
    %c0_i32 = arith.constant 0 : i32
    %c0_i32_0 = arith.constant 0 : i32
    %c0_i32_1 = arith.constant 0 : i32
    return %arg1, %c0_i32, %c0_i32_0 : i32, i32, i32
  }
  func.func @transform_15(%arg0: i32, %arg1: i32) -> (i32, i32, i32) {
    %c0_i32 = arith.constant 0 : i32
    %c0_i32_0 = arith.constant 0 : i32
    %c0_i32_1 = arith.constant 0 : i32
    return %arg1, %c0_i32, %c0_i32_0 : i32, i32, i32
  }
  func.func @transform_16(%arg0: i32, %arg1: i32) -> (i32, i32, i32) {
    %c0_i32 = arith.constant 0 : i32
    %c0_i32_0 = arith.constant 0 : i32
    %c0_i32_1 = arith.constant 0 : i32
    return %arg1, %c0_i32, %c0_i32_0 : i32, i32, i32
  }
  func.func @transform_17(%arg0: i32, %arg1: i32) -> (i32, i32, i32) {
    %c0_i32 = arith.constant 0 : i32
    %c0_i32_0 = arith.constant 0 : i32
    %c0_i32_1 = arith.constant 0 : i32
    return %arg1, %c0_i32, %c0_i32_0 : i32, i32, i32
  }
  func.func @transform_18(%arg0: i32, %arg1: i32) -> (i32, i32, i32) {
    %c0_i32 = arith.constant 0 : i32
    %c0_i32_0 = arith.constant 0 : i32
    %c0_i32_1 = arith.constant 0 : i32
    return %arg1, %c0_i32, %c0_i32_0 : i32, i32, i32
  }
  func.func @transform_19(%arg0: i32, %arg1: i32) -> (i32, i32, i32) {
    %c0_i32 = arith.constant 0 : i32
    %c0_i32_0 = arith.constant 0 : i32
    %c0_i32_1 = arith.constant 0 : i32
    return %arg1, %c0_i32, %c0_i32_0 : i32, i32, i32
  }
  func.func @transform_20(%arg0: i32, %arg1: i32) -> (i32, i32, i32) {
    %c0_i32 = arith.constant 0 : i32
    %c0_i32_0 = arith.constant 0 : i32
    %c0_i32_1 = arith.constant 0 : i32
    return %arg1, %c0_i32, %c0_i32_0 : i32, i32, i32
  }
  func.func @transform_21(%arg0: i32, %arg1: i32) -> (i32, i32, i32) {
    %c0_i32 = arith.constant 0 : i32
    %c0_i32_0 = arith.constant 0 : i32
    %c0_i32_1 = arith.constant 0 : i32
    return %arg1, %c0_i32, %c0_i32_0 : i32, i32, i32
  }
  func.func @transform_22(%arg0: i32, %arg1: i32) -> (i32, i32, i32) {
    %c0_i32 = arith.constant 0 : i32
    %c0_i32_0 = arith.constant 0 : i32
    %c0_i32_1 = arith.constant 0 : i32
    return %arg1, %c0_i32, %c0_i32_0 : i32, i32, i32
  }
  func.func @transform_23(%arg0: i32, %arg1: i32) -> (i32, i32, i32) {
    %c0_i32 = arith.constant 0 : i32
    %c0_i32_0 = arith.constant 0 : i32
    %c0_i32_1 = arith.constant 0 : i32
    return %arg1, %c0_i32, %c0_i32_0 : i32, i32, i32
  }
  func.func @transform_24(%arg0: i32, %arg1: i32) -> (i32, i32, i32) {
    %c0_i32 = arith.constant 0 : i32
    %c0_i32_0 = arith.constant 0 : i32
    %c0_i32_1 = arith.constant 0 : i32
    return %arg0, %c0_i32, %c0_i32_0 : i32, i32, i32
  }
}

</mosaic_0001>

<bundles_post_ra>
// kernel: transformer_vae_forward.5
= control target key start
LH: loop header
LB: loop body
LE: loop exit
PB: predicated region body
PF: predicated region fallthrough
CT: control target
= control target key end

     0   :  { %16 = vsyncpa [#allocation3], 0  ;;  %v366_v1 = vmov 0.0   ;;  %vm367_vm0 = vmmov 0   ;;  %s467_s0 = inlined_call_operand.vmem [shape: bf16[2,32], index: 0, kind: input, shape index: {}]   ;;  %s468_s1 = inlined_call_operand.vmem [shape: f32[2,16], index: 1, kind: input, shape index: {}]   ;;  %s469_s2 = inlined_call_operand.vmem [shape: bf16[32,16], index: 2, kind: input, shape index: {}]   ;;  %s470_s3 = inlined_call_operand.vmem [shape: f32[1,16], index: 3, kind: input, shape index: {}]   ;;  %s471_s4 = inlined_call_operand.vmem [shape: bf16[32,16], index: 4, kind: input, shape index: {}]   ;;  %s472_s5 = inlined_call_operand.vmem [shape: f32[1,16], index: 5, kind: input, shape index: {}]   ;;  %s473_s6 = inlined_call_operand.vmem [shape: bf16[16,32], index: 6, kind: input, shape index: {}]   ;;  %s474_s7 = inlined_call_operand.vmem [shape: f32[1,32], index: 7, kind: input, shape index: {}]   ;;  %s475_s8 = inlined_call_operand.hbm [shape: f32[2,16], index: 8, kind: output, shape index: {0}]   ;;  %s476_s9 = inlined_call_operand.hbm [shape: f32[2,16], index: 9, kind: output, shape index: {1}]   ;;  %s477_s10 = inlined_call_operand.vmem [shape: bf16[2,32], index: 10, kind: output, shape index: {2}]  }
   0x1   :  { %v315_v0 = vld [vmem:[%s471_s4 + $0x8] sm:$0xff]   ;;  %297 = vmatprep.subr.bf16.mxu1 %v366_v1  ;;  %289 = vmatprep.subr.bf16.mxu0 %v366_v1  ;;  %v316_v2 = vld [vmem:[%s471_s4] sm:$0xff]  }
   0x2   :  { %298 = vmatpush3.bf16.msra.mxu1 %v315_v0  ;;  %301 = vmatprep.mubr.msk.bf16.mxu1 %vm367_vm0, %v366_v1  ;;  %v317_v3 = vld [vmem:[%s469_s2 + $0x8] sm:$0xff]   ;;  %v318_v4 = vld [vmem:[%s469_s2] sm:$0xff]  }
   0x3   :  { %299 = vmatprep.subr.bf16.mxu1 %v366_v1  ;;  %293 = vmatprep.mubr.msk.bf16.mxu0 %vm367_vm0, %v366_v1 }
   0x4   :  { %290 = vmatpush3.bf16.msra.mxu0 %v317_v3 }
   0x5   :  { %291 = vmatprep.subr.bf16.mxu0 %v366_v1 }
   0x6   :  { %17 = vsyncpa [#allocation5], 0  ;;  %300 = vmatpush3.bf16.msra.mxu1 %v316_v2  ;;  %v35_v5 = vld [vmem:[%s467_s0] sm:$0x1]  ;;  %vm59_vm1 = vcmask 261120   ;;  %vm232_vm2 = vcmask 123904  }
   0x7   :  { %v319_v6 = vld [vmem:[%s473_s6] sm:$0xff]   ;;  %vm188_vm3 = vcmask 130048   ;;  %s369_s27 = smov [#allocation4]  }
   0x8   :  { %292 = vmatpush3.bf16.msra.mxu0 %v318_v4  ;;  %v274_v7 = vld [vmem:[%s472_s5] ss:$0 sm:$0xff]  ;;  %s254_s28 = sshll.u32 %s369_s27, 4  ;;  %s255_s28 = int_to_ptr.vmem [resolvable:$true] %s254_s28 }
   0x9   :  { %302 = vmatmul.mubr.msk.bf16.vlgmr.msra.gmra.mxu1 %vm59_vm1, %v35_v5  ;;  %305 = vmatprep.subr.bf16.mxu0 %v366_v1  ;;  %v270_v9 = vld [vmem:[%s470_s3] ss:$0 sm:$0xff]  ;;  %s368_s3 = smov [#allocation2]  }
   0xa   :  { %v166_v21 = vld [vmem:[%s468_s1] sm:$0x3]  ;;  %s244_s6 = sshll.u32 %s368_s3, 4  ;;  %s245_s6 = int_to_ptr.vmem [resolvable:$true] %s244_s6 }
   0xb   :  { %294 = vmatmul.mubr.msk.bf16.vlgmr.msra.gmra.mxu0 %vm59_vm1, %v35_v5  ;;  %s322_s29 = scalar_lea.vmem %s245_s6, 32  ;;  %p327_p1 = scmp.lt.s32.totalorder %s245_s6, %s245_s6 }
   0xc   :  { %307 = vmatprep.mubr.msk.bf16.mxu0 %vm367_vm0, %v366_v1  ;;  %306 = vmatpush3.bf16.msra.mxu0 %v319_v6  ;;  %p323_p0 = scmp.ne.s32.totalorder %s245_s6, %s322_s29  ;;  %p328_p2 = scmp.lt.s32.totalorder %s322_s29, %s322_s29 }
   0xe   :  { %p329_p3 = por %p328_p2, %p327_p1 }
  0x10   :  { %p330_p4 = pnand %p329_p3, %p323_p0 }
  0xc9   :  { %v160_v8 = vpop.f32.mrf.mxu1 }
  0xca   :  { %v161_v10 = vadd.f32 %v274_v7, %v160_v8 }
  0xcb   :  { %v303_v11 = vpop.f32.mrf.mxu1  ;;  %v97_v12 = vpop.f32.mrf.mxu0 }
  0xcc   :  { %v167_v13 = vmul.f32 0.5, %v161_v10  ;;  %v98_v14 = vadd.f32 %v270_v9, %v97_v12  ;;  %234 = vst.msk [vmem:[#allocation4] sm:$0x3] %vm232_vm2, %v161_v10 }
  0xcd   :  { %v163_v15 = vpop.f32.mrf.mxu1  ;;  %v295_v16 = vpop.f32.mrf.mxu0 }
  0xce   :  { %v168_v17 = vmul.f32 1.442695, %v167_v13  ;;  %233 = vst.msk [vmem:[#allocation2] sm:$0x3] %vm232_vm2, %v98_v14 }
  0xcf   :  { %v304_v18 = vpop.f32.mrf.mxu1  ;;  %v100_v19 = vpop.f32.mrf.mxu0 }
  0xd0   :  { %320 = vpow2.f32 %v168_v17 }
  0xd1   :  { %v296_v20 = vpop.f32.mrf.mxu0 }
  0xdd   :  { %v321_v22 = vpop.eup %320 }
  0xde   :  { %v170_v23 = vmul.f32 %v321_v22, %v166_v21 }
  0xe0   :  { %v171_v24 = vadd.f32 %v170_v23, %v98_v14 }
  0xe2   :  { %v172_v25 = vpack.c.bf16 %v171_v24, %v171_v24 }
  0xe4   :  { %308 = vmatmul.mubr.msk.bf16.vlgmr.msra.gmra.mxu0 %vm188_vm3, %v172_v25 }
  0xe5   :  { %333 = shalt.err (!%p330_p4)
}
  0xe6   :  { %247 = dma.vmem_to_hbm [thread:$0]  %s245_s6, 32, %s475_s8, [#allocation3]  }
  0xe7   :  { %s342_s11 = scalar_lea.vmem %s255_s28, 32  ;;  %p347_p6 = scmp.lt.s32.totalorder %s255_s28, %s255_s28 }
  0xe8   :  { %p343_p5 = scmp.ne.s32.totalorder %s255_s28, %s342_s11  ;;  %p348_p7 = scmp.lt.s32.totalorder %s342_s11, %s342_s11 }
  0xea   :  { %p349_p8 = por %p348_p7, %p347_p6 }
  0xec   :  { %p350_p9 = pnand %p349_p8, %p343_p5 }
  0xee   :  { %353 = shalt.err (!%p350_p9)
}
  0xef   :  { %257 = dma.vmem_to_hbm [thread:$0]  %s255_s28, 32, %s476_s9, [#allocation5]   ;;  %v278_v26 = vld [vmem:[%s474_s7] ss:$0 sm:$0xff]  ;;  %vm236_vm4 = vcmask 253952  }
 0x1a4   :  { %v226_v27 = vpop.f32.mrf.mxu0 }
 0x1a5   :  { %v227_v28 = vadd.f32 %v278_v26, %v226_v27 }
 0x1a6   :  { %v309_v29 = vpop.f32.mrf.mxu0 }
 0x1a7   :  { %v235_v30 = vpack.c.bf16 %v227_v28, %v227_v28 }
 0x1a8   :  { %v229_v31 = vpop.f32.mrf.mxu0 }
 0x1a9   :  { %237 = vst.msk [vmem:[%s477_s10] sm:$0x1] %vm236_vm4, %v235_v30 }
 0x1aa   :  { %v310_v32 = vpop.f32.mrf.mxu0 }
 0x1ab   :  { %362 = dma.done.wait [#allocation3], 32  }
 0x1ac   :  { %363 = vsyncadd [#allocation3], 4294967264 }
 0x1ad   :  { %364 = dma.done.wait [#allocation5], 32  }
 0x1ae   :  { %365 = vsyncadd [#allocation5], 4294967264 }
 0x1af   :  { %268 = vsyncpa [#allocation3], 1 }
 0x1b0   :  { %269 = vsyncpa [#allocation5], 1 }

// kernel: transformer_vae_forward.7
= control target key start
LH: loop header
LB: loop body
LE: loop exit
PB: predicated region body
PF: predicated region fallthrough
CT: control target
= control target key end

     0   :  { %v156_v1 = vmov 0.0   ;;  %vm157_vm0 = vmmov 0   ;;  %s196_s0 = inlined_call_operand.vmem [shape: bf16[16,32], index: 0, kind: input, shape index: {}]   ;;  %s197_s1 = inlined_call_operand.vmem [shape: bf16[32,64], index: 1, kind: input, shape index: {}]   ;;  %s198_s2 = inlined_call_operand.vmem [shape: f32[1,64], index: 2, kind: input, shape index: {}]   ;;  %s199_s3 = inlined_call_operand.hbm [shape: f32[16,64], index: 3, kind: output, shape index: {}]  }
   0x1   :  { %v131_v0 = vld [vmem:[%s197_s1 + $0x8] sm:$0xff]   ;;  %118 = vmatprep.subr.bf16.mxu0 %v156_v1  ;;  %v132_v2 = vld [vmem:[%s197_s1] sm:$0xff]   ;;  %122 = vmatprep.mubr.msk.bf16.mxu0 %vm157_vm0, %v156_v1 }
   0x2   :  { %119 = vmatpush3.bf16.msra.mxu0 %v131_v0 }
   0x3   :  { %120 = vmatprep.subr.bf16.mxu0 %v156_v1 }
   0x4   :  { %8 = vsyncpa [#allocation3], 0  ;;  %v133_v3 = vld [vmem:[%s196_s0] sm:$0xff]   ;;  %vm46_vm1 = vcmask 261120   ;;  %vm91_vm2 = vcmask 523264   ;;  %s158_s20 = smov [#allocation2]  }
   0x5   :  { %v110_v4 = vld [vmem:[%s198_s2] ss:$0 sm:$0xff]  ;;  %s99_s1 = sshll.u32 %s158_s20, 4  ;;  %s100_s1 = int_to_ptr.vmem [resolvable:$true] %s99_s1 }
   0x6   :  { %121 = vmatpush3.bf16.msra.mxu0 %v132_v2  ;;  %s134_s0 = scalar_lea.vmem %s100_s1, 256  ;;  %p139_p1 = scmp.lt.s32.totalorder %s100_s1, %s100_s1 }
   0x7   :  { %p135_p0 = scmp.ne.s32.totalorder %s100_s1, %s134_s0  ;;  %p140_p2 = scmp.lt.s32.totalorder %s134_s0, %s134_s0 }
   0x9   :  { %123 = vmatmul.mubr.msk.bf16.vlgmr.msra.gmra.mxu0 %vm46_vm1, %v133_v3  ;;  %p141_p3 = por %p140_p2, %p139_p1 }
   0xb   :  { %p142_p4 = pnand %p141_p3, %p135_p0 }
  0xc9   :  { %v84_v5 = vpop.f32.mrf.mxu0 }
  0xca   :  { %v85_v6 = vadd.f32 %v110_v4, %v84_v5 }
  0xcb   :  { %v124_v7 = vpop.f32.mrf.mxu0 }
  0xcc   :  { %92 = vst.msk [vmem:[#allocation2] sm:$0xff] %vm91_vm2, %v85_v6 }
  0xcd   :  { %v87_v8 = vpop.f32.mrf.mxu0 }
  0xce   :  { %v88_v9 = vadd.f32 %v110_v4, %v87_v8 }
  0xcf   :  { %v125_v10 = vpop.f32.mrf.mxu0 }
  0xd0   :  { %93 = vst.msk [vmem:[#allocation2 + $0x8] sm:$0xff] %vm91_vm2, %v88_v9 }
  0xd1   :  { %145 = shalt.err (!%p142_p4)
}
  0xd2   :  { %s159_s2 = smov 128   ;;  %s160_s21 = smov 8  }
  0xd3   :  { %105 = dma.vmem_to_hbm [thread:$0]  %s100_s1, 256, %s199_s3, [#allocation3], %s159_s2, %s159_s2, %s160_s21  }
  0xd4   :  { %154 = dma.done.wait [#allocation3], 256  }
  0xd5   :  { %155 = vsyncadd [#allocation3], 4294967040 }
  0xd6   :  { %109 = vsyncpa [#allocation3], 1 }

// kernel: transformer_vae_forward.4
= control target key start
LH: loop header
LB: loop body
LE: loop exit
PB: predicated region body
PF: predicated region fallthrough
CT: control target
= control target key end

     0   :  { %s2742_s29 = smov 0   ;;  %s2744_s30 = smov 0   ;;  %s3117_s0 = inlined_call_operand.vmem [shape: bf16[2,8,32], index: 0, kind: input, shape index: {}]   ;;  %s3118_s1 = inlined_call_operand.vmem [shape: f32[2,1,8], index: 1, kind: input, shape index: {}]   ;;  %s3119_s2 = inlined_call_operand.vmem [shape: bf16[2,32,96], index: 2, kind: input, shape index: {}]   ;;  %s3120_s3 = inlined_call_operand.vmem [shape: f32[2,1,96], index: 3, kind: input, shape index: {}]   ;;  %s3121_s4 = inlined_call_operand.vmem [shape: bf16[2,32,32], index: 4, kind: input, shape index: {}]   ;;  %s3122_s5 = inlined_call_operand.vmem [shape: f32[2,1,32], index: 5, kind: input, shape index: {}]   ;;  %s3123_s6 = inlined_call_operand.vmem [shape: f32[2,1,32], index: 6, kind: input, shape index: {}]   ;;  %s3124_s7 = inlined_call_operand.vmem [shape: f32[2,1,32], index: 7, kind: input, shape index: {}]   ;;  %s3125_s8 = inlined_call_operand.vmem [shape: bf16[2,32,128], index: 8, kind: input, shape index: {}]   ;;  %s3126_s9 = inlined_call_operand.vmem [shape: f32[2,1,128], index: 9, kind: input, shape index: {}]   ;;  %s3127_s10 = inlined_call_operand.vmem [shape: bf16[2,128,32], index: 10, kind: input, shape index: {}]   ;;  %s3128_s11 = inlined_call_operand.vmem [shape: f32[2,1,32], index: 11, kind: input, shape index: {}]   ;;  %s3129_s12 = inlined_call_operand.vmem [shape: f32[2,1,32], index: 12, kind: input, shape index: {}]   ;;  %s3130_s13 = inlined_call_operand.vmem [shape: f32[2,1,32], index: 13, kind: input, shape index: {}]   ;;  %s3131_s14 = inlined_call_operand.vmem [shape: bf16[2,8,32], index: 14, kind: output, shape index: {}]  }
   0x1   :  { %3136 = sst [smem:[#allocation6_spill]] %s3117_s0  ;;  %s2746_s15 = smov 0  }
   0x2   :  { %3137 = sst [smem:[#allocation7_spill]] %s3118_s1 }
   0x3   :  { %3138 = sst [smem:[#allocation8_spill]] %s3119_s2 }
   0x4   :  { %3139 = sst [smem:[#allocation9_spill]] %s3121_s4 }
   0x5   :  { %3140 = sst [smem:[#allocation10_spill]] %s3131_s14 }
   0x6 LB: > { %3141 = sst [smem:[#allocation3_spill]] %s2645_s30  ;;  %s33_s16 = sadd.s32 1, %s2645_s30  ;;  %s2649_s15 = sphi %s2746_s15, %s24_s15   ;;  %s2645_s30 = sphi %s2744_s30, %s3155_s30   ;;  %s2641_s29 = sphi %s2742_s29, %s3154_s29  }
   0x7   : > { %3142 = sst [smem:[#allocation4_spill]] %s2649_s15  ;;  %p2262_p0 = scmp.ge.s32.totalorder %s2649_s15, 1 }
   0x8   : > { %p34_p1 = scmp.ge.s32.totalorder %s33_s16, 2  ;;  %p539_p2 = scmp.lt.s32.totalorder %s2649_s15, 3 }
   0xa   : > { %s3157_s16 = smov (%p34_p1, %s33_s16), 0  ;;  %p540_p3 = pnand %p2262_p0, %p539_p2 }
   0xb   : > { %3143 = sst [smem:[#allocation5_spill]] %s3157_s16  ;;  %p644_p4 = scmp.lt.s32.totalorder (!%p540_p3), %s2641_s29, 1 }
   0xc   : > { %543 = sbr.rel (%p540_p3) target bundleno = 2516 (0x9d4), region = 76  ;;  %s3144_s2 = sld [smem:[#allocation8_spill]] (!%p540_p3) }
   0xd   : > { %s3145_s4 = sld [smem:[#allocation9_spill]] (!%p540_p3)  ;;  %p2271_p5 = scmp.ne.s32.totalorder (!%p540_p3), %s2641_s29, 0 }
  0x11   : > { %s2764_s17 = scalar_select %p644_p4, %s2641_s29, 1 }
  0x12   : > { %s3146_s16 = sld [smem:[#allocation6_spill]] (!%p2271_p5) }
  0x13   : > { %s2320_s18 = sshll.u32 %s2764_s17, 4  ;;  %s681_s0 = scalar_lea.vmem %s3128_s11, %s2764_s17 }
  0x14   : > { %s648_s24 = scalar_lea.vmem %s3144_s2, %s2320_s18  ;;  %s2777_s27 = scalar_lea.vmem %s3145_s4, %s2320_s18 }
  0x15   : > { %s2794_s23 = scalar_lea.vmem %s3125_s8, %s2320_s18  ;;  %s673_s2 = scalar_lea.vmem %s3126_s9, %s2764_s17 }
  0x16   : > { %s2323_s4 = sshll.u32 %s2764_s17, 6  ;;  %s684_s21 = scalar_lea.vmem %s3129_s12, %s2764_s17 }
  0x17   : > { %s2804_s30 = scalar_lea.vmem %s3127_s10, %s2323_s4  ;;  %s687_s1 = scalar_lea.vmem %s3130_s13, %s2764_s17 }
  0x18   : > { %698 = sbr.rel (%p2271_p5) target bundleno = 33 (0x21), region = 80 }
  0x1d   : > { %v2325_v0 = vld [vmem:[%s3146_s16] sm:$0xff]   ;;  %vm703_vm0 = vcmask 261120  }
  0x1e   : > { %v2326_v1 = vunpack.c.l.bf16 %v2325_v0  ;;  %v2327_v2 = vunpack.c.h.bf16 %v2325_v0 }
  0x20   : > { %704 = vst.msk [vmem:[#allocation2] sm:$0xff] %vm703_vm0, %v2326_v1  ;;  %705 = vst.msk [vmem:[#allocation2 + $0x8] sm:$0xff] %vm703_vm0, %v2327_v2 }
  0x21 PF: > { %v2573_v3 = vld [vmem:[%s648_s24 + $0x8] sm:$0xff]   ;;  %v2651_v4 = vmov 0.0   ;;  %v2574_v5 = vld [vmem:[%s648_s24] sm:$0xff]   ;;  %vm2652_vm1 = vmmov 0   ;;  %vm734_vm2 = vcmask 261120   ;;  %s3147_s20 = scalar_lea.vmem %s3120_s3, %s2764_s17  ;;  %s2653_s28 = smov 120  }
  0x22   : > { %2378 = vmatprep.subr.bf16.mxu0 %v2651_v4  ;;  %2398 = vmatprep.subr.bf16.mxu1 %v2651_v4  ;;  %v2272_v9 = vld [vmem:[%s3147_s20] ss:$0 sm:$0xff]  ;;  %s2654_s14 = smov 96   ;;  %s2655_s15 = smov 80   ;;  %vm794_vm3 = vcmask 64512   ;;  %vm858_vm4 = vcmask 1043456  }
  0x23   : > { %2379 = vmatpush3.bf16.msra.mxu0 %v2573_v3  ;;  %2382 = vmatprep.mubr.msk.bf16.mxu0 %vm2652_vm1, %v2651_v4  ;;  %s2656_s19 = smov 88   ;;  %s2657_s18 = smov 72   ;;  %vm1245_vm5 = vcmask 130048   ;;  %vm1247_vm6 = vcmask 195584  }
  0x24   : > { %2380 = vmatprep.subr.bf16.mxu0 %v2651_v4  ;;  %2400 = vmatprep.mubr.msk.bf16.mxu1 %vm2652_vm1, %v2651_v4  ;;  %s2658_s22 = smov 112   ;;  %s2659_s25 = smov 104  }
  0x25   : > { %s3148_s4 = sld [smem:[#allocation7_spill]]  ;;  %s3149_s16 = scalar_lea.vmem %s3122_s5, %s2764_s17 }
  0x26   : > { %s3150_s20 = scalar_lea.vmem %s3123_s6, %s2764_s17  ;;  %p2315_p6 = scmp.ne.s32.totalorder %s2641_s29, 1 }
  0x27   : > { %v2826_v6 = vld [vmem:[#allocation2] sm:$0xff]  ;;  %v2828_v7 = vld [vmem:[#allocation2 + $0x8] sm:$0xff]  ;;  %2381 = vmatpush3.bf16.msra.mxu0 %v2574_v5 }
  0x28   : > { %v710_v8 = vpack.c.bf16 %v2828_v7, %v2826_v6  ;;  %2386 = vmatprep.subr.bf16.mxu0 %v2651_v4 }
  0x2a   : > { %2383 = vmatmul.mubr.msk.bf16.vlgmr.msra.gmra.mxu0 %vm734_vm2, %v710_v8 }
  0x2b   : > { %2388 = vmatprep.mubr.msk.bf16.mxu0 %vm2652_vm1, %v2651_v4  ;;  %v2276_v40 = vld [vmem:[%s3148_s4] ss:$0 sm:$0xff]  ;;  %v2285_v1 = vld [vmem:[%s3148_s4 + $0x1] ss:$0 sm:$0xff] }
  0xea   : > { %v772_v10 = vpop.f32.mrf.mxu0 }
  0xeb   : > { %v773_v11 = vadd.f32 %v2272_v9, %v772_v10 }
  0xec   : > { %v2384_v12 = vpop.f32.mrf.mxu0 }
  0xed   : > { %v2844_v13 = vpack.c.bf16 %v773_v11, %v773_v11 }
  0xee   : > { %v775_v14 = vpop.f32.mrf.mxu0 }
  0xef   : > { %902 = vrot.lane.b32.xlu1 %v2844_v13, %s2653_s28  ;;  %792 = vrot.lane.b32.xlu0 %v2844_v13, %s2654_s14  ;;  %v776_v16 = vadd.f32 %v2272_v9, %v775_v14 }
  0xf0   : > { %v2385_v15 = vpop.f32.mrf.mxu0 }
  0xf1   : > { %v2852_v17 = vpack.c.bf16 %v776_v16, %v776_v16 }
  0xf3   : > { %1014 = vrot.lane.b32.xlu1 %v2844_v13, %s2655_s15  ;;  %904 = vrot.lane.b32.xlu0 %v2844_v13, %s2656_s19 }
  0xf7   : > { %1124 = vrot.lane.b32.xlu1 %v2844_v13, %s2657_s18  ;;  %1012 = vrot.lane.b32.xlu0 %v2844_v13, %s2658_s22 }
  0xfb   : > { %1122 = vrot.lane.b32.xlu0 %v2844_v13, %s2659_s25  ;;  %1257 = vrot.lane.b32.xlu1 %v2852_v17, %s2654_s14  ;;  %s2661_s14 = smov 64  }
  0xff   : > { %1367 = vrot.lane.b32.xlu0 %v2852_v17, %s2656_s19  ;;  %1365 = vrot.lane.b32.xlu1 %v2852_v17, %s2653_s28  ;;  %s2660_s28 = smov 56   ;;  %s2663_s19 = smov 40  }
 0x103   : > { %1477 = vrot.lane.b32.xlu0 %v2852_v17, %s2655_s15  ;;  %1475 = vrot.lane.b32.xlu1 %v2852_v17, %s2658_s22  ;;  %s2662_s15 = smov 48   ;;  %s2665_s22 = smov 16  }
 0x107   : > { %1587 = vrot.lane.b32.xlu0 %v2852_v17, %s2657_s18  ;;  %1585 = vrot.lane.b32.xlu1 %v2852_v17, %s2659_s25  ;;  %s2664_s18 = smov 8   ;;  %s2666_s25 = smov 24  }
 0x161   : > { %v793_v18 = vpop.permute.xlu0 %792  ;;  %v903_v20 = vpop.permute.xlu1 %902 }
 0x162   : > { %v799_v19 = vsel %vm794_vm3, %v793_v18, 0 }
 0x163   : > { %2387 = vmatpush3.bf16.xpose.msra.mxu0 %v799_v19 }
 0x164   : > { %2392 = vmatprep.subr.bf16.mxu0 %v2651_v4 }
 0x165   : > { %v905_v21 = vpop.permute.xlu0 %904  ;;  %v1015_v23 = vpop.permute.xlu1 %1014 }
 0x166   : > { %v910_v22 = vsel %vm794_vm3, %v905_v21, 0  ;;  %v1020_v24 = vsel %vm794_vm3, %v1015_v23, 0 }
 0x167   : > { %2399 = vmatpush3.bf16.xpose.msra.mxu1 %v910_v22 }
 0x168   : > { %2410 = vmatprep.subr.bf16.mxu1 %v2651_v4 }
 0x169   : > { %v1125_v25 = vpop.permute.xlu1 %1124  ;;  %v1013_v26 = vpop.permute.xlu0 %1012 }
 0x16a   : > { %2389 = vmatmul.mubr.msk.bf16.vlgmr.msra.gmra.mxu0 %vm794_vm3, %v2844_v13  ;;  %v1130_v27 = vsel %vm794_vm3, %v1125_v25, 0 }
 0x16b   : > { %2394 = vmatprep.mubr.msk.bf16.mxu0 %vm2652_vm1, %v2651_v4 }
 0x16d   : > { %v1258_v28 = vpop.permute.xlu1 %1257  ;;  %v1123_v29 = vpop.permute.xlu0 %1122 }
 0x16e   : > { %2401 = vmatmul.mubr.msk.bf16.vlgmr.msra.gmra.mxu1 %vm794_vm3, %v903_v20  ;;  %v1263_v30 = vsel %vm794_vm3, %v1258_v28, 0 }
 0x16f   : > { %2411 = vmatpush3.bf16.xpose.msra.mxu1 %v1020_v24  ;;  %2412 = vmatprep.mubr.msk.bf16.mxu1 %vm2652_vm1, %v2651_v4 }
 0x170   : > { %2422 = vmatprep.subr.bf16.mxu1 %v2651_v4 }
 0x171   : > { %v1368_v31 = vpop.permute.xlu0 %1367  ;;  %v1366_v34 = vpop.permute.xlu1 %1365 }
 0x172   : > { %v1373_v32 = vsel %vm794_vm3, %v1368_v31, 0 }
 0x175   : > { %v1478_v33 = vpop.permute.xlu0 %1477  ;;  %v1476_v37 = vpop.permute.xlu1 %1475 }
 0x176   : > { %2413 = vmatmul.mubr.msk.bf16.vlgmr.msra.gmra.mxu1 %vm794_vm3, %v1013_v26  ;;  %v1483_v35 = vsel %vm794_vm3, %v1478_v33, 0 }
 0x177   : > { %2423 = vmatpush3.bf16.xpose.msra.mxu1 %v1130_v27  ;;  %2424 = vmatprep.mubr.msk.bf16.mxu1 %vm2652_vm1, %v2651_v4 }
 0x178   : > { %2434 = vmatprep.subr.bf16.mxu1 %v2651_v4 }
 0x179   : > { %v1588_v36 = vpop.permute.xlu0 %1587  ;;  %v1586_v39 = vpop.permute.xlu1 %1585 }
 0x17a   : > { %v1593_v38 = vsel %vm794_vm3, %v1588_v36, 0 }
 0x17e   : > { %2425 = vmatmul.mubr.msk.bf16.vlgmr.msra.gmra.mxu1 %vm794_vm3, %v1123_v29 }
 0x17f   : > { %2435 = vmatpush3.bf16.xpose.msra.mxu1 %v1263_v30  ;;  %2436 = vmatprep.mubr.msk.bf16.mxu1 %vm2652_vm1, %v2651_v4 }
 0x180   : > { %2446 = vmatprep.subr.bf16.mxu1 %v2651_v4 }
 0x186   : > { %2437 = vmatmul.mubr.msk.bf16.vlgmr.msra.gmra.mxu1 %vm794_vm3, %v2852_v17 }
 0x187   : > { %2447 = vmatpush3.bf16.xpose.msra.mxu1 %v1373_v32  ;;  %2448 = vmatprep.mubr.msk.bf16.mxu1 %vm2652_vm1, %v2651_v4 }
 0x188   : > { %2458 = vmatprep.subr.bf16.mxu1 %v2651_v4 }
 0x18e   : > { %2449 = vmatmul.mubr.msk.bf16.vlgmr.msra.gmra.mxu1 %vm794_vm3, %v1366_v34 }
 0x18f   : > { %2459 = vmatpush3.bf16.xpose.msra.mxu1 %v1483_v35  ;;  %2460 = vmatprep.mubr.msk.bf16.mxu1 %vm2652_vm1, %v2651_v4 }
 0x190   : > { %2470 = vmatprep.subr.bf16.mxu1 %v2651_v4 }
 0x196   : > { %2461 = vmatmul.mubr.msk.bf16.vlgmr.msra.gmra.mxu1 %vm794_vm3, %v1476_v37 }
 0x197   : > { %2471 = vmatpush3.bf16.xpose.msra.mxu1 %v1593_v38  ;;  %2472 = vmatprep.mubr.msk.bf16.mxu1 %vm2652_vm1, %v2651_v4 }
 0x198   : > { %2482 = vmatprep.subr.bf16.mxu1 %v2651_v4 }
 0x19e   : > { %2473 = vmatmul.mubr.msk.bf16.vlgmr.msra.gmra.mxu1 %vm794_vm3, %v1586_v39 }
 0x19f   : > { %2486 = vmatprep.mubr.msk.bf16.mxu1 %vm2652_vm1, %v2651_v4 }
 0x22a   : > { %v835_v41 = vpop.f32.mrf.mxu0 }
 0x22b   : > { %v836_v42 = vadd.f32 %v2276_v40, %v835_v41 }
 0x22c   : > { %v2390_v43 = vpop.f32.mrf.mxu0 }
 0x22d   : > { %v841_v44 = vsel %vm794_vm3, %v836_v42, -inf }
 0x22e   : > { %v946_v45 = vpop.f32.mrf.mxu1  ;;  %842 = vmax.xlane.f32.xlu0 %v841_v44  ;;  %v838_v46 = vpop.f32.mrf.mxu0 }
 0x22f   : > { %v947_v47 = vadd.f32 %v2276_v40, %v946_v45 }
 0x230   : > { %v2391_v48 = vpop.f32.mrf.mxu0  ;;  %v2402_v49 = vpop.f32.mrf.mxu1 }
 0x231   : > { %v952_v50 = vsel %vm794_vm3, %v947_v47, -inf }
 0x232   : > { %v949_v51 = vpop.f32.mrf.mxu1  ;;  %953 = vmax.xlane.f32.xlu1 %v952_v50 }
 0x234   : > { %v2403_v52 = vpop.f32.mrf.mxu1 }
 0x236   : > { %v1056_v53 = vpop.f32.mrf.mxu1 }
 0x237   : > { %v1057_v54 = vadd.f32 %v2276_v40, %v1056_v53 }
 0x238   : > { %v2414_v55 = vpop.f32.mrf.mxu1 }
 0x239   : > { %v1062_v56 = vsel %vm794_vm3, %v1057_v54, -inf }
 0x23a   : > { %v1059_v57 = vpop.f32.mrf.mxu1  ;;  %1063 = vmax.xlane.f32.xlu0 %v1062_v56 }
 0x23c   : > { %v2415_v58 = vpop.f32.mrf.mxu1 }
 0x23e   : > { %v1166_v59 = vpop.f32.mrf.mxu1 }
 0x23f   : > { %v2910_v60 = vadd.f32 %v2276_v40, %v1166_v59 }
 0x240   : > { %v2426_v61 = vpop.f32.mrf.mxu1 }
 0x241   : > { %v1172_v62 = vsel %vm794_vm3, %v2910_v60, -inf }
 0x242   : > { %v1169_v63 = vpop.f32.mrf.mxu1  ;;  %1173 = vmax.xlane.f32.xlu0 %v1172_v62 }
 0x244   : > { %v2427_v0 = vpop.f32.mrf.mxu1 }
 0x246   : > { %v1299_v2 = vpop.f32.mrf.mxu1 }
 0x247   : > { %v2917_v3 = vadd.f32 %v2285_v1, %v1299_v2 }
 0x248   : > { %v2438_v5 = vpop.f32.mrf.mxu1 }
 0x249   : > { %v1305_v8 = vsel %vm794_vm3, %v2917_v3, -inf }
 0x24a   : > { %1306 = vmax.xlane.f32.xlu1 %v1305_v8  ;;  %v1302_v9 = vpop.f32.mrf.mxu1 }
 0x24c   : > { %v2439_v10 = vpop.f32.mrf.mxu1 }
 0x24e   : > { %v1409_v11 = vpop.f32.mrf.mxu1 }
 0x24f   : > { %v2921_v12 = vadd.f32 %v2285_v1, %v1409_v11 }
 0x250   : > { %v2450_v14 = vpop.f32.mrf.mxu1 }
 0x251   : > { %v1415_v15 = vsel %vm794_vm3, %v2921_v12, -inf }
 0x252   : > { %v1412_v16 = vpop.f32.mrf.mxu1  ;;  %1416 = vmax.xlane.f32.xlu0 %v1415_v15 }
 0x254   : > { %v2451_v18 = vpop.f32.mrf.mxu1 }
 0x256   : > { %v1519_v19 = vpop.f32.mrf.mxu1 }
 0x257   : > { %v1520_v20 = vadd.f32 %v2285_v1, %v1519_v19 }
 0x258   : > { %v2462_v21 = vpop.f32.mrf.mxu1 }
 0x259   : > { %v1525_v22 = vsel %vm794_vm3, %v1520_v20, -inf }
 0x25a   : > { %1526 = vmax.xlane.f32.xlu1 %v1525_v22  ;;  %v1522_v23 = vpop.f32.mrf.mxu1 }
 0x25c   : > { %v2463_v24 = vpop.f32.mrf.mxu1 }
 0x25e   : > { %v1629_v25 = vpop.f32.mrf.mxu1 }
 0x25f   : > { %v2930_v29 = vadd.f32 %v2285_v1, %v1629_v25 }
 0x260   : > { %v2474_v26 = vpop.f32.mrf.mxu1 }
 0x261   : > { %v1635_v30 = vsel %vm794_vm3, %v2930_v29, -inf }
 0x262   : > { %v1632_v27 = vpop.f32.mrf.mxu1 }
 0x264   : > { %v2475_v28 = vpop.f32.mrf.mxu1 }
 0x268   : > { %964 = vrot.lane.b32.xlu0 %v2844_v13, %s2660_s28 }
 0x26b   : > { %853 = vrot.lane.b32.xlu1 %v2844_v13, %s2661_s14 }
 0x287   : > { %1636 = vmax.xlane.f32.xlu0 %v1635_v30 }
 0x2b7   : > { %v843_v31 = vpop.xlane.xlu0 %842 }
 0x2b8   : > { %v844_v32 = vsub.f32 %v836_v42, %v843_v31 }
 0x2ba   : > { %v845_v33 = vmul.f32 1.442695, %v844_v32 }
 0x2bb   : > { %v954_v34 = vpop.xlane.xlu1 %953 }
 0x2bc   : > { %2587 = vpow2.f32 %v845_v33  ;;  %v955_v35 = vsub.f32 %v947_v47, %v954_v34 }
 0x2be   : > { %v956_v36 = vmul.f32 1.442695, %v955_v35 }
 0x2c0   : > { %2589 = vpow2.f32 %v956_v36 }
 0x2c3   : > { %v1064_v37 = vpop.xlane.xlu0 %1063 }
 0x2c4   : > { %v1065_v38 = vsub.f32 %v1057_v54, %v1064_v37 }
 0x2c6   : > { %v1066_v39 = vmul.f32 1.442695, %v1065_v38 }
 0x2c8   : > { %2591 = vpow2.f32 %v1066_v39 }
 0x2c9   : > { %v2934_v40 = vpop.eup %2587 }
 0x2ca   : > { %v847_v41 = vsel %vm794_vm3, %v2934_v40, 0.0 }
 0x2cb   : > { %848 = vadd.xlane.f32.xlu1 %v847_v41  ;;  %v1174_v49 = vpop.xlane.xlu0 %1173 }
 0x2cc   : > { %v1175_v51 = vsub.f32 %v2910_v60, %v1174_v49 }
 0x2cd   : > { %v2938_v43 = vpop.eup %2589 }
 0x2ce   : > { %v958_v42 = vsel %vm794_vm3, %v2938_v43, 0.0  ;;  %v1176_v52 = vmul.f32 1.442695, %v1175_v51 }
 0x2cf   : > { %959 = vadd.xlane.f32.xlu0 %v958_v42 }
 0x2d0   : > { %2593 = vpow2.f32 %v1176_v52 }
 0x2d3   : > { %v1307_v46 = vpop.xlane.xlu1 %1306 }
 0x2d4   : > { %v1308_v53 = vsub.f32 %v2917_v3, %v1307_v46 }
 0x2d5   : > { %v2942_v44 = vpop.eup %2591 }
 0x2d6   : > { %v1068_v45 = vsel %vm794_vm3, %v2942_v44, 0.0  ;;  %v1309_v56 = vmul.f32 1.442695, %v1308_v53 }
 0x2d7   : > { %1069 = vadd.xlane.f32.xlu1 %v1068_v45 }
 0x2d8   : > { %2595 = vpow2.f32 %v1309_v56 }
 0x2db   : > { %v1417_v54 = vpop.xlane.xlu0 %1416 }
 0x2dc   : > { %v1418_v55 = vsub.f32 %v2921_v12, %v1417_v54 }
 0x2de   : > { %v1419_v58 = vmul.f32 1.442695, %v1418_v55 }
 0x2df   : > { %v965_v3 = vpop.permute.xlu0 %964 }
 0x2e0   : > { %2597 = vpow2.f32 %v1419_v58  ;;  %v970_v21 = vsel %vm858_vm4, %v965_v3, 0 }
 0x2e3   : > { %v1527_v47 = vpop.xlane.xlu1 %1526 }
 0x2e4   : > { %v1528_v57 = vsub.f32 %v1520_v20, %v1527_v47 }
 0x2e5   : > { %1074 = vrot.lane.b32.xlu0 %v2844_v13, %s2662_s15 }
 0x2e6   : > { %v1529_v59 = vmul.f32 1.442695, %v1528_v57 }
 0x2e7   : > { %v854_v48 = vpop.permute.xlu1 %853 }
 0x2e8   : > { %v860_v50 = vsel %vm858_vm4, %v854_v48, 0  ;;  %1184 = vrot.lane.b32.xlu1 %v2844_v13, %s2663_s19  ;;  %2599 = vpow2.f32 %v1529_v59  ;;  %v2594_v13 = vpop.eup %2593 }
 0x2e9   : > { %2393 = vmatpush3.bf16.msra.mxu0 %v860_v50  ;;  %v1178_v61 = vsel %vm794_vm3, %v2594_v13, 0.0  ;;  %v2956_v62 = vpop.eup %2595 }
 0x2ea   : > { %2404 = vmatprep.subr.bf16.mxu0 %v2651_v4  ;;  %v1311_v63 = vsel %vm794_vm3, %v2956_v62, 0.0 }
 0x2ed   : > { %v2958_v60 = vpop.eup %2597 }
 0x2ee   : > { %v1421_v2 = vsel %vm794_vm3, %v2958_v60, 0.0 }
 0x2f5   : > { %v2962_v0 = vpop.eup %2599 }
 0x2f6   : > { %v1531_v1 = vsel %vm794_vm3, %v2962_v0, 0.0 }
 0x304   : > { %1179 = vadd.xlane.f32.xlu0 %v1178_v61 }
 0x308   : > { %1312 = vadd.xlane.f32.xlu0 %v1311_v63 }
 0x30c   : > { %1532 = vadd.xlane.f32.xlu0 %v1531_v1  ;;  %1422 = vadd.xlane.f32.xlu1 %v1421_v2 }
 0x310   : > { %v1637_v5 = vpop.xlane.xlu0 %1636 }
 0x311   : > { %v1638_v8 = vsub.f32 %v2930_v29, %v1637_v5 }
 0x313   : > { %v1639_v9 = vmul.f32 1.442695, %v1638_v8 }
 0x315   : > { %2601 = vpow2.f32 %v1639_v9 }
 0x31d   : > { %1427 = vrot.lane.b32.xlu1 %v2852_v17, %s2660_s28 }
 0x321   : > { %1537 = vrot.lane.b32.xlu1 %v2852_v17, %s2662_s15  ;;  %s3151_s15 = scalar_lea.vmem %s3124_s7, %s2764_s17  ;;  %s3152_s17 = sld [smem:[#allocation10_spill]] (!%p2315_p6) }
 0x322   : > { %v2973_v10 = vpop.eup %2601 }
 0x323   : > { %v1641_v11 = vsel %vm794_vm3, %v2973_v10, 0.0 }
 0x324   : > { %1642 = vadd.xlane.f32.xlu0 %v1641_v11 }
 0x325   : > { %1647 = vrot.lane.b32.xlu1 %v2852_v17, %s2663_s19 }
 0x33a   : > { %1317 = vrot.lane.b32.xlu0 %v2852_v17, %s2661_s14 }
 0x354   : > { %v849_v12 = vpop.xlane.xlu1 %848 }
 0x355   : > { %2603 = vrcp.f32 %v849_v12 }
 0x358   : > { %v960_v14 = vpop.xlane.xlu0 %959 }
 0x359   : > { %2605 = vrcp.f32 %v960_v14 }
 0x35c   : > { %v1075_v22 = vpop.permute.xlu0 %1074 }
 0x35d   : > { %v1080_v25 = vsel %vm858_vm4, %v1075_v22, 0 }
 0x360   : > { %v1070_v15 = vpop.xlane.xlu1 %1069 }
 0x361   : > { %2607 = vrcp.f32 %v1070_v15 }
 0x362   : > { %v2604_v16 = vpop.eup %2603 }
 0x363   : > { %v851_v18 = vmul.f32 %v2604_v16, %v2934_v40 }
 0x364   : > { %v1185_v27 = vpop.permute.xlu1 %1184 }
 0x365   : > { %v852_v19 = vpack.c.bf16 %v851_v18, %v851_v18  ;;  %v1190_v29 = vsel %vm858_vm4, %v1185_v27, 0 }
 0x366   : > { %v2606_v20 = vpop.eup %2605 }
 0x367   : > { %2395 = vmatmul.mubr.msk.bf16.vlgmr.msra.gmra.mxu0 %vm794_vm3, %v852_v19  ;;  %v962_v17 = vmul.f32 %v2606_v20, %v2938_v43  ;;  %v2575_v19 = vld [vmem:[%s2777_s27 + $0x8] sm:$0xff]  }
 0x368   : > { %2405 = vmatpush3.bf16.msra.mxu0 %v970_v21  ;;  %2406 = vmatprep.mubr.msk.bf16.mxu0 %vm2652_vm1, %v2651_v4 }
 0x369   : > { %2416 = vmatprep.subr.bf16.mxu0 %v2651_v4  ;;  %v963_v23 = vpack.c.bf16 %v962_v17, %v962_v17  ;;  %2483 = vmatpush3.bf16.msra.mxu1 %v2575_v19 }
 0x36a   : > { %2484 = vmatprep.subr.bf16.mxu1 %v2651_v4 }
 0x36e   : > { %v2608_v24 = vpop.eup %2607 }
 0x36f   : > { %2407 = vmatmul.mubr.msk.bf16.vlgmr.msra.gmra.mxu0 %vm794_vm3, %v963_v23  ;;  %v1072_v26 = vmul.f32 %v2608_v24, %v2942_v44  ;;  %v2576_v23 = vld [vmem:[%s2777_s27] sm:$0xff]  }
 0x370   : > { %2417 = vmatpush3.bf16.msra.mxu0 %v1080_v25  ;;  %2418 = vmatprep.mubr.msk.bf16.mxu0 %vm2652_vm1, %v2651_v4 }
 0x371   : > { %2428 = vmatprep.subr.bf16.mxu0 %v2651_v4  ;;  %v1073_v28 = vpack.c.bf16 %v1072_v26, %v1072_v26  ;;  %2485 = vmatpush3.bf16.msra.mxu1 %v2576_v23  ;;  %v2298_v23 = vld [vmem:[%s3150_s20] ss:$0 sm:$0xff] }
 0x372   : > { %2498 = vmatprep.subr.bf16.mxu1 %v2651_v4 }
 0x377   : > { %2419 = vmatmul.mubr.msk.bf16.vlgmr.msra.gmra.mxu0 %vm794_vm3, %v1073_v28 }
 0x378   : > { %2429 = vmatpush3.bf16.msra.mxu0 %v1190_v29  ;;  %2430 = vmatprep.mubr.msk.bf16.mxu0 %vm2652_vm1, %v2651_v4 }
 0x379   : > { %2440 = vmatprep.subr.bf16.mxu0 %v2651_v4 }
 0x38d   : > { %v1180_v30 = vpop.xlane.xlu0 %1179 }
 0x38e   : > { %2609 = vrcp.f32 %v1180_v30 }
 0x391   : > { %v1313_v33 = vpop.xlane.xlu0 %1312 }
 0x392   : > { %2611 = vrcp.f32 %v1313_v33 }
 0x395   : > { %v1423_v35 = vpop.xlane.xlu1 %1422  ;;  %v1533_v36 = vpop.xlane.xlu0 %1532 }
 0x396   : > { %2613 = vrcp.f32 %v1423_v35 }
 0x397   : > { %2615 = vrcp.f32 %v1533_v36 }
 0x399   : > { %v1428_v43 = vpop.permute.xlu1 %1427 }
 0x39a   : > { %v1433_v45 = vsel %vm858_vm4, %v1428_v43, 0 }
 0x39b   : > { %v2610_v31 = vpop.eup %2609 }
 0x39c   : > { %v1182_v32 = vmul.f32 %v2610_v31, %v2594_v13 }
 0x39d   : > { %v1538_v47 = vpop.permute.xlu1 %1537 }
 0x39e   : > { %v1183_v34 = vpack.c.bf16 %v1182_v32, %v1182_v32  ;;  %v1543_v50 = vsel %vm858_vm4, %v1538_v47, 0 }
 0x39f   : > { %v2612_v37 = vpop.eup %2611 }
 0x3a0   : > { %2431 = vmatmul.mubr.msk.bf16.vlgmr.msra.gmra.mxu0 %vm794_vm3, %v1183_v34  ;;  %v1315_v39 = vmul.f32 %v2612_v37, %v2956_v62 }
 0x3a1   : > { %2442 = vmatprep.mubr.msk.bf16.mxu0 %vm2652_vm1, %v2651_v4  ;;  %v1648_v52 = vpop.permute.xlu1 %1647 }
 0x3a2   : > { %v1316_v42 = vpack.c.bf16 %v1315_v39, %v1315_v39  ;;  %v1653_v55 = vsel %vm858_vm4, %v1648_v52, 0 }
 0x3a3   : > { %v2614_v44 = vpop.eup %2613 }
 0x3a4   : > { %v1425_v46 = vmul.f32 %v2614_v44, %v2958_v60  ;;  %v2616_v49 = vpop.eup %2615 }
 0x3a5   : > { %v1535_v51 = vmul.f32 %v2616_v49, %v2962_v0 }
 0x3a6   : > { %v1426_v48 = vpack.c.bf16 %v1425_v46, %v1425_v46 }
 0x3a7   : > { %v1536_v53 = vpack.c.bf16 %v1535_v51, %v1535_v51 }
 0x3ad   : > { %v1643_v38 = vpop.xlane.xlu0 %1642 }
 0x3ae   : > { %2617 = vrcp.f32 %v1643_v38 }
 0x3b1   : > { %v1318_v40 = vpop.permute.xlu0 %1317 }
 0x3b2   : > { %v1323_v41 = vsel %vm858_vm4, %v1318_v40, 0 }
 0x3b3   : > { %2441 = vmatpush3.bf16.msra.mxu0 %v1323_v41 }
 0x3b4   : > { %2452 = vmatprep.subr.bf16.mxu0 %v2651_v4 }
 0x3b6   : > { %2443 = vmatmul.mubr.msk.bf16.vlgmr.msra.gmra.mxu0 %vm794_vm3, %v1316_v42 }
 0x3b7   : > { %2453 = vmatpush3.bf16.msra.mxu0 %v1433_v45  ;;  %2454 = vmatprep.mubr.msk.bf16.mxu0 %vm2652_vm1, %v2651_v4 }
 0x3b8   : > { %2464 = vmatprep.subr.bf16.mxu0 %v2651_v4 }
 0x3bb   : > { %v2618_v54 = vpop.eup %2617 }
 0x3bc   : > { %v1645_v56 = vmul.f32 %v2618_v54, %v2973_v10 }
 0x3be   : > { %2455 = vmatmul.mubr.msk.bf16.vlgmr.msra.gmra.mxu0 %vm794_vm3, %v1426_v48  ;;  %v1646_v57 = vpack.c.bf16 %v1645_v56, %v1645_v56 }
 0x3bf   : > { %2465 = vmatpush3.bf16.msra.mxu0 %v1543_v50  ;;  %2466 = vmatprep.mubr.msk.bf16.mxu0 %vm2652_vm1, %v2651_v4  ;;  %v2294_v50 = vld [vmem:[%s3149_s16] ss:$0 sm:$0xff] }
 0x3c0   : > { %2476 = vmatprep.subr.bf16.mxu0 %v2651_v4 }
 0x3c6   : > { %2467 = vmatmul.mubr.msk.bf16.vlgmr.msra.gmra.mxu0 %vm794_vm3, %v1536_v53 }
 0x3c7   : > { %2477 = vmatpush3.bf16.msra.mxu0 %v1653_v55  ;;  %2478 = vmatprep.mubr.msk.bf16.mxu0 %vm2652_vm1, %v2651_v4 }
 0x3c8   : > { %2490 = vmatprep.subr.bf16.mxu0 %v2651_v4 }
 0x3ce   : > { %2479 = vmatmul.mubr.msk.bf16.vlgmr.msra.gmra.mxu0 %vm794_vm3, %v1646_v57 }
 0x3cf   : > { %2494 = vmatprep.mubr.msk.bf16.mxu0 %vm2652_vm1, %v2651_v4 }
 0x427   : > { %v896_v58 = vpop.f32.mrf.mxu0 }
 0x429   : > { %v2396_v59 = vpop.f32.mrf.mxu0 }
 0x42b   : > { %v899_v13 = vpop.f32.mrf.mxu0 }
 0x42d   : > { %v2397_v61 = vpop.f32.mrf.mxu0 }
 0x42f   : > { %v1006_v62 = vpop.f32.mrf.mxu0 }
 0x431   : > { %v2408_v60 = vpop.f32.mrf.mxu0 }
 0x433   : > { %v1009_v63 = vpop.f32.mrf.mxu0 }
 0x435   : > { %v2409_v0 = vpop.f32.mrf.mxu0 }
 0x437   : > { %v1116_v1 = vpop.f32.mrf.mxu0 }
 0x439   : > { %v2420_v2 = vpop.f32.mrf.mxu0 }
 0x43b   : > { %v1119_v3 = vpop.f32.mrf.mxu0 }
 0x43d   : > { %v2421_v5 = vpop.f32.mrf.mxu0 }
 0x43e   : > { %v2577_v5 = vld [vmem:[%s2794_s23 + $0x8] sm:$0xff]  }
 0x43f   : > { %2491 = vmatpush3.bf16.msra.mxu0 %v2577_v5 }
 0x440   : > { %2492 = vmatprep.subr.bf16.mxu0 %v2651_v4 }
 0x460   : > { %v1226_v8 = vpop.f32.mrf.mxu0 }
 0x462   : > { %v2432_v9 = vpop.f32.mrf.mxu0 }
 0x463   : > { %v2579_v9 = vld [vmem:[%s2804_s30 + $0x38] sm:$0xff]  }
 0x464   : > { %v1229_v10 = vpop.f32.mrf.mxu0 }
 0x465   : > { %v2580_v10 = vld [vmem:[%s2804_s30 + $0x30] sm:$0xff]  }
 0x466   : > { %v2433_v11 = vpop.f32.mrf.mxu0 }
 0x467   : > { %v2581_v11 = vld [vmem:[%s2804_s30 + $0x28] sm:$0xff]  }
 0x476   : > { %v1359_v12 = vpop.f32.mrf.mxu0 }
 0x478   : > { %v2444_v14 = vpop.f32.mrf.mxu0 }
 0x479   : > { %v2583_v14 = vld [vmem:[%s2804_s30 + $0x18] sm:$0xff]  }
 0x47a   : > { %v1362_v15 = vpop.f32.mrf.mxu0 }
 0x47c   : > { %v2445_v16 = vpop.f32.mrf.mxu0 }
 0x47e   : > { %v1469_v18 = vpop.f32.mrf.mxu0 }
 0x47f   : > { %v2558_v20 = vpack.i.bf16 %v1469_v18, %v1006_v62 }
 0x480   : > { %v2456_v21 = vpop.f32.mrf.mxu0 }
 0x481   : > { %2559 = vrot.lane.b32.xlu1 %v2558_v20, %s2664_s18 }
 0x482   : > { %v1472_v17 = vpop.f32.mrf.mxu0 }
 0x484   : > { %v2457_v22 = vpop.f32.mrf.mxu0 }
 0x486   : > { %v1579_v24 = vpop.f32.mrf.mxu0 }
 0x487   : > { %v2563_v25 = vpack.i.bf16 %v1579_v24, %v1116_v1 }
 0x488   : > { %v2468_v26 = vpop.f32.mrf.mxu0 }
 0x489   : > { %2564 = vrot.lane.b32.xlu1 %v2563_v25, %s2665_s22 }
 0x48a   : > { %v1582_v27 = vpop.f32.mrf.mxu0 }
 0x48b   : > { %v2299_v27 = vld [vmem:[%s3151_s15] ss:$0 sm:$0xff] }
 0x48c   : > { %v2469_v28 = vpop.f32.mrf.mxu0 }
 0x48e   : > { %v1689_v29 = vpop.f32.mrf.mxu0 }
 0x48f   : > { %v2568_v30 = vpack.i.bf16 %v1689_v29, %v1226_v8  ;;  %v2578_v8 = vld [vmem:[%s2794_s23] sm:$0xff]  }
 0x490   : > { %v2480_v31 = vpop.f32.mrf.mxu0  ;;  %2493 = vmatpush3.bf16.msra.mxu0 %v2578_v8  ;;  %v2313_v8 = vld [vmem:[%s684_s21] ss:$0 sm:$0xff] }
 0x491   : > { %2569 = vrot.lane.b32.xlu0 %v2568_v30, %s2666_s25 }
 0x492   : > { %v1692_v32 = vpop.f32.mrf.mxu0 }
 0x493   : > { %v2584_v32 = vld [vmem:[%s2804_s30 + $0x10] sm:$0xff]  }
 0x494   : > { %v2481_v33 = vpop.f32.mrf.mxu0 }
 0x495   : > { %v2585_v33 = vld [vmem:[%s2804_s30 + $0x8] sm:$0xff]  }
 0x4f3   : > { %v2560_v34 = vpop.permute.xlu1 %2559 }
 0x4f4   : > { %v2562_v36 = vunpack.i.h.bf16 %v2560_v34  ;;  %v2561_v37 = vunpack.i.l.bf16 %v2560_v34  ;;  %v2586_v34 = vld [vmem:[%s2804_s30] sm:$0xff]  }
 0x4f6   : > { %v1707_v41 = vsel %vm794_vm3, %v1359_v12, %v2562_v36  ;;  %v1244_v43 = vsel %vm794_vm3, %v896_v58, %v2561_v37  ;;  %v2582_v12 = vld [vmem:[%s2804_s30 + $0x20] sm:$0xff]  }
 0x4fb   : > { %v2565_v35 = vpop.permute.xlu1 %2564 }
 0x4fc   : > { %v2567_v38 = vunpack.i.h.bf16 %v2565_v35  ;;  %v2566_v39 = vunpack.i.l.bf16 %v2565_v35  ;;  %v2300_v35 = vld [vmem:[%s673_s2] ss:$0 sm:$0xff] }
 0x4fe   : > { %v1708_v45 = vsel %vm1245_vm5, %v1707_v41, %v2567_v38  ;;  %v1246_v46 = vsel %vm1245_vm5, %v1244_v43, %v2566_v39 }
 0x503   : > { %v2570_v40 = vpop.permute.xlu0 %2569 }
 0x504   : > { %v2572_v42 = vunpack.i.h.bf16 %v2570_v40  ;;  %v2571_v44 = vunpack.i.l.bf16 %v2570_v40 }
 0x506   : > { %v1709_v47 = vsel %vm1247_vm6, %v1708_v45, %v2572_v42  ;;  %v1248_v48 = vsel %vm1247_vm6, %v1246_v46, %v2571_v44 }
 0x507   : > { %v1710_v49 = vpack.c.bf16 %v1709_v47, %v1248_v48 }
 0x509   : > { %2487 = vmatmul.mubr.msk.bf16.vlgmr.msra.gmra.mxu1 %vm734_vm2, %v1710_v49 }
 0x50a   : > { %2514 = vmatprep.mubr.msk.bf16.mxu1 %vm2652_vm1, %v2651_v4  ;;  %2499 = vmatpush3.bf16.msra.mxu1 %v2579_v9 }
 0x50b   : > { %2500 = vmatprep.subr.bf16.mxu1 %v2651_v4 }
 0x50e   : > { %2501 = vmatpush3.bf16.msra.mxu1 %v2580_v10  ;;  %v2314_v10 = vld [vmem:[%s687_s1] ss:$0 sm:$0xff] }
 0x50f   : > { %2502 = vmatprep.subr.bf16.mxu1 %v2651_v4 }
 0x512   : > { %2503 = vmatpush3.bf16.msra.mxu1 %v2581_v11 }
 0x513   : > { %2504 = vmatprep.subr.bf16.mxu1 %v2651_v4 }
 0x516   : > { %2505 = vmatpush3.bf16.msra.mxu1 %v2582_v12 }
 0x517   : > { %2506 = vmatprep.subr.bf16.mxu1 %v2651_v4 }
 0x51a   : > { %2507 = vmatpush3.bf16.msra.mxu1 %v2583_v14 }
 0x51b   : > { %2508 = vmatprep.subr.bf16.mxu1 %v2651_v4 }
 0x51e   : > { %2509 = vmatpush3.bf16.msra.mxu1 %v2584_v32 }
 0x51f   : > { %2510 = vmatprep.subr.bf16.mxu1 %v2651_v4 }
 0x522   : > { %2511 = vmatpush3.bf16.msra.mxu1 %v2585_v33 }
 0x523   : > { %2512 = vmatprep.subr.bf16.mxu1 %v2651_v4  ;;  %v2304_v4 = vld [vmem:[%s681_s0] ss:$0 sm:$0xff] }
 0x526   : > { %2513 = vmatpush3.bf16.msra.mxu1 %v2586_v34 }
 0x5c9   : > { %v1766_v51 = vpop.f32.mrf.mxu1 }
 0x5ca   : > { %v1767_v52 = vadd.f32 %v2294_v50, %v1766_v51 }
 0x5cb   : > { %v2488_v53 = vpop.f32.mrf.mxu1 }
 0x5cc   : > { %v1773_v54 = vadd.f32 %v1767_v52, %v2826_v6 }
 0x5cd   : > { %v1769_v55 = vpop.f32.mrf.mxu1 }
 0x5ce   : > { %v1770_v56 = vadd.f32 %v2294_v50, %v1769_v55  ;;  %v1777_v57 = vsel %vm734_vm2, %v1773_v54, 0.0 }
 0x5cf   : > { %1778 = vadd.xlane.f32.xlu1 %v1777_v57  ;;  %v2489_v58 = vpop.f32.mrf.mxu1 }
 0x5d0   : > { %v1774_v59 = vadd.f32 %v1770_v56, %v2828_v7 }
 0x5d2   : > { %v1780_v13 = vsel %vm734_vm2, %v1774_v59, 0.0 }
 0x5d3   : > { %1781 = vadd.xlane.f32.xlu0 %v1780_v13 }
 0x658   : > { %v1779_v61 = vpop.xlane.xlu1 %1778 }
 0x659   : > { %v1784_v62 = vmul.f32 0.03125, %v1779_v61 }
 0x65b   : > { %v1786_v60 = vsub.f32 %v1773_v54, %v1784_v62 }
 0x65c   : > { %v1782_v63 = vpop.xlane.xlu0 %1781 }
 0x65d   : > { %v1785_v6 = vmul.f32 0.03125, %v1782_v63  ;;  %v1788_v0 = vmul.f32 %v1786_v60, %v1786_v60 }
 0x65f   : > { %v1787_v1 = vsub.f32 %v1774_v59, %v1785_v6  ;;  %v1790_v2 = vsel %vm734_vm2, %v1788_v0, 0.0 }
 0x660   : > { %1791 = vadd.xlane.f32.xlu0 %v1790_v2 }
 0x661   : > { %v1789_v3 = vmul.f32 %v1787_v1, %v1787_v1 }
 0x663   : > { %v1793_v7 = vsel %vm734_vm2, %v1789_v3, 0.0 }
 0x664   : > { %1794 = vadd.xlane.f32.xlu1 %v1793_v7 }
 0x6e9   : > { %v1792_v15 = vpop.xlane.xlu0 %1791 }
 0x6ea   : > { %v1796_v16 = vmul.f32 0.03125, %v1792_v15 }
 0x6ec   : > { %v1798_v18 = vadd.f32 1e-05, %v1796_v16 }
 0x6ed   : > { %v1795_v19 = vpop.xlane.xlu1 %1794 }
 0x6ee   : > { %2619 = vrsqrt.f32 %v1798_v18  ;;  %v1797_v20 = vmul.f32 0.03125, %v1795_v19 }
 0x6f0   : > { %v1799_v21 = vadd.f32 1e-05, %v1797_v20 }
 0x6f2   : > { %2621 = vrsqrt.f32 %v1799_v21 }
 0x6fb   : > { %v2620_v17 = vpop.eup %2619 }
 0x6fc   : > { %v1802_v22 = vmul.f32 %v2620_v17, %v1786_v60 }
 0x6fe   : > { %v1810_v26 = vmul.f32 %v2298_v23, %v1802_v22 }
 0x6ff   : > { %v2622_v24 = vpop.eup %2621 }
 0x700   : > { %v1803_v25 = vmul.f32 %v2622_v24, %v1787_v1  ;;  %v1818_v29 = vadd.f32 %v2299_v27, %v1810_v26 }
 0x702   : > { %v1811_v28 = vmul.f32 %v2298_v23, %v1803_v25 }
 0x704   : > { %v1819_v30 = vadd.f32 %v2299_v27, %v1811_v28 }
 0x706   : > { %v1820_v31 = vpack.c.bf16 %v1819_v30, %v1818_v29 }
 0x708   : > { %2495 = vmatmul.mubr.msk.bf16.vlgmr.msra.gmra.mxu0 %vm734_vm2, %v1820_v31 }
 0x7c8   : > { %v1881_v36 = vpop.f32.mrf.mxu0 }
 0x7c9   : > { %v1882_v38 = vadd.f32 %v2300_v35, %v1881_v36 }
 0x7ca   : > { %v2496_v37 = vpop.f32.mrf.mxu0 }
 0x7cb   : > { %v1888_v43 = vmax.f32 %v1882_v38, 0.0 }
 0x7cc   : > { %v1884_v39 = vpop.f32.mrf.mxu0 }
 0x7cd   : > { %v1885_v40 = vadd.f32 %v2300_v35, %v1884_v39 }
 0x7ce   : > { %v2497_v41 = vpop.f32.mrf.mxu0 }
 0x7cf   : > { %v1889_v42 = vmax.f32 %v1885_v40, 0.0 }
 0x7d1   : > { %v1890_v44 = vpack.c.bf16 %v1889_v42, %v1888_v43 }
 0x7d3   : > { %2515 = vmatmul.mubr.bf16.vlgmr.msra.gmra.mxu1 %v1890_v44 }
 0x893   : > { %v1996_v45 = vpop.f32.mrf.mxu1 }
 0x894   : > { %v1997_v46 = vadd.f32 %v2304_v4, %v1996_v45 }
 0x895   : > { %v2516_v47 = vpop.f32.mrf.mxu1 }
 0x896   : > { %v2003_v48 = vadd.f32 %v1997_v46, %v1818_v29 }
 0x897   : > { %v1999_v49 = vpop.f32.mrf.mxu1 }
 0x898   : > { %v2000_v50 = vadd.f32 %v2304_v4, %v1999_v49  ;;  %v2007_v51 = vsel %vm734_vm2, %v2003_v48, 0.0 }
 0x899   : > { %2008 = vadd.xlane.f32.xlu0 %v2007_v51  ;;  %v2517_v52 = vpop.f32.mrf.mxu1 }
 0x89a   : > { %v2004_v53 = vadd.f32 %v2000_v50, %v1819_v30 }
 0x89c   : > { %v2010_v54 = vsel %vm734_vm2, %v2004_v53, 0.0 }
 0x89d   : > { %2011 = vadd.xlane.f32.xlu1 %v2010_v54 }
 0x922   : > { %v2009_v55 = vpop.xlane.xlu0 %2008 }
 0x923   : > { %v2013_v56 = vmul.f32 0.03125, %v2009_v55 }
 0x925   : > { %v2015_v57 = vsub.f32 %v2003_v48, %v2013_v56 }
 0x926   : > { %v2012_v58 = vpop.xlane.xlu1 %2011 }
 0x927   : > { %v2014_v59 = vmul.f32 0.03125, %v2012_v58  ;;  %v2017_v13 = vmul.f32 %v2015_v57, %v2015_v57 }
 0x929   : > { %v2016_v61 = vsub.f32 %v2004_v53, %v2014_v59  ;;  %v2019_v62 = vsel %vm734_vm2, %v2017_v13, 0.0 }
 0x92a   : > { %2020 = vadd.xlane.f32.xlu0 %v2019_v62 }
 0x92b   : > { %v2018_v60 = vmul.f32 %v2016_v61, %v2016_v61 }
 0x92d   : > { %v2022_v63 = vsel %vm734_vm2, %v2018_v60, 0.0 }
 0x92e   : > { %2023 = vadd.xlane.f32.xlu1 %v2022_v63 }
 0x9b3   : > { %v2021_v6 = vpop.xlane.xlu0 %2020 }
 0x9b4   : > { %v2025_v0 = vmul.f32 0.03125, %v2021_v6 }
 0x9b6   : > { %v2027_v1 = vadd.f32 1e-05, %v2025_v0 }
 0x9b7   : > { %v2024_v2 = vpop.xlane.xlu1 %2023 }
 0x9b8   : > { %2623 = vrsqrt.f32 %v2027_v1  ;;  %v2026_v3 = vmul.f32 0.03125, %v2024_v2 }
 0x9ba   : > { %v2028_v7 = vadd.f32 1e-05, %v2026_v3 }
 0x9bc   : > { %2625 = vrsqrt.f32 %v2028_v7 }
 0x9c5   : > { %v2624_v5 = vpop.eup %2623 }
 0x9c6   : > { %v2031_v9 = vmul.f32 %v2624_v5, %v2015_v57 }
 0x9c8   : > { %v2039_v11 = vmul.f32 %v2313_v8, %v2031_v9 }
 0x9c9   : > { %v2626_v12 = vpop.eup %2625 }
 0x9ca   : > { %v2047_v14 = vadd.f32 %v2314_v10, %v2039_v11  ;;  %v2032_v15 = vmul.f32 %v2626_v12, %v2016_v61 }
 0x9cc   : > { %2049 = vst.msk [vmem:[#allocation2] sm:$0xff] %vm734_vm2, %v2047_v14  ;;  %v2040_v16 = vmul.f32 %v2313_v8, %v2032_v15  ;;  %2054 = sbr.rel (%p2315_p6) target bundleno = 2516 (0x9d4), region = 84 }
 0x9ce   : > { %v2048_v18 = vadd.f32 %v2314_v10, %v2040_v16 }
 0x9d0   : > { %2050 = vst.msk [vmem:[#allocation2 + $0x8] sm:$0xff] %vm734_vm2, %v2048_v18 }
 0x9d1   : > { %v2055_v19 = vpack.c.bf16 %v2047_v14, %v2047_v14  ;;  %vm2057_vm7 = vcmask 257024   ;;  %v2056_v20 = vpack.c.bf16 %v2048_v18, %v2048_v18 }
 0x9d3   : > { %2058 = vst.msk [vmem:[%s3152_s17] sm:$0xf] %vm2057_vm7, %v2055_v19  ;;  %2059 = vst.msk [vmem:[%s3152_s17 + $0x4] sm:$0xf] %vm2057_vm7, %v2056_v20 }
 0x9d4 PF: > { %s3153_s23 = sld [smem:[#allocation4_spill]] }
 0x9d5   : > { %s3154_s29 = sld [smem:[#allocation3_spill]] }
 0x9d6   : > { %s3155_s30 = sld [smem:[#allocation5_spill]] }
 0x9da   : > { %s24_s15 = sadd.s32 1, %s3153_s23  }
 0x9db   : > { %p21_p7 = scmp.ge.s32.totalorder %s24_s15, 4  }
 0x9dd   :  { %23 = sbr.rel (!%p21_p7) target bundleno = 6 (0x6), region = 153 }

// kernel: transformer_vae_forward.6
= control target key start
LH: loop header
LB: loop body
LE: loop exit
PB: predicated region body
PF: predicated region fallthrough
CT: control target
= control target key end

     0   :  { %s4794_s26 = smov 0   ;;  %s4796_s27 = smov 0   ;;  %s5465_s0 = inlined_call_operand.vmem [shape: bf16[2,8,32], index: 0, kind: input, shape index: {}]   ;;  %s5466_s1 = inlined_call_operand.vmem [shape: bf16[2,8,32], index: 1, kind: input, shape index: {}]   ;;  %s5467_s2 = inlined_call_operand.vmem [shape: f32[2,1,8], index: 2, kind: input, shape index: {}]   ;;  %s5468_s3 = inlined_call_operand.vmem [shape: f32[2,1,8], index: 3, kind: input, shape index: {}]   ;;  %s5469_s4 = inlined_call_operand.vmem [shape: bf16[2,32,96], index: 4, kind: input, shape index: {}]   ;;  %s5470_s5 = inlined_call_operand.vmem [shape: f32[2,1,96], index: 5, kind: input, shape index: {}]   ;;  %s5471_s6 = inlined_call_operand.vmem [shape: bf16[2,32,32], index: 6, kind: input, shape index: {}]   ;;  %s5472_s7 = inlined_call_operand.vmem [shape: f32[2,1,32], index: 7, kind: input, shape index: {}]   ;;  %s5473_s8 = inlined_call_operand.vmem [shape: bf16[2,32,32], index: 8, kind: input, shape index: {}]   ;;  %s5474_s9 = inlined_call_operand.vmem [shape: f32[2,1,32], index: 9, kind: input, shape index: {}]   ;;  %s5475_s10 = inlined_call_operand.vmem [shape: bf16[2,32,64], index: 10, kind: input, shape index: {}]   ;;  %s5476_s11 = inlined_call_operand.vmem [shape: f32[2,1,64], index: 11, kind: input, shape index: {}]   ;;  %s5477_s12 = inlined_call_operand.vmem [shape: bf16[2,32,32], index: 12, kind: input, shape index: {}]   ;;  %s5478_s13 = inlined_call_operand.vmem [shape: f32[2,1,32], index: 13, kind: input, shape index: {}]   ;;  %s5479_s14 = inlined_call_operand.vmem [shape: f32[2,1,32], index: 14, kind: input, shape index: {}]   ;;  %s5480_s15 = inlined_call_operand.vmem [shape: f32[2,1,32], index: 15, kind: input, shape index: {}]   ;;  %s5481_s16 = inlined_call_operand.vmem [shape: f32[2,1,32], index: 16, kind: input, shape index: {}]   ;;  %s5482_s17 = inlined_call_operand.vmem [shape: f32[2,1,32], index: 17, kind: input, shape index: {}]   ;;  %s5483_s18 = inlined_call_operand.vmem [shape: f32[2,1,32], index: 18, kind: input, shape index: {}]   ;;  %s5484_s19 = inlined_call_operand.vmem [shape: f32[2,1,32], index: 19, kind: input, shape index: {}]   ;;  %s5485_s20 = inlined_call_operand.vmem [shape: bf16[2,32,128], index: 20, kind: input, shape index: {}]   ;;  %s5486_s21 = inlined_call_operand.vmem [shape: f32[2,1,128], index: 21, kind: input, shape index: {}]   ;;  %s5487_s22 = inlined_call_operand.vmem [shape: bf16[2,128,32], index: 22, kind: input, shape index: {}]   ;;  %s5488_s23 = inlined_call_operand.vmem [shape: f32[2,1,32], index: 23, kind: input, shape index: {}]   ;;  %s5489_s24 = inlined_call_operand.vmem [shape: bf16[2,8,32], index: 24, kind: output, shape index: {}]  }
   0x1   :  { %5498 = sst [smem:[#allocation9_spill]] %s5465_s0 }
   0x2   :  { %5499 = sst [smem:[#allocation10_spill]] %s5466_s1 }
   0x3   :  { %5500 = sst [smem:[#allocation11_spill]] %s5467_s2 }
   0x4   :  { %5501 = sst [smem:[#allocation12_spill]] %s5468_s3 }
   0x5   :  { %5502 = sst [smem:[#allocation13_spill]] %s5469_s4 }
   0x6   :  { %5503 = sst [smem:[#allocation14_spill]] %s5470_s5  ;;  %s4792_s5 = smov 0  }
   0x7   :  { %5504 = sst [smem:[#allocation15_spill]] %s5471_s6 }
   0x8   :  { %5505 = sst [smem:[#allocation16_spill]] %s5472_s7 }
   0x9   :  { %5506 = sst [smem:[#allocation17_spill]] %s5473_s8 }
   0xa   :  { %5507 = sst [smem:[#allocation18_spill]] %s5474_s9 }
   0xb   :  { %5508 = sst [smem:[#allocation19_spill]] %s5475_s10 }
   0xc   :  { %5509 = sst [smem:[#allocation20_spill]] %s5477_s12 }
   0xd   :  { %5510 = sst [smem:[#allocation21_spill]] %s5482_s17 }
   0xe   :  { %5511 = sst [smem:[#allocation22_spill]] %s5486_s21 }
   0xf   :  { %5512 = sst [smem:[#allocation23_spill]] %s5487_s22 }
  0x10   :  { %5513 = sst [smem:[#allocation24_spill]] %s5488_s23 }
  0x11   :  { %5514 = sst [smem:[#allocation25_spill]] %s5489_s24 }
  0x12 LB: > { %5515 = sst [smem:[#allocation3_spill]] %s4641_s5  ;;  %s43_s28 = sadd.s32 1, %s4645_s26  ;;  %s4649_s27 = sphi %s4796_s27, %s34_s27   ;;  %s4645_s26 = sphi %s4794_s26, %s5560_s26   ;;  %s4641_s5 = sphi %s4792_s5, %s5559_s5  }
  0x13   : > { %5516 = sst [smem:[#allocation4_spill]] %s4645_s26  ;;  %p4001_p0 = scmp.ge.s32.totalorder %s4649_s27, 1 }
  0x14   : > { %5517 = sst [smem:[#allocation5_spill]] %s4649_s27  ;;  %p44_p1 = scmp.ge.s32.totalorder %s43_s28, 2 }
  0x15   : > { %p880_p2 = scmp.lt.s32.totalorder %s4649_s27, 3 }
  0x16   : > { %s5562_s28 = smov (%p44_p1, %s43_s28), 0 }
  0x17   : > { %5518 = sst [smem:[#allocation6_spill]] %s5562_s28  ;;  %p881_p3 = pnand %p4001_p0, %p880_p2 }
  0x19   : > { %884 = sbr.rel (%p881_p3) target bundleno = 4792 (0x12b8), region = 116 }
  0x1e   : > { %p1055_p4 = scmp.lt.s32.totalorder %s4641_s5, 1  ;;  %s5520_s8 = sld [smem:[#allocation13_spill]] }
  0x1f   : > { %s5521_s26 = sld [smem:[#allocation15_spill]] }
  0x20   : > { %s4814_s6 = scalar_select %p1055_p4, %s4641_s5, 1 }
  0x21   : > { %s5524_s0 = sld [smem:[#allocation17_spill]] }
  0x22   : > { %s4098_s2 = sshll.u32 %s4814_s6, 4  ;;  %s5526_s10 = sld [smem:[#allocation19_spill]] }
  0x23   : > { %s5527_s12 = sld [smem:[#allocation20_spill]]  ;;  %s1112_s25 = scalar_lea.vmem %s5484_s19, %s4814_s6 }
  0x24   : > { %s4824_s4 = scalar_lea.vmem %s5520_s8, %s4098_s2  ;;  %s4889_s8 = scalar_lea.vmem %s5485_s20, %s4098_s2 }
  0x25   : > { %s4829_s27 = scalar_lea.vmem %s5521_s26, %s4098_s2  ;;  %s5531_s5 = sld [smem:[#allocation23_spill]] }
  0x26   : > { %5522 = sst [smem:[#allocation7_spill]] %s4829_s27 }
  0x27   : > { %s4838_s7 = scalar_lea.vmem %s5524_s0, %s4098_s2  ;;  %s5530_s27 = sld [smem:[#allocation22_spill]] }
  0x28   : > { %s4847_s26 = scalar_lea.vmem %s5526_s10, %s4098_s2  ;;  %s4104_s10 = sshll.u32 %s4814_s6, 6 }
  0x29   : > { %s4856_s21 = scalar_lea.vmem %s5527_s12, %s4098_s2  ;;  %s5532_s29 = sld [smem:[#allocation24_spill]] }
  0x2a   : > { %5528 = sst [smem:[#allocation8_spill]] %s4856_s21 }
  0x2b   : > { %s4899_s17 = scalar_lea.vmem %s5531_s5, %s4104_s10  ;;  %s5533_s0 = sld [smem:[#allocation3_spill]] }
  0x2d   : > { %s1120_s1 = scalar_lea.vmem %s5530_s27, %s4814_s6 }
  0x2f   : > { %s1128_s30 = scalar_lea.vmem %s5532_s29, %s4814_s6 }
  0x31   : > { %p4016_p5 = scmp.ne.s32.totalorder %s5533_s0, 0 }
  0x32   : > { %s5534_s3 = sld [smem:[#allocation9_spill]] (!%p4016_p5) }
  0x33   : > { %1139 = sbr.rel (%p4016_p5) target bundleno = 60 (0x3c), region = 120 }
  0x38   : > { %v4106_v0 = vld [vmem:[%s5534_s3] sm:$0xff]   ;;  %vm1144_vm0 = vcmask 261120  }
  0x39   : > { %v4107_v1 = vunpack.c.l.bf16 %v4106_v0  ;;  %v4108_v2 = vunpack.c.h.bf16 %v4106_v0 }
  0x3b   : > { %1145 = vst.msk [vmem:[#allocation2] sm:$0xff] %vm1144_vm0, %v4107_v1  ;;  %1146 = vst.msk [vmem:[#allocation2 + $0x8] sm:$0xff] %vm1144_vm0, %v4108_v2 }
  0x3c PF: > { %v4530_v3 = vld [vmem:[%s4824_s4 + $0x8] sm:$0xff]   ;;  %v4651_v4 = vmov 0.0   ;;  %v4531_v5 = vld [vmem:[%s4824_s4] sm:$0xff]   ;;  %vm4652_vm1 = vmmov 0   ;;  %vm1185_vm2 = vcmask 261120   ;;  %s5535_s5 = sld [smem:[#allocation14_spill]]  ;;  %v1155_v21 = vlaneseq }
  0x3d   : > { %4200 = vmatprep.subr.bf16.mxu1 %v4651_v4  ;;  %4226 = vmatprep.subr.bf16.mxu0 %v4651_v4  ;;  %s4653_s28 = smov 64   ;;  %s4654_s9 = smov 96   ;;  %vm1246_vm3 = vcmask 64512   ;;  %vm1310_vm4 = vcmask 1043456   ;;  %vm1697_vm6 = vcmask 130048   ;;  %vm1699_vm7 = vcmask 195584  }
  0x3e   : > { %4201 = vmatpush3.bf16.msra.mxu1 %v4530_v3  ;;  %4204 = vmatprep.mubr.msk.bf16.mxu1 %vm4652_vm1, %v4651_v4  ;;  %s4655_s27 = smov 88   ;;  %v1156_v22 = vshrl.u32 %v1155_v21, 7  ;;  %v1158_v23 = vand.u32 127, %v1155_v21  ;;  %s5537_s12 = sld [smem:[#allocation11_spill]] }
  0x3f   : > { %4202 = vmatprep.subr.bf16.mxu1 %v4651_v4  ;;  %4228 = vmatprep.mubr.msk.bf16.mxu0 %vm4652_vm1, %v4651_v4  ;;  %s4656_s21 = smov 72   ;;  %s4657_s0 = smov 112  }
  0x40   : > { %vm1159_vm5 = vcmp.gt.s32.totalorder %v1158_v23, %v1156_v22  ;;  %s4658_s22 = smov 104   ;;  %s4659_s2 = smov 120  }
  0x41   : > { %v4953_v25 = vsel %vm1159_vm5, -1e+30, %v4651_v4  ;;  %s4660_s3 = smov 80   ;;  %s4663_s24 = smov 40  }
  0x42   : > { %v4915_v6 = vld [vmem:[#allocation2] sm:$0xff]  ;;  %v4917_v7 = vld [vmem:[#allocation2 + $0x8] sm:$0xff]  ;;  %4203 = vmatpush3.bf16.msra.mxu1 %v4531_v5  ;;  %s5536_s29 = scalar_lea.vmem %s5535_s5, %s4814_s6  ;;  %s4661_s5 = smov 56  }
  0x43   : > { %v1161_v8 = vpack.c.bf16 %v4917_v7, %v4915_v6  ;;  %4208 = vmatprep.subr.bf16.mxu1 %v4651_v4  ;;  %v4017_v9 = vld [vmem:[%s5536_s29] ss:$0 sm:$0xff]  ;;  %s4662_s29 = smov 48   ;;  %s4664_s23 = smov 8  }
  0x44   : > { %v4021_v24 = vld [vmem:[%s5537_s12] ss:$0 sm:$0xff]  ;;  %v4030_v22 = vld [vmem:[%s5537_s12 + $0x1] ss:$0 sm:$0xff]  ;;  %s4665_s10 = smov 16   ;;  %s4666_s4 = smov 24  }
  0x45   : > { %4205 = vmatmul.mubr.msk.bf16.vlgmr.msra.gmra.mxu1 %vm1185_vm2, %v1161_v8  ;;  %v4956_v26 = vadd.f32 %v4021_v24, %v4953_v25 }
  0x46   : > { %4210 = vmatprep.mubr.msk.bf16.mxu1 %vm4652_vm1, %v4651_v4 }
 0x105   : > { %v1223_v10 = vpop.f32.mrf.mxu1 }
 0x106   : > { %v1224_v11 = vadd.f32 %v4017_v9, %v1223_v10 }
 0x107   : > { %v4206_v12 = vpop.f32.mrf.mxu1 }
 0x108   : > { %v4933_v13 = vpack.c.bf16 %v1224_v11, %v1224_v11 }
 0x109   : > { %v1226_v14 = vpop.f32.mrf.mxu1 }
 0x10a   : > { %v1227_v15 = vadd.f32 %v4017_v9, %v1226_v14  ;;  %1305 = vrot.lane.b32.xlu1 %v4933_v13, %s4653_s28  ;;  %1244 = vrot.lane.b32.xlu0 %v4933_v13, %s4654_s9 }
 0x10b   : > { %v4207_v16 = vpop.f32.mrf.mxu1 }
 0x10c   : > { %v4962_v33 = vpack.c.bf16 %v1227_v15, %v1227_v15 }
 0x10e   : > { %1356 = vrot.lane.b32.xlu1 %v4933_v13, %s4655_s27 }
 0x17c   : > { %v1245_v17 = vpop.permute.xlu0 %1244  ;;  %v1306_v19 = vpop.permute.xlu1 %1305 }
 0x17d   : > { %v1251_v18 = vsel %vm1246_vm3, %v1245_v17, 0  ;;  %v1312_v20 = vsel %vm1310_vm4, %v1306_v19, 0 }
 0x17e   : > { %4209 = vmatpush3.bf16.xpose.msra.mxu1 %v1251_v18 }
 0x17f   : > { %4214 = vmatprep.subr.bf16.mxu1 %v4651_v4 }
 0x180   : > { %v1357_v39 = vpop.permute.xlu1 %1356 }
 0x181   : > { %v1362_v45 = vsel %vm1246_vm3, %v1357_v39, 0 }
 0x185   : > { %4211 = vmatmul.mubr.msk.bf16.vlgmr.msra.gmra.mxu1 %vm1246_vm3, %v4933_v13 }
 0x186   : > { %4215 = vmatpush3.bf16.msra.mxu1 %v1312_v20  ;;  %4216 = vmatprep.mubr.msk.bf16.mxu1 %vm4652_vm1, %v4651_v4 }
 0x187   : > { %4220 = vmatprep.subr.bf16.mxu1 %v4651_v4 }
 0x245   : > { %v1287_v27 = vpop.f32.mrf.mxu1 }
 0x246   : > { %v1288_v28 = vadd.f32 %v1287_v27, %v4956_v26  ;;  %v1707_v27 = vadd.f32 %v4030_v22, %v4953_v25 }
 0x247   : > { %v4212_v29 = vpop.f32.mrf.mxu1 }
 0x248   : > { %v1293_v30 = vsel %vm1246_vm3, %v1288_v28, -inf }
 0x249   : > { %1294 = vmax.xlane.f32.xlu0 %v1293_v30  ;;  %v1290_v31 = vpop.f32.mrf.mxu1 }
 0x24b   : > { %v4213_v32 = vpop.f32.mrf.mxu1 }
 0x25f   : > { %1576 = vrot.lane.b32.xlu0 %v4933_v13, %s4656_s21 }
 0x263   : > { %1928 = vrot.lane.b32.xlu0 %v4962_v33, %s4657_s0 }
 0x267   : > { %2038 = vrot.lane.b32.xlu0 %v4962_v33, %s4658_s22 }
 0x2d2   : > { %v1295_v34 = vpop.xlane.xlu0 %1294 }
 0x2d3   : > { %v1296_v35 = vsub.f32 %v1288_v28, %v1295_v34 }
 0x2d5   : > { %v1297_v36 = vmul.f32 1.442695, %v1296_v35 }
 0x2d6   : > { %v1577_v49 = vpop.permute.xlu0 %1576 }
 0x2d7   : > { %4551 = vpow2.f32 %v1297_v36  ;;  %v1582_v51 = vsel %vm1246_vm3, %v1577_v49, 0 }
 0x2da   : > { %v1929_v60 = vpop.permute.xlu0 %1928 }
 0x2de   : > { %v2039_v62 = vpop.permute.xlu0 %2038 }
 0x2e4   : > { %v4552_v37 = vpop.eup %4551 }
 0x2e5   : > { %v1299_v38 = vsel %vm1246_vm3, %v4552_v37, 0.0 }
 0x2e6   : > { %1300 = vadd.xlane.f32.xlu1 %v1299_v38 }
 0x2f7   : > { %1354 = vrot.lane.b32.xlu1 %v4933_v13, %s4659_s2 }
 0x2fb   : > { %1466 = vrot.lane.b32.xlu1 %v4933_v13, %s4660_s3 }
 0x2ff   : > { %1464 = vrot.lane.b32.xlu1 %v4933_v13, %s4657_s0 }
 0x303   : > { %1574 = vrot.lane.b32.xlu1 %v4933_v13, %s4658_s22 }
 0x307   : > { %1710 = vrot.lane.b32.xlu1 %v4962_v33, %s4654_s9 }
 0x30b   : > { %1820 = vrot.lane.b32.xlu1 %v4962_v33, %s4655_s27 }
 0x30f   : > { %1818 = vrot.lane.b32.xlu1 %v4962_v33, %s4659_s2 }
 0x313   : > { %1930 = vrot.lane.b32.xlu1 %v4962_v33, %s4660_s3 }
 0x317   : > { %2040 = vrot.lane.b32.xlu1 %v4962_v33, %s4656_s21 }
 0x36f   : > { %v1301_v40 = vpop.xlane.xlu1 %1300 }
 0x370   : > { %4553 = vrcp.f32 %v1301_v40 }
 0x373   : > { %v1355_v42 = vpop.permute.xlu1 %1354 }
 0x377   : > { %v1467_v46 = vpop.permute.xlu1 %1466 }
 0x378   : > { %v1472_v48 = vsel %vm1246_vm3, %v1467_v46, 0 }
 0x37b   : > { %v1465_v47 = vpop.permute.xlu1 %1464 }
 0x37d   : > { %v4554_v41 = vpop.eup %4553 }
 0x37e   : > { %v1303_v43 = vmul.f32 %v4554_v41, %v4552_v37 }
 0x37f   : > { %v1575_v50 = vpop.permute.xlu1 %1574 }
 0x380   : > { %v1304_v44 = vpack.c.bf16 %v1303_v43, %v1303_v43 }
 0x382   : > { %4217 = vmatmul.mubr.msk.bf16.vlgmr.msra.gmra.mxu1 %vm1246_vm3, %v1304_v44 }
 0x383   : > { %4221 = vmatpush3.bf16.xpose.msra.mxu1 %v1362_v45  ;;  %4222 = vmatprep.mubr.msk.bf16.mxu1 %vm4652_vm1, %v4651_v4  ;;  %v1711_v52 = vpop.permute.xlu1 %1710 }
 0x384   : > { %4232 = vmatprep.subr.bf16.mxu1 %v4651_v4  ;;  %v1716_v53 = vsel %vm1246_vm3, %v1711_v52, 0 }
 0x387   : > { %v1821_v54 = vpop.permute.xlu1 %1820 }
 0x388   : > { %v1826_v56 = vsel %vm1246_vm3, %v1821_v54, 0 }
 0x38a   : > { %4223 = vmatmul.mubr.msk.bf16.vlgmr.msra.gmra.mxu1 %vm1246_vm3, %v1355_v42 }
 0x38b   : > { %4233 = vmatpush3.bf16.xpose.msra.mxu1 %v1472_v48  ;;  %4234 = vmatprep.mubr.msk.bf16.mxu1 %vm4652_vm1, %v4651_v4  ;;  %v1819_v55 = vpop.permute.xlu1 %1818 }
 0x38c   : > { %4244 = vmatprep.subr.bf16.mxu1 %v4651_v4 }
 0x38f   : > { %v1931_v57 = vpop.permute.xlu1 %1930 }
 0x390   : > { %v1936_v58 = vsel %vm1246_vm3, %v1931_v57, 0 }
 0x392   : > { %4235 = vmatmul.mubr.msk.bf16.vlgmr.msra.gmra.mxu1 %vm1246_vm3, %v1465_v47 }
 0x393   : > { %4245 = vmatpush3.bf16.xpose.msra.mxu1 %v1582_v51  ;;  %4246 = vmatprep.mubr.msk.bf16.mxu1 %vm4652_vm1, %v4651_v4  ;;  %v2041_v59 = vpop.permute.xlu1 %2040 }
 0x394   : > { %4256 = vmatprep.subr.bf16.mxu1 %v4651_v4  ;;  %v2046_v61 = vsel %vm1246_vm3, %v2041_v59, 0 }
 0x39a   : > { %4247 = vmatmul.mubr.msk.bf16.vlgmr.msra.gmra.mxu1 %vm1246_vm3, %v1575_v50 }
 0x39b   : > { %4257 = vmatpush3.bf16.xpose.msra.mxu1 %v1716_v53  ;;  %4258 = vmatprep.mubr.msk.bf16.mxu1 %vm4652_vm1, %v4651_v4 }
 0x39c   : > { %4268 = vmatprep.subr.bf16.mxu1 %v4651_v4 }
 0x3a2   : > { %4259 = vmatmul.mubr.msk.bf16.vlgmr.msra.gmra.mxu1 %vm1246_vm3, %v4962_v33 }
 0x3a3   : > { %4269 = vmatpush3.bf16.xpose.msra.mxu1 %v1826_v56  ;;  %4270 = vmatprep.mubr.msk.bf16.mxu1 %vm4652_vm1, %v4651_v4 }
 0x3a4   : > { %4280 = vmatprep.subr.bf16.mxu1 %v4651_v4 }
 0x3aa   : > { %4271 = vmatmul.mubr.msk.bf16.vlgmr.msra.gmra.mxu1 %vm1246_vm3, %v1819_v55 }
 0x3ab   : > { %4281 = vmatpush3.bf16.xpose.msra.mxu1 %v1936_v58  ;;  %4282 = vmatprep.mubr.msk.bf16.mxu1 %vm4652_vm1, %v4651_v4 }
 0x3ac   : > { %4292 = vmatprep.subr.bf16.mxu1 %v4651_v4 }
 0x3b2   : > { %4283 = vmatmul.mubr.msk.bf16.vlgmr.msra.gmra.mxu1 %vm1246_vm3, %v1929_v60 }
 0x3b3   : > { %4293 = vmatpush3.bf16.xpose.msra.mxu1 %v2046_v61  ;;  %4294 = vmatprep.mubr.msk.bf16.mxu1 %vm4652_vm1, %v4651_v4 }
 0x3b4   : > { %4304 = vmatprep.subr.bf16.mxu1 %v4651_v4 }
 0x3ba   : > { %4295 = vmatmul.mubr.msk.bf16.vlgmr.msra.gmra.mxu1 %vm1246_vm3, %v2039_v62 }
 0x3bb   : > { %4308 = vmatprep.mubr.msk.bf16.mxu1 %vm4652_vm1, %v4651_v4 }
 0x442   : > { %v5026_v63 = vpop.f32.mrf.mxu1 }
 0x444   : > { %v4218_v0 = vpop.f32.mrf.mxu1 }
 0x446   : > { %v1351_v1 = vpop.f32.mrf.mxu1 }
 0x448   : > { %v4219_v2 = vpop.f32.mrf.mxu1 }
 0x44a   : > { %v1398_v3 = vpop.f32.mrf.mxu1 }
 0x44b   : > { %v1399_v5 = vadd.f32 %v1398_v3, %v4956_v26 }
 0x44c   : > { %v4224_v8 = vpop.f32.mrf.mxu1 }
 0x44d   : > { %v1404_v9 = vsel %vm1246_vm3, %v1399_v5, -inf }
 0x44e   : > { %1405 = vmax.xlane.f32.xlu1 %v1404_v9  ;;  %v1401_v10 = vpop.f32.mrf.mxu1 }
 0x450   : > { %v4225_v11 = vpop.f32.mrf.mxu1 }
 0x452   : > { %v1508_v12 = vpop.f32.mrf.mxu1 }
 0x453   : > { %v1509_v14 = vadd.f32 %v1508_v12, %v4956_v26 }
 0x454   : > { %v4236_v15 = vpop.f32.mrf.mxu1 }
 0x455   : > { %v1514_v16 = vsel %vm1246_vm3, %v1509_v14, -inf }
 0x456   : > { %1515 = vmax.xlane.f32.xlu0 %v1514_v16  ;;  %v1511_v17 = vpop.f32.mrf.mxu1 }
 0x458   : > { %v4237_v18 = vpop.f32.mrf.mxu1 }
 0x45a   : > { %v1618_v19 = vpop.f32.mrf.mxu1 }
 0x45b   : > { %v1619_v20 = vadd.f32 %v1618_v19, %v4956_v26 }
 0x45c   : > { %v4248_v21 = vpop.f32.mrf.mxu1 }
 0x45d   : > { %v1624_v23 = vsel %vm1246_vm3, %v1619_v20, -inf }
 0x45e   : > { %1625 = vmax.xlane.f32.xlu0 %v1624_v23  ;;  %v1621_v24 = vpop.f32.mrf.mxu1 }
 0x460   : > { %v4249_v28 = vpop.f32.mrf.mxu1 }
 0x462   : > { %v1752_v29 = vpop.f32.mrf.mxu1 }
 0x463   : > { %v5038_v30 = vadd.f32 %v1752_v29, %v1707_v27 }
 0x464   : > { %v4260_v31 = vpop.f32.mrf.mxu1 }
 0x465   : > { %v1758_v32 = vsel %vm1246_vm3, %v5038_v30, -inf }
 0x466   : > { %1759 = vmax.xlane.f32.xlu1 %v1758_v32  ;;  %v1755_v26 = vpop.f32.mrf.mxu1 }
 0x468   : > { %v4261_v34 = vpop.f32.mrf.mxu1 }
 0x46a   : > { %v1862_v35 = vpop.f32.mrf.mxu1 }
 0x46b   : > { %v1863_v36 = vadd.f32 %v1862_v35, %v1707_v27 }
 0x46c   : > { %v4272_v37 = vpop.f32.mrf.mxu1 }
 0x46d   : > { %v1868_v38 = vsel %vm1246_vm3, %v1863_v36, -inf }
 0x46e   : > { %1869 = vmax.xlane.f32.xlu0 %v1868_v38  ;;  %v1865_v39 = vpop.f32.mrf.mxu1 }
 0x470   : > { %v4273_v40 = vpop.f32.mrf.mxu1 }
 0x472   : > { %v1972_v25 = vpop.f32.mrf.mxu1 }
 0x473   : > { %v1973_v41 = vadd.f32 %v1972_v25, %v1707_v27 }
 0x474   : > { %v4284_v42 = vpop.f32.mrf.mxu1 }
 0x475   : > { %v1978_v43 = vsel %vm1246_vm3, %v1973_v41, -inf }
 0x476   : > { %1979 = vmax.xlane.f32.xlu1 %v1978_v43  ;;  %v1975_v44 = vpop.f32.mrf.mxu1 }
 0x478   : > { %v4285_v45 = vpop.f32.mrf.mxu1 }
 0x47a   : > { %v2082_v46 = vpop.f32.mrf.mxu1 }
 0x47b   : > { %v2083_v47 = vadd.f32 %v2082_v46, %v1707_v27 }
 0x47c   : > { %v4296_v48 = vpop.f32.mrf.mxu1 }
 0x47d   : > { %v2088_v49 = vsel %vm1246_vm3, %v2083_v47, -inf }
 0x47e   : > { %2089 = vmax.xlane.f32.xlu0 %v2088_v49  ;;  %v2085_v50 = vpop.f32.mrf.mxu1 }
 0x480   : > { %v4297_v51 = vpop.f32.mrf.mxu1 }
 0x487   : > { %1416 = vrot.lane.b32.xlu1 %v4933_v13, %s4661_s5 }
 0x494   : > { %1526 = vrot.lane.b32.xlu0 %v4933_v13, %s4662_s29 }
 0x4d7   : > { %v1406_v52 = vpop.xlane.xlu1 %1405 }
 0x4d8   : > { %v1407_v53 = vsub.f32 %v1399_v5, %v1406_v52 }
 0x4da   : > { %v1408_v54 = vmul.f32 1.442695, %v1407_v53 }
 0x4dc   : > { %4555 = vpow2.f32 %v1408_v54 }
 0x4df   : > { %v1516_v55 = vpop.xlane.xlu0 %1515 }
 0x4e0   : > { %v1517_v56 = vsub.f32 %v1509_v14, %v1516_v55 }
 0x4e2   : > { %v1518_v57 = vmul.f32 1.442695, %v1517_v56 }
 0x4e4   : > { %4557 = vpow2.f32 %v1518_v57 }
 0x4e7   : > { %v1626_v58 = vpop.xlane.xlu0 %1625 }
 0x4e8   : > { %v1627_v59 = vsub.f32 %v1619_v20, %v1626_v58 }
 0x4e9   : > { %v4556_v60 = vpop.eup %4555 }
 0x4ea   : > { %v1628_v61 = vmul.f32 1.442695, %v1627_v59  ;;  %v1410_v62 = vsel %vm1246_vm3, %v4556_v60, 0.0 }
 0x4eb   : > { %1411 = vadd.xlane.f32.xlu1 %v1410_v62 }
 0x4ec   : > { %4559 = vpow2.f32 %v1628_v61 }
 0x4ef   : > { %v1760_v5 = vpop.xlane.xlu1 %1759 }
 0x4f0   : > { %v1761_v11 = vsub.f32 %v5038_v30, %v1760_v5 }
 0x4f1   : > { %v4558_v0 = vpop.eup %4557 }
 0x4f2   : > { %v1520_v1 = vsel %vm1246_vm3, %v4558_v0, 0.0  ;;  %v1762_v14 = vmul.f32 1.442695, %v1761_v11 }
 0x4f3   : > { %1521 = vadd.xlane.f32.xlu0 %v1520_v1 }
 0x4f4   : > { %4561 = vpow2.f32 %v1762_v14 }
 0x4f7   : > { %v1870_v12 = vpop.xlane.xlu0 %1869 }
 0x4f8   : > { %v1871_v15 = vsub.f32 %v1863_v36, %v1870_v12 }
 0x4f9   : > { %v5051_v2 = vpop.eup %4559 }
 0x4fa   : > { %v1630_v3 = vsel %vm1246_vm3, %v5051_v2, 0.0  ;;  %v1872_v18 = vmul.f32 1.442695, %v1871_v15 }
 0x4fb   : > { %1631 = vadd.xlane.f32.xlu1 %v1630_v3 }
 0x4fc   : > { %4563 = vpow2.f32 %v1872_v18 }
 0x4ff   : > { %v1980_v8 = vpop.xlane.xlu1 %1979 }
 0x500   : > { %v1981_v17 = vsub.f32 %v1973_v41, %v1980_v8 }
 0x501   : > { %v4562_v22 = vpop.eup %4561 }
 0x502   : > { %v1982_v20 = vmul.f32 1.442695, %v1981_v17 }
 0x503   : > { %v1417_v9 = vpop.permute.xlu1 %1416 }
 0x504   : > { %v1422_v10 = vsel %vm1310_vm4, %v1417_v9, 0  ;;  %4565 = vpow2.f32 %v1982_v20 }
 0x505   : > { %4227 = vmatpush3.bf16.msra.mxu0 %v1422_v10 }
 0x506   : > { %4238 = vmatprep.subr.bf16.mxu0 %v4651_v4 }
 0x507   : > { %v2090_v16 = vpop.xlane.xlu0 %2089 }
 0x508   : > { %v2091_v19 = vsub.f32 %v2083_v47, %v2090_v16 }
 0x509   : > { %1636 = vrot.lane.b32.xlu0 %v4933_v13, %s4663_s24  ;;  %v1764_v13 = vsel %vm1246_vm3, %v4562_v22, 0.0  ;;  %v5063_v23 = vpop.eup %4563 }
 0x50a   : > { %v2092_v21 = vmul.f32 1.442695, %v2091_v19  ;;  %v1874_v27 = vsel %vm1246_vm3, %v5063_v23, 0.0 }
 0x50b   : > { %v1527_v32 = vpop.permute.xlu0 %1526 }
 0x50c   : > { %1770 = vrot.lane.b32.xlu1 %v4962_v33, %s4653_s28  ;;  %4567 = vpow2.f32 %v2092_v21  ;;  %v1532_v38 = vsel %vm1310_vm4, %v1527_v32, 0  ;;  %s5538_s28 = sld [smem:[#allocation7_spill]] }
 0x511   : > { %v5065_v24 = vpop.eup %4565 }
 0x512   : > { %v1984_v29 = vsel %vm1246_vm3, %v5065_v24, 0.0 }
 0x519   : > { %v5069_v28 = vpop.eup %4567 }
 0x51a   : > { %v2094_v30 = vsel %vm1246_vm3, %v5069_v28, 0.0 }
 0x528   : > { %1765 = vadd.xlane.f32.xlu0 %v1764_v13 }
 0x52c   : > { %1875 = vadd.xlane.f32.xlu0 %v1874_v27 }
 0x530   : > { %1985 = vadd.xlane.f32.xlu1 %v1984_v29  ;;  %2095 = vadd.xlane.f32.xlu0 %v2094_v30 }
 0x541   : > { %1990 = vrot.lane.b32.xlu1 %v4962_v33, %s4662_s29  ;;  %s5551_s29 = sld [smem:[#allocation21_spill]] }
 0x545   : > { %2100 = vrot.lane.b32.xlu1 %v4962_v33, %s4663_s24  ;;  %s5539_s24 = sld [smem:[#allocation16_spill]] }
 0x546   : > { %1880 = vrot.lane.b32.xlu0 %v4962_v33, %s4661_s5 }
 0x574   : > { %v1412_v31 = vpop.xlane.xlu1 %1411 }
 0x575   : > { %4569 = vrcp.f32 %v1412_v31 }
 0x57c   : > { %v1522_v26 = vpop.xlane.xlu0 %1521 }
 0x57d   : > { %4571 = vrcp.f32 %v1522_v26  ;;  %v4533_v26 = vld [vmem:[%s5538_s28] sm:$0xff]  }
 0x580   : > { %v1637_v40 = vpop.permute.xlu0 %1636 }
 0x581   : > { %v1642_v41 = vsel %vm1310_vm4, %v1637_v40, 0 }
 0x582   : > { %v4570_v34 = vpop.eup %4569 }
 0x583   : > { %v1414_v35 = vmul.f32 %v4570_v34, %v4556_v60 }
 0x584   : > { %v1632_v36 = vpop.xlane.xlu1 %1631 }
 0x585   : > { %4573 = vrcp.f32 %v1632_v36  ;;  %v1415_v37 = vpack.c.bf16 %v1414_v35, %v1414_v35 }
 0x587   : > { %4229 = vmatmul.mubr.msk.bf16.vlgmr.msra.gmra.mxu0 %vm1246_vm3, %v1415_v37 }
 0x588   : > { %4239 = vmatpush3.bf16.msra.mxu0 %v1532_v38  ;;  %4240 = vmatprep.mubr.msk.bf16.mxu0 %vm4652_vm1, %v4651_v4  ;;  %v1771_v44 = vpop.permute.xlu1 %1770 }
 0x589   : > { %4250 = vmatprep.subr.bf16.mxu0 %v4651_v4  ;;  %v1776_v46 = vsel %vm1310_vm4, %v1771_v44, 0 }
 0x58a   : > { %v4572_v33 = vpop.eup %4571 }
 0x58b   : > { %v1524_v39 = vmul.f32 %v4572_v33, %v4558_v0 }
 0x58d   : > { %v1525_v25 = vpack.c.bf16 %v1524_v39, %v1524_v39 }
 0x58f   : > { %4241 = vmatmul.mubr.msk.bf16.vlgmr.msra.gmra.mxu0 %vm1246_vm3, %v1525_v25 }
 0x590   : > { %4251 = vmatpush3.bf16.msra.mxu0 %v1642_v41  ;;  %4252 = vmatprep.mubr.msk.bf16.mxu0 %vm4652_vm1, %v4651_v4 }
 0x591   : > { %4262 = vmatprep.subr.bf16.mxu0 %v4651_v4 }
 0x592   : > { %v4574_v42 = vpop.eup %4573 }
 0x593   : > { %v1634_v43 = vmul.f32 %v4574_v42, %v5051_v2 }
 0x595   : > { %v1635_v45 = vpack.c.bf16 %v1634_v43, %v1634_v43 }
 0x597   : > { %4253 = vmatmul.mubr.msk.bf16.vlgmr.msra.gmra.mxu0 %vm1246_vm3, %v1635_v45 }
 0x598   : > { %4263 = vmatpush3.bf16.msra.mxu0 %v1776_v46  ;;  %4264 = vmatprep.mubr.msk.bf16.mxu0 %vm4652_vm1, %v4651_v4 }
 0x599   : > { %4274 = vmatprep.subr.bf16.mxu0 %v4651_v4 }
 0x5b1   : > { %v1766_v47 = vpop.xlane.xlu0 %1765 }
 0x5b2   : > { %4575 = vrcp.f32 %v1766_v47 }
 0x5b5   : > { %v1876_v48 = vpop.xlane.xlu0 %1875 }
 0x5b6   : > { %4577 = vrcp.f32 %v1876_v48 }
 0x5b9   : > { %v1986_v49 = vpop.xlane.xlu1 %1985  ;;  %v2096_v50 = vpop.xlane.xlu0 %2095 }
 0x5ba   : > { %4579 = vrcp.f32 %v1986_v49 }
 0x5bb   : > { %4581 = vrcp.f32 %v2096_v50 }
 0x5bd   : > { %v1881_v53 = vpop.permute.xlu0 %1880  ;;  %v1991_v58 = vpop.permute.xlu1 %1990 }
 0x5be   : > { %v1886_v56 = vsel %vm1310_vm4, %v1881_v53, 0  ;;  %v1996_v61 = vsel %vm1310_vm4, %v1991_v58, 0 }
 0x5bf   : > { %v4576_v51 = vpop.eup %4575 }
 0x5c0   : > { %v1768_v52 = vmul.f32 %v4576_v51, %v4562_v22 }
 0x5c1   : > { %v2101_v0 = vpop.permute.xlu1 %2100 }
 0x5c2   : > { %v1769_v54 = vpack.c.bf16 %v1768_v52, %v1768_v52  ;;  %v2106_v3 = vsel %vm1310_vm4, %v2101_v0, 0 }
 0x5c3   : > { %v4578_v55 = vpop.eup %4577 }
 0x5c4   : > { %4265 = vmatmul.mubr.msk.bf16.vlgmr.msra.gmra.mxu0 %vm1246_vm3, %v1769_v54  ;;  %v1878_v57 = vmul.f32 %v4578_v55, %v5063_v23 }
 0x5c5   : > { %4275 = vmatpush3.bf16.msra.mxu0 %v1886_v56  ;;  %4276 = vmatprep.mubr.msk.bf16.mxu0 %vm4652_vm1, %v4651_v4 }
 0x5c6   : > { %4286 = vmatprep.subr.bf16.mxu0 %v4651_v4  ;;  %v1879_v59 = vpack.c.bf16 %v1878_v57, %v1878_v57 }
 0x5c7   : > { %v4580_v60 = vpop.eup %4579 }
 0x5c8   : > { %v1988_v62 = vmul.f32 %v4580_v60, %v5065_v24  ;;  %v4582_v2 = vpop.eup %4581 }
 0x5c9   : > { %v2098_v5 = vmul.f32 %v4582_v2, %v5069_v28  ;;  %v4532_v28 = vld [vmem:[%s5538_s28 + $0x8] sm:$0xff]   ;;  %s5540_s28 = scalar_lea.vmem %s5539_s24, %s4814_s6  ;;  %s5541_s24 = sld [smem:[#allocation10_spill]] }
 0x5ca   : > { %v1989_v1 = vpack.c.bf16 %v1988_v62, %v1988_v62  ;;  %4305 = vmatpush3.bf16.msra.mxu1 %v4532_v28 }
 0x5cb   : > { %v2099_v8 = vpack.c.bf16 %v2098_v5, %v2098_v5  ;;  %4306 = vmatprep.subr.bf16.mxu1 %v4651_v4 }
 0x5cc   : > { %4277 = vmatmul.mubr.msk.bf16.vlgmr.msra.gmra.mxu0 %vm1246_vm3, %v1879_v59 }
 0x5cd   : > { %4287 = vmatpush3.bf16.msra.mxu0 %v1996_v61  ;;  %4288 = vmatprep.mubr.msk.bf16.mxu0 %vm4652_vm1, %v4651_v4 }
 0x5ce   : > { %4298 = vmatprep.subr.bf16.mxu0 %v4651_v4  ;;  %4307 = vmatpush3.bf16.msra.mxu1 %v4533_v26 }
 0x5cf   : > { %4320 = vmatprep.subr.bf16.mxu1 %v4651_v4 }
 0x5d4   : > { %4289 = vmatmul.mubr.msk.bf16.vlgmr.msra.gmra.mxu0 %vm1246_vm3, %v1989_v1 }
 0x5d5   : > { %4299 = vmatpush3.bf16.msra.mxu0 %v2106_v3  ;;  %4300 = vmatprep.mubr.msk.bf16.mxu0 %vm4652_vm1, %v4651_v4 }
 0x5d6   : > { %4312 = vmatprep.subr.bf16.mxu0 %v4651_v4 }
 0x5dc   : > { %4301 = vmatmul.mubr.msk.bf16.vlgmr.msra.gmra.mxu0 %vm1246_vm3, %v2099_v8 }
 0x5dd   : > { %4316 = vmatprep.mubr.msk.bf16.mxu0 %vm4652_vm1, %v4651_v4 }
 0x647   : > { %v1458_v9 = vpop.f32.mrf.mxu0 }
 0x649   : > { %v4230_v10 = vpop.f32.mrf.mxu0 }
 0x64b   : > { %v1461_v11 = vpop.f32.mrf.mxu0 }
 0x64d   : > { %v4231_v12 = vpop.f32.mrf.mxu0 }
 0x64f   : > { %v1568_v14 = vpop.f32.mrf.mxu0 }
 0x651   : > { %v4242_v15 = vpop.f32.mrf.mxu0 }
 0x653   : > { %v1571_v16 = vpop.f32.mrf.mxu0 }
 0x655   : > { %v4243_v17 = vpop.f32.mrf.mxu0 }
 0x657   : > { %v1678_v18 = vpop.f32.mrf.mxu0 }
 0x659   : > { %v4254_v19 = vpop.f32.mrf.mxu0 }
 0x65a   : > { %v4536_v19 = vld [vmem:[%s5541_s24] sm:$0xff]   ;;  %s5543_s24 = scalar_lea.vmem %s5480_s15, %s4814_s6 }
 0x65b   : > { %v1681_v20 = vpop.f32.mrf.mxu0 }
 0x65c   : > { %v4537_v20 = vld [vmem:[%s4838_s7 + $0x8] sm:$0xff]  }
 0x65d   : > { %v4255_v21 = vpop.f32.mrf.mxu0  ;;  %4313 = vmatpush3.bf16.msra.mxu0 %v4537_v20 }
 0x65e   : > { %v4538_v21 = vld [vmem:[%s4838_s7] sm:$0xff]   ;;  %4314 = vmatprep.subr.bf16.mxu0 %v4651_v4  ;;  %s5542_s7 = scalar_lea.vmem %s5479_s14, %s4814_s6 }
 0x661   : > { %4315 = vmatpush3.bf16.msra.mxu0 %v4538_v21 }
 0x662   : > { %4328 = vmatprep.subr.bf16.mxu0 %v4651_v4 }
 0x684   : > { %v1812_v22 = vpop.f32.mrf.mxu0 }
 0x686   : > { %v4266_v13 = vpop.f32.mrf.mxu0 }
 0x688   : > { %v1815_v23 = vpop.f32.mrf.mxu0 }
 0x68a   : > { %v4267_v24 = vpop.f32.mrf.mxu0 }
 0x68c   : > { %v1922_v27 = vpop.f32.mrf.mxu0 }
 0x68d   : > { %v4500_v29 = vpack.i.bf16 %v1922_v27, %v1458_v9 }
 0x68e   : > { %v4278_v30 = vpop.f32.mrf.mxu0 }
 0x68f   : > { %4501 = vrot.lane.b32.xlu1 %v4500_v29, %s4664_s23 }
 0x690   : > { %v1925_v31 = vpop.f32.mrf.mxu0 }
 0x691   : > { %v4043_v31 = vld [vmem:[%s5542_s7] ss:$0 sm:$0xff]  ;;  %s5544_s7 = scalar_lea.vmem %s5476_s11, %s4814_s6 }
 0x692   : > { %v4279_v32 = vpop.f32.mrf.mxu0 }
 0x694   : > { %v2032_v34 = vpop.f32.mrf.mxu0 }
 0x695   : > { %v4505_v35 = vpack.i.bf16 %v2032_v34, %v1568_v14 }
 0x696   : > { %v4290_v36 = vpop.f32.mrf.mxu0 }
 0x697   : > { %4506 = vrot.lane.b32.xlu1 %v4505_v35, %s4665_s10  ;;  %v4044_v35 = vld [vmem:[%s5543_s24] ss:$0 sm:$0xff]  ;;  %s5545_s24 = sld [smem:[#allocation18_spill]] }
 0x698   : > { %v2035_v37 = vpop.f32.mrf.mxu0 }
 0x69a   : > { %v4291_v38 = vpop.f32.mrf.mxu0 }
 0x69c   : > { %v2142_v33 = vpop.f32.mrf.mxu0 }
 0x69d   : > { %v4510_v39 = vpack.i.bf16 %v2142_v33, %v1678_v18  ;;  %v4535_v18 = vld [vmem:[%s4847_s26] sm:$0xff]  }
 0x69e   : > { %v4302_v40 = vpop.f32.mrf.mxu0 }
 0x69f   : > { %4511 = vrot.lane.b32.xlu0 %v4510_v39, %s4666_s4  ;;  %v4049_v39 = vld [vmem:[%s5544_s7] ss:$0 sm:$0xff] }
 0x6a0   : > { %v2145_v25 = vpop.f32.mrf.mxu0 }
 0x6a2   : > { %v4303_v41 = vpop.f32.mrf.mxu0 }
 0x701   : > { %v4502_v42 = vpop.permute.xlu1 %4501 }
 0x702   : > { %v4504_v44 = vunpack.i.h.bf16 %v4502_v42  ;;  %v4503_v45 = vunpack.i.l.bf16 %v4502_v42 }
 0x704   : > { %v2160_v49 = vsel %vm1246_vm3, %v1812_v22, %v4504_v44  ;;  %v1696_v50 = vsel %vm1246_vm3, %v5026_v63, %v4503_v45  ;;  %v4039_v63 = vld [vmem:[%s5540_s28] ss:$0 sm:$0xff] }
 0x709   : > { %v4507_v43 = vpop.permute.xlu1 %4506 }
 0x70a   : > { %v4509_v46 = vunpack.i.h.bf16 %v4507_v43  ;;  %v4508_v47 = vunpack.i.l.bf16 %v4507_v43 }
 0x70c   : > { %v2161_v53 = vsel %vm1697_vm6, %v2160_v49, %v4509_v46  ;;  %v1698_v54 = vsel %vm1697_vm6, %v1696_v50, %v4508_v47 }
 0x711   : > { %v4512_v48 = vpop.permute.xlu0 %4511 }
 0x712   : > { %v4514_v51 = vunpack.i.h.bf16 %v4512_v48  ;;  %v4513_v52 = vunpack.i.l.bf16 %v4512_v48 }
 0x714   : > { %v2162_v55 = vsel %vm1699_vm7, %v2161_v53, %v4514_v51  ;;  %v1700_v56 = vsel %vm1699_vm7, %v1698_v54, %v4513_v52 }
 0x715   : > { %v2163_v57 = vpack.c.bf16 %v2162_v55, %v1700_v56 }
 0x717   : > { %4309 = vmatmul.mubr.msk.bf16.vlgmr.msra.gmra.mxu1 %vm1185_vm2, %v2163_v57 }
 0x718   : > { %4324 = vmatprep.mubr.msk.bf16.mxu1 %vm4652_vm1, %v4651_v4 }
 0x7d7   : > { %v2219_v58 = vpop.f32.mrf.mxu1 }
 0x7d8   : > { %v2220_v59 = vadd.f32 %v4039_v63, %v2219_v58 }
 0x7d9   : > { %v4310_v60 = vpop.f32.mrf.mxu1 }
 0x7da   : > { %v2226_v61 = vadd.f32 %v2220_v59, %v4915_v6 }
 0x7db   : > { %v2222_v62 = vpop.f32.mrf.mxu1 }
 0x7dc   : > { %v2223_v0 = vadd.f32 %v4039_v63, %v2222_v62  ;;  %v2230_v1 = vsel %vm1185_vm2, %v2226_v61, 0.0 }
 0x7dd   : > { %2231 = vadd.xlane.f32.xlu1 %v2230_v1  ;;  %v4311_v2 = vpop.f32.mrf.mxu1 }
 0x7de   : > { %v2227_v3 = vadd.f32 %v2223_v0, %v4917_v7  ;;  %v4534_v7 = vld [vmem:[%s4847_s26 + $0x8] sm:$0xff]   ;;  %s5546_s26 = scalar_lea.vmem %s5545_s24, %s4814_s6  ;;  %s5552_s24 = scalar_lea.vmem %s5551_s29, %s4814_s6 }
 0x7df   : > { %4321 = vmatpush3.bf16.msra.mxu1 %v4534_v7  ;;  %v4045_v47 = vld [vmem:[%s5546_s26] ss:$0 sm:$0xff] }
 0x7e0   : > { %v2233_v5 = vsel %vm1185_vm2, %v2227_v3, 0.0  ;;  %4322 = vmatprep.subr.bf16.mxu1 %v4651_v4 }
 0x7e1   : > { %2234 = vadd.xlane.f32.xlu0 %v2233_v5 }
 0x7e3   : > { %4323 = vmatpush3.bf16.msra.mxu1 %v4535_v18 }
 0x7e4   : > { %4334 = vmatprep.subr.bf16.mxu1 %v4651_v4 }
 0x7e6   : > { %4325 = vmatmul.mubr.msk.bf16.vlgmr.msra.gmra.mxu1 %vm1185_vm2, %v4536_v19 }
 0x7e7   : > { %4336 = vmatprep.mubr.msk.bf16.mxu1 %vm4652_vm1, %v4651_v4 }
 0x866   : > { %v2232_v8 = vpop.xlane.xlu1 %2231 }
 0x867   : > { %v2237_v9 = vmul.f32 0.03125, %v2232_v8 }
 0x869   : > { %v2239_v10 = vsub.f32 %v2226_v61, %v2237_v9 }
 0x86a   : > { %v2235_v11 = vpop.xlane.xlu0 %2234 }
 0x86b   : > { %v2238_v12 = vmul.f32 0.03125, %v2235_v11  ;;  %v2241_v6 = vmul.f32 %v2239_v10, %v2239_v10 }
 0x86d   : > { %v2240_v14 = vsub.f32 %v2227_v3, %v2238_v12  ;;  %v2243_v15 = vsel %vm1185_vm2, %v2241_v6, 0.0 }
 0x86e   : > { %2244 = vadd.xlane.f32.xlu0 %v2243_v15 }
 0x86f   : > { %v2242_v16 = vmul.f32 %v2240_v14, %v2240_v14 }
 0x871   : > { %v2246_v17 = vsel %vm1185_vm2, %v2242_v16, 0.0 }
 0x872   : > { %2247 = vadd.xlane.f32.xlu1 %v2246_v17 }
 0x8a6   : > { %v2406_v40 = vpop.f32.mrf.mxu1 }
 0x8a7   : > { %v2407_v25 = vadd.f32 %v4049_v39, %v2406_v40 }
 0x8a8   : > { %v4326_v41 = vpop.f32.mrf.mxu1 }
 0x8a9   : > { %v5184_v42 = vpack.c.bf16 %v2407_v25, %v2407_v25 }
 0x8aa   : > { %v2409_v43 = vpop.f32.mrf.mxu1 }
 0x8ab   : > { %v2410_v44 = vadd.f32 %v4049_v39, %v2409_v43  ;;  %2536 = vrot.lane.b32.xlu0 %v5184_v42, %s4659_s2  ;;  %v2430_v45 = vsel %vm1246_vm3, %v5184_v42, 0 }
 0x8ac   : > { %v4327_v46 = vpop.f32.mrf.mxu1 }
 0x8ad   : > { %v5209_v63 = vpack.c.bf16 %v2410_v44, %v2410_v44 }
 0x8af   : > { %v2891_v2 = vsel %vm1246_vm3, %v5209_v63, 0 }
 0x8f7   : > { %v2245_v22 = vpop.xlane.xlu0 %2244 }
 0x8f8   : > { %v2249_v13 = vmul.f32 0.03125, %v2245_v22 }
 0x8fa   : > { %v2251_v23 = vadd.f32 1e-05, %v2249_v13 }
 0x8fb   : > { %v2248_v24 = vpop.xlane.xlu1 %2247 }
 0x8fc   : > { %4583 = vrsqrt.f32 %v2251_v23  ;;  %v2250_v27 = vmul.f32 0.03125, %v2248_v24 }
 0x8fe   : > { %v2252_v28 = vadd.f32 1e-05, %v2250_v27 }
 0x900   : > { %4585 = vrsqrt.f32 %v2252_v28 }
 0x909   : > { %v4584_v29 = vpop.eup %4583 }
 0x90a   : > { %v2255_v30 = vmul.f32 %v4584_v29, %v2239_v10 }
 0x90c   : > { %v2263_v34 = vmul.f32 %v4043_v31, %v2255_v30 }
 0x90d   : > { %v4586_v32 = vpop.eup %4585 }
 0x90e   : > { %v2256_v26 = vmul.f32 %v4586_v32, %v2240_v14  ;;  %v5170_v37 = vadd.f32 %v4044_v35, %v2263_v34 }
 0x910   : > { %v2264_v36 = vmul.f32 %v4043_v31, %v2256_v26 }
 0x912   : > { %v5172_v38 = vadd.f32 %v4044_v35, %v2264_v36 }
 0x914   : > { %v2273_v33 = vpack.c.bf16 %v5172_v38, %v5170_v37 }
 0x916   : > { %4317 = vmatmul.mubr.msk.bf16.vlgmr.msra.gmra.mxu0 %vm1185_vm2, %v2273_v33 }
 0x917   : > { %4330 = vmatprep.mubr.msk.bf16.mxu0 %vm4652_vm1, %v4651_v4  ;;  %4329 = vmatpush3.bf16.xpose.msra.mxu0 %v2430_v45 }
 0x918   : > { %4340 = vmatprep.subr.bf16.mxu0 %v4651_v4 }
 0x91d   : > { %v2537_v50 = vpop.permute.xlu0 %2536 }
 0x91e   : > { %v2542_v54 = vsel %vm1246_vm3, %v2537_v50, 0 }
 0x9d6   : > { %v2334_v48 = vpop.f32.mrf.mxu0 }
 0x9d7   : > { %v2335_v49 = vadd.f32 %v4045_v47, %v2334_v48 }
 0x9d8   : > { %v4318_v51 = vpop.f32.mrf.mxu0 }
 0x9d9   : > { %v2418_v52 = vpack.c.bf16 %v2335_v49, %v2335_v49 }
 0x9da   : > { %v2337_v53 = vpop.f32.mrf.mxu0 }
 0x9db   : > { %2534 = vrot.lane.b32.xlu1 %v2418_v52, %s4659_s2  ;;  %2644 = vrot.lane.b32.xlu0 %v2418_v52, %s4657_s0  ;;  %v2338_v56 = vadd.f32 %v4045_v47, %v2337_v53 }
 0x9dc   : > { %4331 = vmatmul.mubr.msk.bf16.vlgmr.msra.gmra.mxu0 %vm1246_vm3, %v2418_v52  ;;  %v4319_v55 = vpop.f32.mrf.mxu0 }
 0x9dd   : > { %4341 = vmatpush3.bf16.xpose.msra.mxu0 %v2542_v54  ;;  %4342 = vmatprep.mubr.msk.bf16.mxu0 %vm4652_vm1, %v4651_v4  ;;  %v2879_v57 = vpack.c.bf16 %v2338_v56, %v2338_v56 }
 0x9de   : > { %4352 = vmatprep.subr.bf16.mxu0 %v4651_v4 }
 0x9df   : > { %2646 = vrot.lane.b32.xlu1 %v5184_v42, %s4657_s0  ;;  %2754 = vrot.lane.b32.xlu0 %v2418_v52, %s4658_s22 }
 0x9e3   : > { %2756 = vrot.lane.b32.xlu1 %v5184_v42, %s4658_s22  ;;  %2995 = vrot.lane.b32.xlu0 %v2879_v57, %s4659_s2 }
 0x9e7   : > { %3105 = vrot.lane.b32.xlu0 %v2879_v57, %s4657_s0  ;;  %2997 = vrot.lane.b32.xlu1 %v5209_v63, %s4659_s2  ;;  %s5547_s2 = sld [smem:[#allocation12_spill]] }
 0x9eb   : > { %3215 = vrot.lane.b32.xlu0 %v2879_v57, %s4658_s22  ;;  %3107 = vrot.lane.b32.xlu1 %v5209_v63, %s4657_s0 }
 0x9ed   : > { %v4054_v15 = vld [vmem:[%s5547_s2] ss:$0 sm:$0xff]  ;;  %v4063_v25 = vld [vmem:[%s5547_s2 + $0x1] ss:$0 sm:$0xff] }
 0x9ef   : > { %3217 = vrot.lane.b32.xlu1 %v5209_v63, %s4658_s22 }
 0xa4d   : > { %v2535_v58 = vpop.permute.xlu1 %2534  ;;  %v2645_v62 = vpop.permute.xlu0 %2644 }
 0xa4e   : > { %4343 = vmatmul.mubr.msk.bf16.vlgmr.msra.gmra.mxu0 %vm1246_vm3, %v2535_v58 }
 0xa4f   : > { %4354 = vmatprep.mubr.msk.bf16.mxu0 %vm4652_vm1, %v4651_v4 }
 0xa51   : > { %v2647_v59 = vpop.permute.xlu1 %2646  ;;  %v2755_v1 = vpop.permute.xlu0 %2754 }
 0xa52   : > { %v2652_v60 = vsel %vm1246_vm3, %v2647_v59, 0 }
 0xa53   : > { %4353 = vmatpush3.bf16.xpose.msra.mxu0 %v2652_v60 }
 0xa54   : > { %4364 = vmatprep.subr.bf16.mxu0 %v4651_v4 }
 0xa55   : > { %v2757_v61 = vpop.permute.xlu1 %2756  ;;  %v2996_v9 = vpop.permute.xlu0 %2995 }
 0xa56   : > { %v2762_v0 = vsel %vm1246_vm3, %v2757_v61, 0 }
 0xa59   : > { %v2998_v3 = vpop.permute.xlu1 %2997  ;;  %v3106_v12 = vpop.permute.xlu0 %3105 }
 0xa5a   : > { %4355 = vmatmul.mubr.msk.bf16.vlgmr.msra.gmra.mxu0 %vm1246_vm3, %v2645_v62  ;;  %v3003_v5 = vsel %vm1246_vm3, %v2998_v3, 0 }
 0xa5b   : > { %4365 = vmatpush3.bf16.xpose.msra.mxu0 %v2762_v0  ;;  %4366 = vmatprep.mubr.msk.bf16.mxu0 %vm4652_vm1, %v4651_v4 }
 0xa5c   : > { %4376 = vmatprep.subr.bf16.mxu0 %v4651_v4 }
 0xa5d   : > { %v3108_v8 = vpop.permute.xlu1 %3107  ;;  %v3216_v14 = vpop.permute.xlu0 %3215 }
 0xa5e   : > { %v3113_v10 = vsel %vm1246_vm3, %v3108_v8, 0 }
 0xa61   : > { %v3218_v11 = vpop.permute.xlu1 %3217 }
 0xa62   : > { %4367 = vmatmul.mubr.msk.bf16.vlgmr.msra.gmra.mxu0 %vm1246_vm3, %v2755_v1  ;;  %v3223_v6 = vsel %vm1246_vm3, %v3218_v11, 0 }
 0xa63   : > { %4377 = vmatpush3.bf16.xpose.msra.mxu0 %v2891_v2  ;;  %4378 = vmatprep.mubr.msk.bf16.mxu0 %vm4652_vm1, %v4651_v4 }
 0xa64   : > { %4388 = vmatprep.subr.bf16.mxu0 %v4651_v4 }
 0xa6a   : > { %4379 = vmatmul.mubr.msk.bf16.vlgmr.msra.gmra.mxu0 %vm1246_vm3, %v2879_v57 }
 0xa6b   : > { %4389 = vmatpush3.bf16.xpose.msra.mxu0 %v3003_v5  ;;  %4390 = vmatprep.mubr.msk.bf16.mxu0 %vm4652_vm1, %v4651_v4 }
 0xa6c   : > { %4400 = vmatprep.subr.bf16.mxu0 %v4651_v4 }
 0xa72   : > { %4391 = vmatmul.mubr.msk.bf16.vlgmr.msra.gmra.mxu0 %vm1246_vm3, %v2996_v9 }
 0xa73   : > { %4401 = vmatpush3.bf16.xpose.msra.mxu0 %v3113_v10  ;;  %4402 = vmatprep.mubr.msk.bf16.mxu0 %vm4652_vm1, %v4651_v4 }
 0xa74   : > { %4412 = vmatprep.subr.bf16.mxu0 %v4651_v4 }
 0xa7a   : > { %4403 = vmatmul.mubr.msk.bf16.vlgmr.msra.gmra.mxu0 %vm1246_vm3, %v3106_v12 }
 0xa7b   : > { %4413 = vmatpush3.bf16.xpose.msra.mxu0 %v3223_v6  ;;  %4414 = vmatprep.mubr.msk.bf16.mxu0 %vm4652_vm1, %v4651_v4 }
 0xa7c   : > { %4424 = vmatprep.subr.bf16.mxu0 %v4651_v4 }
 0xa82   : > { %4415 = vmatmul.mubr.msk.bf16.vlgmr.msra.gmra.mxu0 %vm1246_vm3, %v3216_v14 }
 0xa83   : > { %4428 = vmatprep.mubr.msk.bf16.mxu0 %vm4652_vm1, %v4651_v4 }
 0xa9c   : > { %v2466_v16 = vpop.f32.mrf.mxu0 }
 0xa9d   : > { %v2467_v17 = vadd.f32 %v4054_v15, %v2466_v16 }
 0xa9e   : > { %v4332_v7 = vpop.f32.mrf.mxu0 }
 0xa9f   : > { %v2472_v18 = vsel %vm1246_vm3, %v2467_v17, -inf }
 0xaa0   : > { %v2469_v19 = vpop.f32.mrf.mxu0  ;;  %2473 = vmax.xlane.f32.xlu1 %v2472_v18 }
 0xaa2   : > { %v4333_v20 = vpop.f32.mrf.mxu0 }
 0xb0e   : > { %v2578_v21 = vpop.f32.mrf.mxu0 }
 0xb0f   : > { %v2579_v22 = vadd.f32 %v4054_v15, %v2578_v21 }
 0xb10   : > { %v4344_v13 = vpop.f32.mrf.mxu0 }
 0xb11   : > { %v2584_v23 = vsel %vm1246_vm3, %v2579_v22, -inf }
 0xb12   : > { %2585 = vmax.xlane.f32.xlu0 %v2584_v23  ;;  %v2581_v24 = vpop.f32.mrf.mxu0 }
 0xb14   : > { %v4345_v27 = vpop.f32.mrf.mxu0 }
 0xb1a   : > { %v2688_v28 = vpop.f32.mrf.mxu0 }
 0xb1b   : > { %v2689_v29 = vadd.f32 %v4054_v15, %v2688_v28 }
 0xb1c   : > { %v4356_v30 = vpop.f32.mrf.mxu0 }
 0xb1d   : > { %v2694_v31 = vsel %vm1246_vm3, %v2689_v29, -inf }
 0xb1e   : > { %2695 = vmax.xlane.f32.xlu0 %v2694_v31  ;;  %v2691_v32 = vpop.f32.mrf.mxu0 }
 0xb20   : > { %v4357_v26 = vpop.f32.mrf.mxu0 }
 0xb22   : > { %v2798_v34 = vpop.f32.mrf.mxu0 }
 0xb23   : > { %v2799_v35 = vadd.f32 %v4054_v15, %v2798_v34 }
 0xb24   : > { %v4368_v36 = vpop.f32.mrf.mxu0 }
 0xb25   : > { %v2804_v33 = vsel %vm1246_vm3, %v2799_v35, -inf }
 0xb26   : > { %v2801_v39 = vpop.f32.mrf.mxu0  ;;  %2805 = vmax.xlane.f32.xlu1 %v2804_v33 }
 0xb28   : > { %v4369_v40 = vpop.f32.mrf.mxu0 }
 0xb29   : > { %v2474_v1 = vpop.xlane.xlu1 %2473 }
 0xb2a   : > { %v2927_v41 = vpop.f32.mrf.mxu0  ;;  %v2475_v2 = vsub.f32 %v2467_v17, %v2474_v1 }
 0xb2b   : > { %v2928_v43 = vadd.f32 %v4063_v25, %v2927_v41 }
 0xb2c   : > { %v4380_v44 = vpop.f32.mrf.mxu0  ;;  %v2476_v3 = vmul.f32 1.442695, %v2475_v2 }
 0xb2d   : > { %v2933_v45 = vsel %vm1246_vm3, %v2928_v43, -inf }
 0xb2e   : > { %2934 = vmax.xlane.f32.xlu0 %v2933_v45  ;;  %v2930_v46 = vpop.f32.mrf.mxu0  ;;  %4587 = vpow2.f32 %v2476_v3 }
 0xb30   : > { %v4381_v47 = vpop.f32.mrf.mxu0 }
 0xb32   : > { %v3039_v48 = vpop.f32.mrf.mxu0 }
 0xb33   : > { %v5264_v49 = vadd.f32 %v4063_v25, %v3039_v48 }
 0xb34   : > { %v4392_v50 = vpop.f32.mrf.mxu0 }
 0xb35   : > { %v3045_v51 = vsel %vm1246_vm3, %v5264_v49, -inf }
 0xb36   : > { %3046 = vmax.xlane.f32.xlu1 %v3045_v51  ;;  %v3042_v52 = vpop.f32.mrf.mxu0 }
 0xb38   : > { %v4393_v53 = vpop.f32.mrf.mxu0 }
 0xb3a   : > { %v3149_v54 = vpop.f32.mrf.mxu0 }
 0xb3b   : > { %v3150_v55 = vadd.f32 %v4063_v25, %v3149_v54  ;;  %v5274_v9 = vpop.eup %4587 }
 0xb3c   : > { %v4404_v56 = vpop.f32.mrf.mxu0  ;;  %v2478_v10 = vsel %vm1246_vm3, %v5274_v9, 0.0 }
 0xb3d   : > { %v3155_v57 = vsel %vm1246_vm3, %v3150_v55, -inf }
 0xb3e   : > { %3156 = vmax.xlane.f32.xlu0 %v3155_v57  ;;  %v3152_v58 = vpop.f32.mrf.mxu0 }
 0xb40   : > { %v4405_v59 = vpop.f32.mrf.mxu0 }
 0xb42   : > { %v3259_v60 = vpop.f32.mrf.mxu0 }
 0xb43   : > { %v3260_v5 = vadd.f32 %v4063_v25, %v3259_v60 }
 0xb44   : > { %v4416_v61 = vpop.f32.mrf.mxu0 }
 0xb45   : > { %v3265_v8 = vsel %vm1246_vm3, %v3260_v5, -inf }
 0xb46   : > { %v3262_v62 = vpop.f32.mrf.mxu0 }
 0xb47   : > { %2596 = vrot.lane.b32.xlu1 %v5184_v42, %s4655_s27 }
 0xb48   : > { %v4417_v0 = vpop.f32.mrf.mxu0 }
 0xb54   : > { %2485 = vrot.lane.b32.xlu0 %v5184_v42, %s4654_s9 }
 0xb6b   : > { %3266 = vmax.xlane.f32.xlu1 %v3265_v8 }
 0xb73   : > { %2479 = vadd.xlane.f32.xlu0 %v2478_v10 }
 0xb7c   : > { %2706 = vrot.lane.b32.xlu1 %v5184_v42, %s4660_s3 }
 0xb9b   : > { %v2586_v11 = vpop.xlane.xlu0 %2585 }
 0xb9c   : > { %v2587_v12 = vsub.f32 %v2579_v22, %v2586_v11 }
 0xb9e   : > { %v2588_v6 = vmul.f32 1.442695, %v2587_v12 }
 0xba0   : > { %4589 = vpow2.f32 %v2588_v6 }
 0xba7   : > { %v2696_v14 = vpop.xlane.xlu0 %2695 }
 0xba8   : > { %v2697_v15 = vsub.f32 %v2689_v29, %v2696_v14 }
 0xbaa   : > { %v2698_v16 = vmul.f32 1.442695, %v2697_v15 }
 0xbac   : > { %4591 = vpow2.f32 %v2698_v16 }
 0xbad   : > { %v5280_v17 = vpop.eup %4589 }
 0xbae   : > { %v2590_v7 = vsel %vm1246_vm3, %v5280_v17, 0.0 }
 0xbaf   : > { %v2806_v18 = vpop.xlane.xlu1 %2805  ;;  %2591 = vadd.xlane.f32.xlu1 %v2590_v7 }
 0xbb0   : > { %v2807_v19 = vsub.f32 %v2799_v35, %v2806_v18 }
 0xbb2   : > { %v2808_v20 = vmul.f32 1.442695, %v2807_v19 }
 0xbb4   : > { %4593 = vpow2.f32 %v2808_v20 }
 0xbb7   : > { %v2935_v21 = vpop.xlane.xlu0 %2934 }
 0xbb8   : > { %v2936_v13 = vsub.f32 %v2928_v43, %v2935_v21 }
 0xbb9   : > { %v5284_v23 = vpop.eup %4591 }
 0xbba   : > { %v2937_v22 = vmul.f32 1.442695, %v2936_v13  ;;  %v2700_v24 = vsel %vm1246_vm3, %v5284_v23, 0.0 }
 0xbbb   : > { %2701 = vadd.xlane.f32.xlu0 %v2700_v24 }
 0xbbc   : > { %4595 = vpow2.f32 %v2937_v22 }
 0xbbf   : > { %v3047_v36 = vpop.xlane.xlu1 %3046 }
 0xbc0   : > { %v3048_v33 = vsub.f32 %v5264_v49, %v3047_v36 }
 0xbc1   : > { %v5288_v27 = vpop.eup %4593 }
 0xbc2   : > { %v2810_v28 = vsel %vm1246_vm3, %v5288_v27, 0.0  ;;  %v3049_v25 = vmul.f32 1.442695, %v3048_v33 }
 0xbc3   : > { %2811 = vadd.xlane.f32.xlu1 %v2810_v28  ;;  %v2597_v44 = vpop.permute.xlu1 %2596 }
 0xbc4   : > { %v2602_v53 = vsel %vm1310_vm4, %v2597_v44, 0 }
 0xbc7   : > { %v3157_v29 = vpop.xlane.xlu0 %3156 }
 0xbc8   : > { %v3158_v30 = vsub.f32 %v3150_v55, %v3157_v29 }
 0xbc9   : > { %v5292_v31 = vpop.eup %4595 }
 0xbca   : > { %v3159_v32 = vmul.f32 1.442695, %v3158_v30  ;;  %v2939_v26 = vsel %vm1246_vm3, %v5292_v31, 0.0 }
 0xbcb   : > { %v2486_v34 = vpop.permute.xlu0 %2485  ;;  %2940 = vadd.xlane.f32.xlu1 %v2939_v26 }
 0xbcc   : > { %4597 = vpow2.f32 %v3159_v32  ;;  %v2491_v35 = vsel %vm1310_vm4, %v2486_v34, 0 }
 0xbcd   : > { %4335 = vmatpush3.bf16.msra.mxu1 %v2491_v35  ;;  %4599 = vpow2.f32 %v3049_v25 }
 0xbce   : > { %4346 = vmatprep.subr.bf16.mxu1 %v4651_v4 }
 0xbd1   : > { %2816 = vrot.lane.b32.xlu0 %v5184_v42, %s4656_s21 }
 0xbd9   : > { %v5301_v39 = vpop.eup %4597 }
 0xbda   : > { %v3161_v40 = vsel %vm1246_vm3, %v5301_v39, 0.0  ;;  %v5305_v41 = vpop.eup %4599 }
 0xbdb   : > { %3162 = vadd.xlane.f32.xlu1 %v3161_v40  ;;  %v3051_v43 = vsel %vm1246_vm3, %v5305_v41, 0.0 }
 0xbf0   : > { %3052 = vadd.xlane.f32.xlu0 %v3051_v43 }
 0xbf4   : > { %v3267_v45 = vpop.xlane.xlu1 %3266 }
 0xbf5   : > { %v3268_v42 = vsub.f32 %v3260_v5, %v3267_v45 }
 0xbf7   : > { %v3269_v46 = vmul.f32 1.442695, %v3268_v42 }
 0xbf8   : > { %v2707_v54 = vpop.permute.xlu1 %2706 }
 0xbf9   : > { %4601 = vpow2.f32 %v3269_v46  ;;  %v2712_v60 = vsel %vm1310_vm4, %v2707_v54, 0 }
 0xbfc   : > { %v2480_v47 = vpop.xlane.xlu0 %2479 }
 0xbfd   : > { %4603 = vrcp.f32 %v2480_v47 }
 0xc06   : > { %v5309_v48 = vpop.eup %4601  ;;  %3057 = vrot.lane.b32.xlu0 %v5209_v63, %s4655_s27 }
 0xc07   : > { %v3271_v49 = vsel %vm1246_vm3, %v5309_v48, 0.0 }
 0xc08   : > { %3272 = vadd.xlane.f32.xlu1 %v3271_v49 }
 0xc0a   : > { %v4604_v50 = vpop.eup %4603  ;;  %3167 = vrot.lane.b32.xlu0 %v5209_v63, %s4660_s3  ;;  %s5549_s3 = scalar_lea.vmem %s5478_s13, %s4814_s6 }
 0xc0b   : > { %v2482_v51 = vmul.f32 %v4604_v50, %v5274_v9 }
 0xc0d   : > { %v2483_v52 = vpack.c.bf16 %v2482_v51, %v2482_v51 }
 0xc0e   : > { %3277 = vrot.lane.b32.xlu0 %v5209_v63, %s4656_s21 }
 0xc0f   : > { %4337 = vmatmul.mubr.msk.bf16.vlgmr.msra.gmra.mxu1 %vm1246_vm3, %v2483_v52 }
 0xc10   : > { %4347 = vmatpush3.bf16.msra.mxu1 %v2602_v53  ;;  %4348 = vmatprep.mubr.msk.bf16.mxu1 %vm4652_vm1, %v4651_v4 }
 0xc11   : > { %4358 = vmatprep.subr.bf16.mxu1 %v4651_v4 }
 0xc19   : > { %2946 = vrot.lane.b32.xlu1 %v5209_v63, %s4654_s9  ;;  %s5548_s9 = sld [smem:[#allocation8_spill]] }
 0xc1f   : > { %v4539_v54 = vld [vmem:[%s5548_s9 + $0x8] sm:$0xff]  }
 0xc20   : > { %4425 = vmatpush3.bf16.msra.mxu0 %v4539_v54 }
 0xc21   : > { %4426 = vmatprep.subr.bf16.mxu0 %v4651_v4 }
 0xc38   : > { %v2592_v55 = vpop.xlane.xlu1 %2591 }
 0xc39   : > { %4605 = vrcp.f32 %v2592_v55 }
 0xc44   : > { %v2702_v56 = vpop.xlane.xlu0 %2701 }
 0xc45   : > { %4607 = vrcp.f32 %v2702_v56 }
 0xc46   : > { %v4606_v57 = vpop.eup %4605 }
 0xc47   : > { %v2594_v58 = vmul.f32 %v4606_v57, %v5280_v17 }
 0xc48   : > { %v2817_v0 = vpop.permute.xlu0 %2816 }
 0xc49   : > { %v2595_v59 = vpack.c.bf16 %v2594_v58, %v2594_v58  ;;  %v2822_v2 = vsel %vm1310_vm4, %v2817_v0, 0 }
 0xc4b   : > { %4349 = vmatmul.mubr.msk.bf16.vlgmr.msra.gmra.mxu1 %vm1246_vm3, %v2595_v59  ;;  %v4540_v59 = vld [vmem:[%s5548_s9] sm:$0xff]  }
 0xc4c   : > { %4359 = vmatpush3.bf16.msra.mxu1 %v2712_v60  ;;  %v2812_v61 = vpop.xlane.xlu1 %2811  ;;  %4360 = vmatprep.mubr.msk.bf16.mxu1 %vm4652_vm1, %v4651_v4 }
 0xc4d   : > { %4609 = vrcp.f32 %v2812_v61  ;;  %4370 = vmatprep.subr.bf16.mxu1 %v4651_v4  ;;  %4427 = vmatpush3.bf16.msra.mxu0 %v4540_v59 }
 0xc4e   : > { %4440 = vmatprep.subr.bf16.mxu0 %v4651_v4 }
 0xc52   : > { %v4608_v63 = vpop.eup %4607 }
 0xc53   : > { %v2704_v62 = vmul.f32 %v4608_v63, %v5284_v23 }
 0xc54   : > { %v2941_v9 = vpop.xlane.xlu1 %2940 }
 0xc55   : > { %v2705_v1 = vpack.c.bf16 %v2704_v62, %v2704_v62  ;;  %4611 = vrcp.f32 %v2941_v9 }
 0xc57   : > { %4361 = vmatmul.mubr.msk.bf16.vlgmr.msra.gmra.mxu1 %vm1246_vm3, %v2705_v1 }
 0xc58   : > { %4371 = vmatpush3.bf16.msra.mxu1 %v2822_v2  ;;  %4372 = vmatprep.mubr.msk.bf16.mxu1 %vm4652_vm1, %v4651_v4 }
 0xc59   : > { %4382 = vmatprep.subr.bf16.mxu1 %v4651_v4 }
 0xc5a   : > { %v4610_v3 = vpop.eup %4609 }
 0xc5b   : > { %v2814_v5 = vmul.f32 %v4610_v3, %v5288_v27 }
 0xc5d   : > { %v2815_v8 = vpack.c.bf16 %v2814_v5, %v2814_v5 }
 0xc5f   : > { %4373 = vmatmul.mubr.msk.bf16.vlgmr.msra.gmra.mxu1 %vm1246_vm3, %v2815_v8 }
 0xc60   : > { %4384 = vmatprep.mubr.msk.bf16.mxu1 %vm4652_vm1, %v4651_v4 }
 0xc62   : > { %v4612_v12 = vpop.eup %4611 }
 0xc63   : > { %v2943_v14 = vmul.f32 %v4612_v12, %v5292_v31 }
 0xc64   : > { %v3163_v11 = vpop.xlane.xlu1 %3162 }
 0xc65   : > { %v2944_v7 = vpack.c.bf16 %v2943_v14, %v2943_v14 }
 0xc79   : > { %v3053_v10 = vpop.xlane.xlu0 %3052 }
 0xc7a   : > { %4613 = vrcp.f32 %v3053_v10 }
 0xc7b   : > { %4615 = vrcp.f32 %v3163_v11 }
 0xc7d   : > { %v3058_v17 = vpop.permute.xlu0 %3057 }
 0xc7e   : > { %v3063_v19 = vsel %vm1310_vm4, %v3058_v17, 0 }
 0xc81   : > { %v3168_v21 = vpop.permute.xlu0 %3167 }
 0xc82   : > { %v3173_v22 = vsel %vm1310_vm4, %v3168_v21, 0 }
 0xc85   : > { %v3278_v27 = vpop.permute.xlu0 %3277 }
 0xc86   : > { %v3283_v30 = vsel %vm1310_vm4, %v3278_v27, 0 }
 0xc87   : > { %v4614_v18 = vpop.eup %4613 }
 0xc88   : > { %v3055_v20 = vmul.f32 %v4614_v18, %v5305_v41  ;;  %v4616_v23 = vpop.eup %4615 }
 0xc89   : > { %v3165_v24 = vmul.f32 %v4616_v23, %v5301_v39 }
 0xc8a   : > { %v3056_v13 = vpack.c.bf16 %v3055_v20, %v3055_v20 }
 0xc8b   : > { %v3166_v28 = vpack.c.bf16 %v3165_v24, %v3165_v24 }
 0xc91   : > { %v3273_v6 = vpop.xlane.xlu1 %3272 }
 0xc92   : > { %4617 = vrcp.f32 %v3273_v6 }
 0xc95   : > { %v2947_v15 = vpop.permute.xlu1 %2946 }
 0xc96   : > { %v2952_v16 = vsel %vm1310_vm4, %v2947_v15, 0 }
 0xc97   : > { %4383 = vmatpush3.bf16.msra.mxu1 %v2952_v16 }
 0xc98   : > { %4394 = vmatprep.subr.bf16.mxu1 %v4651_v4 }
 0xc9a   : > { %4385 = vmatmul.mubr.msk.bf16.vlgmr.msra.gmra.mxu1 %vm1246_vm3, %v2944_v7 }
 0xc9b   : > { %4395 = vmatpush3.bf16.msra.mxu1 %v3063_v19  ;;  %4396 = vmatprep.mubr.msk.bf16.mxu1 %vm4652_vm1, %v4651_v4 }
 0xc9c   : > { %4406 = vmatprep.subr.bf16.mxu1 %v4651_v4 }
 0xc9f   : > { %v4618_v29 = vpop.eup %4617 }
 0xca0   : > { %v3275_v31 = vmul.f32 %v4618_v29, %v5309_v48 }
 0xca2   : > { %4397 = vmatmul.mubr.msk.bf16.vlgmr.msra.gmra.mxu1 %vm1246_vm3, %v3056_v13  ;;  %v3276_v32 = vpack.c.bf16 %v3275_v31, %v3275_v31 }
 0xca3   : > { %4407 = vmatpush3.bf16.msra.mxu1 %v3173_v22  ;;  %4408 = vmatprep.mubr.msk.bf16.mxu1 %vm4652_vm1, %v4651_v4  ;;  %v4072_v22 = vld [vmem:[%s5549_s3] ss:$0 sm:$0xff]  ;;  %s5556_s3 = sld [smem:[#allocation3_spill]] }
 0xca4   : > { %4418 = vmatprep.subr.bf16.mxu1 %v4651_v4 }
 0xca9   : > { %p4093_p6 = scmp.ne.s32.totalorder %s5556_s3, 1 }
 0xcaa   : > { %4409 = vmatmul.mubr.msk.bf16.vlgmr.msra.gmra.mxu1 %vm1246_vm3, %v3166_v28 }
 0xcab   : > { %4419 = vmatpush3.bf16.msra.mxu1 %v3283_v30  ;;  %4420 = vmatprep.mubr.msk.bf16.mxu1 %vm4652_vm1, %v4651_v4 }
 0xcac   : > { %4432 = vmatprep.subr.bf16.mxu1 %v4651_v4 }
 0xcb2   : > { %4421 = vmatmul.mubr.msk.bf16.vlgmr.msra.gmra.mxu1 %vm1246_vm3, %v3276_v32 }
 0xcb3   : > { %4436 = vmatprep.mubr.msk.bf16.mxu1 %vm4652_vm1, %v4651_v4 }
 0xccf   : > { %v2527_v26 = vpop.f32.mrf.mxu1 }
 0xcd1   : > { %v4338_v34 = vpop.f32.mrf.mxu1 }
 0xcd3   : > { %v2530_v35 = vpop.f32.mrf.mxu1 }
 0xcd5   : > { %v4339_v36 = vpop.f32.mrf.mxu1 }
 0xd0b   : > { %v2638_v33 = vpop.f32.mrf.mxu1 }
 0xd0d   : > { %v4350_v39 = vpop.f32.mrf.mxu1 }
 0xd0f   : > { %v2641_v40 = vpop.f32.mrf.mxu1 }
 0xd11   : > { %v4351_v25 = vpop.f32.mrf.mxu1 }
 0xd17   : > { %v2748_v41 = vpop.f32.mrf.mxu1 }
 0xd19   : > { %v4362_v43 = vpop.f32.mrf.mxu1 }
 0xd1b   : > { %v2751_v44 = vpop.f32.mrf.mxu1 }
 0xd1d   : > { %v4363_v45 = vpop.f32.mrf.mxu1 }
 0xd1e   : > { %v4541_v45 = vld [vmem:[%s4889_s8 + $0x8] sm:$0xff]  }
 0xd1f   : > { %v2858_v42 = vpop.f32.mrf.mxu1  ;;  %4433 = vmatpush3.bf16.msra.mxu1 %v4541_v45 }
 0xd20   : > { %4434 = vmatprep.subr.bf16.mxu1 %v4651_v4 }
 0xd21   : > { %v4374_v46 = vpop.f32.mrf.mxu1 }
 0xd22   : > { %v4543_v46 = vld [vmem:[%s4899_s17 + $0x38] sm:$0xff]  }
 0xd23   : > { %v2861_v47 = vpop.f32.mrf.mxu1 }
 0xd24   : > { %v4544_v47 = vld [vmem:[%s4899_s17 + $0x30] sm:$0xff]  }
 0xd25   : > { %v4375_v48 = vpop.f32.mrf.mxu1 }
 0xd26   : > { %v4545_v48 = vld [vmem:[%s4899_s17 + $0x28] sm:$0xff]  }
 0xd5a   : > { %v2988_v49 = vpop.f32.mrf.mxu1 }
 0xd5c   : > { %v4386_v50 = vpop.f32.mrf.mxu1 }
 0xd5d   : > { %v4547_v50 = vld [vmem:[%s4899_s17 + $0x18] sm:$0xff]  }
 0xd5e   : > { %v2991_v51 = vpop.f32.mrf.mxu1 }
 0xd60   : > { %v4387_v52 = vpop.f32.mrf.mxu1 }
 0xd62   : > { %v3099_v53 = vpop.f32.mrf.mxu1 }
 0xd63   : > { %v4515_v55 = vpack.i.bf16 %v3099_v53, %v2638_v33 }
 0xd64   : > { %v4398_v56 = vpop.f32.mrf.mxu1 }
 0xd65   : > { %4516 = vrot.lane.b32.xlu1 %v4515_v55, %s4664_s23 }
 0xd66   : > { %v3102_v57 = vpop.f32.mrf.mxu1 }
 0xd68   : > { %v4399_v58 = vpop.f32.mrf.mxu1 }
 0xd6a   : > { %v3209_v60 = vpop.f32.mrf.mxu1 }
 0xd6b   : > { %v4520_v61 = vpack.i.bf16 %v3209_v60, %v2748_v41 }
 0xd6c   : > { %v4410_v63 = vpop.f32.mrf.mxu1 }
 0xd6d   : > { %4521 = vrot.lane.b32.xlu0 %v4520_v61, %s4665_s10  ;;  %s5550_s10 = scalar_lea.vmem %s5481_s16, %s4814_s6 }
 0xd6e   : > { %v3212_v62 = vpop.f32.mrf.mxu1  ;;  %v4076_v59 = vld [vmem:[%s5550_s10] ss:$0 sm:$0xff] }
 0xd6f   : > { %v4077_v62 = vld [vmem:[%s5552_s24] ss:$0 sm:$0xff] }
 0xd70   : > { %v4411_v0 = vpop.f32.mrf.mxu1 }
 0xd72   : > { %v3319_v1 = vpop.f32.mrf.mxu1 }
 0xd73   : > { %v4525_v2 = vpack.i.bf16 %v3319_v1, %v2858_v42  ;;  %v4542_v42 = vld [vmem:[%s4889_s8] sm:$0xff]  }
 0xd74   : > { %v4422_v3 = vpop.f32.mrf.mxu1  ;;  %4435 = vmatpush3.bf16.msra.mxu1 %v4542_v42 }
 0xd75   : > { %4526 = vrot.lane.b32.xlu1 %v4525_v2, %s4666_s4 }
 0xd76   : > { %v3322_v5 = vpop.f32.mrf.mxu1 }
 0xd77   : > { %v4548_v5 = vld [vmem:[%s4899_s17 + $0x10] sm:$0xff]  }
 0xd78   : > { %v4423_v8 = vpop.f32.mrf.mxu1 }
 0xd79   : > { %v4549_v8 = vld [vmem:[%s4899_s17 + $0x8] sm:$0xff]  }
 0xdd7   : > { %v4517_v9 = vpop.permute.xlu1 %4516 }
 0xdd8   : > { %v4519_v11 = vunpack.i.h.bf16 %v4517_v9  ;;  %v4518_v12 = vunpack.i.l.bf16 %v4517_v9  ;;  %v4550_v9 = vld [vmem:[%s4899_s17] sm:$0xff]  }
 0xdda   : > { %v3337_v16 = vsel %vm1246_vm3, %v2988_v49, %v4519_v11  ;;  %v2876_v17 = vsel %vm1246_vm3, %v2527_v26, %v4518_v12  ;;  %v4546_v49 = vld [vmem:[%s4899_s17 + $0x20] sm:$0xff]  }
 0xddf   : > { %v4522_v10 = vpop.permute.xlu0 %4521 }
 0xde0   : > { %v4524_v6 = vunpack.i.h.bf16 %v4522_v10  ;;  %v4523_v14 = vunpack.i.l.bf16 %v4522_v10  ;;  %v4078_v10 = vld [vmem:[%s1120_s1] ss:$0 sm:$0xff] }
 0xde2   : > { %v3338_v19 = vsel %vm1697_vm6, %v3337_v16, %v4524_v6  ;;  %v2877_v20 = vsel %vm1697_vm6, %v2876_v17, %v4523_v14 }
 0xde7   : > { %v4527_v15 = vpop.permute.xlu1 %4526 }
 0xde8   : > { %v4529_v7 = vunpack.i.h.bf16 %v4527_v15  ;;  %v4528_v18 = vunpack.i.l.bf16 %v4527_v15 }
 0xdea   : > { %v3339_v21 = vsel %vm1699_vm7, %v3338_v19, %v4529_v7  ;;  %v2878_v13 = vsel %vm1699_vm7, %v2877_v20, %v4528_v18 }
 0xdeb   : > { %v3340_v23 = vpack.c.bf16 %v3339_v21, %v2878_v13 }
 0xded   : > { %4429 = vmatmul.mubr.msk.bf16.vlgmr.msra.gmra.mxu0 %vm1185_vm2, %v3340_v23 }
 0xdee   : > { %4456 = vmatprep.mubr.msk.bf16.mxu0 %vm4652_vm1, %v4651_v4  ;;  %4441 = vmatpush3.bf16.msra.mxu0 %v4543_v46 }
 0xdef   : > { %4442 = vmatprep.subr.bf16.mxu0 %v4651_v4 }
 0xdf2   : > { %4443 = vmatpush3.bf16.msra.mxu0 %v4544_v47  ;;  %v4092_v47 = vld [vmem:[%s1112_s25] ss:$0 sm:$0xff] }
 0xdf3   : > { %4444 = vmatprep.subr.bf16.mxu0 %v4651_v4 }
 0xdf6   : > { %4445 = vmatpush3.bf16.msra.mxu0 %v4545_v48 }
 0xdf7   : > { %4446 = vmatprep.subr.bf16.mxu0 %v4651_v4 }
 0xdfa   : > { %4447 = vmatpush3.bf16.msra.mxu0 %v4546_v49 }
 0xdfb   : > { %4448 = vmatprep.subr.bf16.mxu0 %v4651_v4 }
 0xdfe   : > { %4449 = vmatpush3.bf16.msra.mxu0 %v4547_v50 }
 0xdff   : > { %4450 = vmatprep.subr.bf16.mxu0 %v4651_v4 }
 0xe02   : > { %4451 = vmatpush3.bf16.msra.mxu0 %v4548_v5 }
 0xe03   : > { %4452 = vmatprep.subr.bf16.mxu0 %v4651_v4 }
 0xe06   : > { %4453 = vmatpush3.bf16.msra.mxu0 %v4549_v8 }
 0xe07   : > { %4454 = vmatprep.subr.bf16.mxu0 %v4651_v4  ;;  %v4082_v4 = vld [vmem:[%s1128_s30] ss:$0 sm:$0xff]  ;;  %s5555_s30 = scalar_lea.vmem %s5483_s18, %s4814_s6  ;;  %s5557_s6 = sld [smem:[#allocation25_spill]] (!%p4093_p6) }
 0xe08   : > { %v4091_v42 = vld [vmem:[%s5555_s30] ss:$0 sm:$0xff] }
 0xe0a   : > { %4455 = vmatpush3.bf16.msra.mxu0 %v4550_v9 }
 0xead   : > { %v3396_v24 = vpop.f32.mrf.mxu0 }
 0xeae   : > { %v3397_v27 = vadd.f32 %v4072_v22, %v3396_v24 }
 0xeaf   : > { %v4430_v28 = vpop.f32.mrf.mxu0 }
 0xeb0   : > { %v3403_v29 = vadd.f32 %v3397_v27, %v5170_v37 }
 0xeb1   : > { %v3399_v30 = vpop.f32.mrf.mxu0 }
 0xeb2   : > { %v3400_v31 = vadd.f32 %v4072_v22, %v3399_v30  ;;  %v3407_v32 = vsel %vm1185_vm2, %v3403_v29, 0.0 }
 0xeb3   : > { %3408 = vadd.xlane.f32.xlu0 %v3407_v32  ;;  %v4431_v26 = vpop.f32.mrf.mxu0 }
 0xeb4   : > { %v3404_v34 = vadd.f32 %v3400_v31, %v5172_v38 }
 0xeb6   : > { %v3410_v35 = vsel %vm1185_vm2, %v3404_v34, 0.0 }
 0xeb7   : > { %3411 = vadd.xlane.f32.xlu1 %v3410_v35 }
 0xf3c   : > { %v3409_v36 = vpop.xlane.xlu0 %3408 }
 0xf3d   : > { %v3413_v33 = vmul.f32 0.03125, %v3409_v36 }
 0xf3f   : > { %v3415_v39 = vsub.f32 %v3403_v29, %v3413_v33 }
 0xf40   : > { %v3412_v40 = vpop.xlane.xlu1 %3411 }
 0xf41   : > { %v3414_v37 = vmul.f32 0.03125, %v3412_v40  ;;  %v3417_v25 = vmul.f32 %v3415_v39, %v3415_v39 }
 0xf43   : > { %v3416_v41 = vsub.f32 %v3404_v34, %v3414_v37  ;;  %v3419_v43 = vsel %vm1185_vm2, %v3417_v25, 0.0 }
 0xf44   : > { %3420 = vadd.xlane.f32.xlu0 %v3419_v43 }
 0xf45   : > { %v3418_v44 = vmul.f32 %v3416_v41, %v3416_v41 }
 0xf47   : > { %v3422_v38 = vsel %vm1185_vm2, %v3418_v44, 0.0 }
 0xf48   : > { %3423 = vadd.xlane.f32.xlu0 %v3422_v38 }
 0xfcd   : > { %v3421_v51 = vpop.xlane.xlu0 %3420 }
 0xfce   : > { %v3425_v52 = vmul.f32 0.03125, %v3421_v51 }
 0xfd0   : > { %v3427_v53 = vadd.f32 1e-05, %v3425_v52 }
 0xfd1   : > { %v3424_v54 = vpop.xlane.xlu0 %3423 }
 0xfd2   : > { %4619 = vrsqrt.f32 %v3427_v53  ;;  %v3426_v55 = vmul.f32 0.03125, %v3424_v54 }
 0xfd4   : > { %v3428_v56 = vadd.f32 1e-05, %v3426_v55 }
 0xfd6   : > { %4621 = vrsqrt.f32 %v3428_v56 }
 0xfdf   : > { %v4620_v57 = vpop.eup %4619 }
 0xfe0   : > { %v3431_v58 = vmul.f32 %v4620_v57, %v3415_v39 }
 0xfe2   : > { %v3439_v63 = vmul.f32 %v4076_v59, %v3431_v58 }
 0xfe3   : > { %v4622_v60 = vpop.eup %4621 }
 0xfe4   : > { %v3432_v61 = vmul.f32 %v4622_v60, %v3416_v41  ;;  %v3447_v1 = vadd.f32 %v4077_v62, %v3439_v63 }
 0xfe6   : > { %v3440_v0 = vmul.f32 %v4076_v59, %v3432_v61 }
 0xfe8   : > { %v3448_v2 = vadd.f32 %v4077_v62, %v3440_v0 }
 0xfea   : > { %v3449_v3 = vpack.c.bf16 %v3448_v2, %v3447_v1 }
 0xfec   : > { %4437 = vmatmul.mubr.msk.bf16.vlgmr.msra.gmra.mxu1 %vm1185_vm2, %v3449_v3 }
0x10ac   : > { %v3510_v11 = vpop.f32.mrf.mxu1 }
0x10ad   : > { %v3511_v6 = vadd.f32 %v4078_v10, %v3510_v11 }
0x10ae   : > { %v4438_v12 = vpop.f32.mrf.mxu1 }
0x10af   : > { %v3517_v17 = vmax.f32 %v3511_v6, 0.0 }
0x10b0   : > { %v3513_v14 = vpop.f32.mrf.mxu1 }
0x10b1   : > { %v3514_v15 = vadd.f32 %v4078_v10, %v3513_v14 }
0x10b2   : > { %v4439_v16 = vpop.f32.mrf.mxu1 }
0x10b3   : > { %v3518_v7 = vmax.f32 %v3514_v15, 0.0 }
0x10b5   : > { %v3519_v18 = vpack.c.bf16 %v3518_v7, %v3517_v17 }
0x10b7   : > { %4457 = vmatmul.mubr.bf16.vlgmr.msra.gmra.mxu0 %v3519_v18 }
0x1177   : > { %v3625_v19 = vpop.f32.mrf.mxu0 }
0x1178   : > { %v3626_v20 = vadd.f32 %v4082_v4, %v3625_v19 }
0x1179   : > { %v4458_v21 = vpop.f32.mrf.mxu0 }
0x117a   : > { %v3632_v13 = vadd.f32 %v3626_v20, %v3447_v1 }
0x117b   : > { %v3628_v23 = vpop.f32.mrf.mxu0 }
0x117c   : > { %v3629_v22 = vadd.f32 %v4082_v4, %v3628_v23  ;;  %v3636_v24 = vsel %vm1185_vm2, %v3632_v13, 0.0 }
0x117d   : > { %3637 = vadd.xlane.f32.xlu1 %v3636_v24  ;;  %v4459_v27 = vpop.f32.mrf.mxu0 }
0x117e   : > { %v3633_v28 = vadd.f32 %v3629_v22, %v3448_v2 }
0x1180   : > { %v3639_v29 = vsel %vm1185_vm2, %v3633_v28, 0.0 }
0x1181   : > { %3640 = vadd.xlane.f32.xlu0 %v3639_v29 }
0x1206   : > { %v3638_v30 = vpop.xlane.xlu1 %3637 }
0x1207   : > { %v3642_v31 = vmul.f32 0.03125, %v3638_v30 }
0x1209   : > { %v3644_v32 = vsub.f32 %v3632_v13, %v3642_v31 }
0x120a   : > { %v3641_v26 = vpop.xlane.xlu0 %3640 }
0x120b   : > { %v3643_v34 = vmul.f32 0.03125, %v3641_v26  ;;  %v3646_v35 = vmul.f32 %v3644_v32, %v3644_v32 }
0x120d   : > { %v3645_v36 = vsub.f32 %v3633_v28, %v3643_v34  ;;  %v3648_v33 = vsel %vm1185_vm2, %v3646_v35, 0.0 }
0x120e   : > { %3649 = vadd.xlane.f32.xlu1 %v3648_v33 }
0x120f   : > { %v3647_v39 = vmul.f32 %v3645_v36, %v3645_v36 }
0x1211   : > { %v3651_v40 = vsel %vm1185_vm2, %v3647_v39, 0.0 }
0x1212   : > { %3652 = vadd.xlane.f32.xlu0 %v3651_v40 }
0x1297   : > { %v3650_v37 = vpop.xlane.xlu1 %3649 }
0x1298   : > { %v3654_v25 = vmul.f32 0.03125, %v3650_v37 }
0x129a   : > { %v3656_v41 = vadd.f32 1e-05, %v3654_v25 }
0x129b   : > { %v3653_v43 = vpop.xlane.xlu0 %3652 }
0x129c   : > { %4623 = vrsqrt.f32 %v3656_v41  ;;  %v3655_v44 = vmul.f32 0.03125, %v3653_v43 }
0x129e   : > { %v3657_v38 = vadd.f32 1e-05, %v3655_v44 }
0x12a0   : > { %4625 = vrsqrt.f32 %v3657_v38 }
0x12a9   : > { %v4624_v45 = vpop.eup %4623 }
0x12aa   : > { %v3660_v46 = vmul.f32 %v4624_v45, %v3644_v32 }
0x12ac   : > { %v3668_v48 = vmul.f32 %v4091_v42, %v3660_v46 }
0x12ad   : > { %v4626_v49 = vpop.eup %4625 }
0x12ae   : > { %v3676_v50 = vadd.f32 %v4092_v47, %v3668_v48  ;;  %v3661_v51 = vmul.f32 %v4626_v49, %v3645_v36 }
0x12b0   : > { %3678 = vst.msk [vmem:[#allocation2] sm:$0xff] %vm1185_vm2, %v3676_v50  ;;  %v3669_v52 = vmul.f32 %v4091_v42, %v3661_v51  ;;  %3683 = sbr.rel (%p4093_p6) target bundleno = 4792 (0x12b8), region = 124 }
0x12b2   : > { %v3677_v53 = vadd.f32 %v4092_v47, %v3669_v52 }
0x12b4   : > { %3679 = vst.msk [vmem:[#allocation2 + $0x8] sm:$0xff] %vm1185_vm2, %v3677_v53 }
0x12b5   : > { %v3684_v54 = vpack.c.bf16 %v3676_v50, %v3676_v50  ;;  %vm3686_vm8 = vcmask 257024   ;;  %v3685_v55 = vpack.c.bf16 %v3677_v53, %v3677_v53 }
0x12b7   : > { %3687 = vst.msk [vmem:[%s5557_s6] sm:$0xf] %vm3686_vm8, %v3684_v54  ;;  %3688 = vst.msk [vmem:[%s5557_s6 + $0x4] sm:$0xf] %vm3686_vm8, %v3685_v55 }
0x12b8 PF: > { %s5558_s4 = sld [smem:[#allocation5_spill]] }
0x12b9   : > { %s5559_s5 = sld [smem:[#allocation4_spill]] }
0x12ba   : > { %s5560_s26 = sld [smem:[#allocation6_spill]] }
0x12be   : > { %s34_s27 = sadd.s32 1, %s5558_s4  }
0x12bf   : > { %p31_p7 = scmp.ge.s32.totalorder %s34_s27, 4  }
0x12c1   :  { %33 = sbr.rel (!%p31_p7) target bundleno = 18 (0x12), region = 223 }

</bundles_post_ra>
